<compile_context>
chip_gen: v6e
topology: v6e:2x2x1
jax: 0.10.0
libtpu: 0.0.40
codegen_flags: <defaults>
</compile_context>

<pallas_src>
import jax
import jax.numpy as jnp
import numpy as np
from jax import lax
from jax.experimental import pallas as pl
from jax.experimental.pallas import tpu as pltpu


def _round_up(x, m):
    return ((x + m - 1) // m) * m


def _fold_bn(gamma, beta, mean, var, eps=1e-5):
    scale = gamma / jnp.sqrt(var + eps)
    bias = beta - mean * scale
    return scale, bias


def _basic_block_kernel(x_ref, w1_ref, b1_ref, w2_ref, b2_ref, o_ref,
                        xpad_ref, midpad_ref):
    """Fused BasicBlock for one image (channels already padded to Cp).

    x_ref:    (1, H, W, Cp)   bf16  input
    w1_ref:   (3, 3*Cp, Cp)   bf16  conv1 weights (BN1 scale folded); dx-major,
                                    contraction dim laid out as (dy, ci)
    b1_ref:   (1, Cp)         f32   BN1 folded bias
    w2_ref:   (3, 3*Cp, Cp)   bf16  conv2 weights (BN2 scale folded)
    b2_ref:   (1, Cp)         f32   BN2 folded bias
    o_ref:    (1, H, W, Cp)   f32   output
    xpad_ref / midpad_ref: (H+2, W+2, Cp) bf16 VMEM scratch (spatially padded planes)
    """
    _, H, W, Cp = o_ref.shape
    K3 = 3 * Cp

    def zero_halo(ref):
        # Zero only the halo ring; the interior is fully overwritten every step.
        # INVARIANT: if row-tiling is ever added, the full interior of both planes must
        # still be overwritten (or the halo re-zeroed) before the shifted reads below.
        zrow = jnp.zeros((1, W + 2, Cp), ref.dtype)
        zcol = jnp.zeros((H + 2, 1, Cp), ref.dtype)
        ref[0:1, :, :] = zrow
        ref[H + 1:H + 2, :, :] = zrow
        ref[:, 0:1, :] = zcol
        ref[:, W + 1:W + 2, :] = zcol

    zero_halo(xpad_ref)
    zero_halo(midpad_ref)

    # Padded input plane (already bf16, the MXU operand dtype): interior only.
    xpad_ref[1:H + 1, 1:W + 1, :] = x_ref[0]

    def conv3x3(plane_ref, w_ref):
        # 3 matmuls, one per dx tap, each (H*W, 3*Cp) x (3*Cp, Cp):
        # one dx-shifted view per tap; the 3 dy shifts are free major-axis slices of
        # that view, stacked along the contraction dim to fill the MXU depth.
        acc = None
        for dx in range(3):
            shifted = plane_ref[:, dx:dx + W, :]                    # (H+2, W, Cp) bf16
            cat = jnp.concatenate(
                [shifted[0:H], shifted[1:H + 1], shifted[2:H + 2]], axis=-1)
            d = jnp.dot(cat.reshape(H * W, K3), w_ref[dx],
                        preferred_element_type=jnp.float32)         # (H*W, Cp) f32
            acc = d if acc is None else acc + d
        return acc

    # conv1 (BN1 scale folded) + bias + ReLU -> padded bf16 VMEM plane.
    y1 = jnp.maximum(conv3x3(xpad_ref, w1_ref) + b1_ref[0], 0.0)
    midpad_ref[1:H + 1, 1:W + 1, :] = y1.reshape(H, W, Cp).astype(midpad_ref.dtype)

    # conv2 (BN2 scale folded) + bias + residual + ReLU -> output.
    # Re-read x_ref here for the residual (not kept live across both convs).
    y2 = conv3x3(midpad_ref, w2_ref) + b2_ref[0]
    res = x_ref[0].astype(jnp.float32).reshape(H * W, Cp)
    o_ref[0] = jnp.maximum(y2 + res, 0.0).reshape(H, W, Cp).astype(o_ref.dtype)


def basic_block_forward(x_nchw, params, eps=1e-5):
    """BasicBlock forward. x_nchw: (N, C, H, W) -> (N, C, H, W)."""
    x = jnp.transpose(x_nchw, (0, 2, 3, 1)).astype(jnp.float32)   # NHWC
    N, H, W, C = x.shape
    assert params["w1"].shape[2] == C and params["w1"].shape[3] == C, \
        "downsample=None / stride=1 path requires in_channels == out_channels"
    Cp = _round_up(C, 128)                                        # lane-dense channels

    # Fold BN (inference / running stats); fold the scale into the conv weights so the
    # in-kernel epilogue is just bias + ReLU (+ residual).
    s1, b1 = _fold_bn(params["g1"], params["b1"], params["m1"], params["v1"], eps)
    s2, b2 = _fold_bn(params["g2"], params["b2"], params["m2"], params["v2"], eps)

    def prep_w(w, s):
        # (3,3,C,C) HWIO (dy, dx, ci, co): fold BN scale over co, zero-pad channels,
        # then lay out as (dx, dy*Cp + ci, co) so the kernel contracts over (dy, ci)
        # with K = 3*Cp per dx tap.
        w = w * s[None, None, None, :]
        w = jnp.pad(w, ((0, 0), (0, 0), (0, Cp - C), (0, Cp - C)))   # (3,3,Cp,Cp)
        w = jnp.transpose(w, (1, 0, 2, 3)).reshape(3, 3 * Cp, Cp)    # (dx, dy*Cp+ci, co)
        return w.astype(jnp.bfloat16)

    w1p = prep_w(params["w1"], s1)
    w2p = prep_w(params["w2"], s2)
    b1p = jnp.pad(b1, (0, Cp - C)).reshape(1, Cp).astype(jnp.float32)
    b2p = jnp.pad(b2, (0, Cp - C)).reshape(1, Cp).astype(jnp.float32)

    # Channel padding is a no-op when C is already a multiple of 128 (the common case
    # for real DeepLab blocks).  bf16 activations halve input-side HBM DMA; the
    # accumulation, residual and epilogue stay f32 in-kernel.
    x_p = jnp.pad(x, ((0, 0), (0, 0), (0, 0), (0, Cp - C))).astype(jnp.bfloat16)

    out_p = pl.pallas_call(
        _basic_block_kernel,
        out_shape=jax.ShapeDtypeStruct((N, H, W, Cp), jnp.float32),
        grid_spec=pltpu.PrefetchScalarGridSpec(
            num_scalar_prefetch=0,
            grid=(N,),
            in_specs=[
                pl.BlockSpec((1, H, W, Cp), lambda n: (n, 0, 0, 0)),
                pl.BlockSpec((3, 3 * Cp, Cp), lambda n: (0, 0, 0)),
                pl.BlockSpec((1, Cp), lambda n: (0, 0)),
                pl.BlockSpec((3, 3 * Cp, Cp), lambda n: (0, 0, 0)),
                pl.BlockSpec((1, Cp), lambda n: (0, 0)),
            ],
            out_specs=pl.BlockSpec((1, H, W, Cp), lambda n: (n, 0, 0, 0)),
            scratch_shapes=[
                pltpu.VMEM((H + 2, W + 2, Cp), jnp.bfloat16),   # padded input plane
                pltpu.VMEM((H + 2, W + 2, Cp), jnp.bfloat16),   # padded intermediate
            ],
        ),
        compiler_params=pltpu.CompilerParams(
            dimension_semantics=("parallel",),
            vmem_limit_bytes=64 * 1024 * 1024,
        ),
    )(x_p, w1p, b1p, w2p, b2p)

    # TODO(synk): training-mode BatchNorm (batch statistics) not implemented.
    # TODO(synk): stride!=1 / downsample branch not implemented (module defaults used).
    # TODO(synk): for real DeepLab spatial sizes add a row-tile grid axis with a 2-row
    #             halo (tile sized per generation against 64/128 MiB VMEM) and
    #             single-buffer the grid-invariant weight blocks
    #             (pipeline_mode=pl.Buffered(1)) to reclaim VMEM at large Cp.
    return jnp.transpose(out_p[..., :C], (0, 3, 1, 2))            # back to NCHW


def _reference(x_nchw, params):
    """Pure-JAX f32 reference (lax.conv) for verification."""
    x = jnp.transpose(x_nchw, (0, 2, 3, 1)).astype(jnp.float32)
    dn = ("NHWC", "HWIO", "NHWC")
    s1, b1 = _fold_bn(params["g1"], params["b1"], params["m1"], params["v1"])
    s2, b2 = _fold_bn(params["g2"], params["b2"], params["m2"], params["v2"])
    y = lax.conv_general_dilated(x, params["w1"], (1, 1), "SAME", dimension_numbers=dn)
    y = jnp.maximum(y * s1 + b1, 0.0)
    y = lax.conv_general_dilated(y, params["w2"], (1, 1), "SAME", dimension_numbers=dn)
    y = jnp.maximum(y * s2 + b2 + x, 0.0)
    return jnp.transpose(y, (0, 3, 1, 2))


def make_params(key, cin, cout):
    ks = jax.random.split(key, 10)
    return {
        "w1": 0.1 * jax.random.normal(ks[0], (3, 3, cin, cout), jnp.float32),
        "w2": 0.1 * jax.random.normal(ks[1], (3, 3, cout, cout), jnp.float32),
        "g1": 1.0 + 0.1 * jax.random.normal(ks[2], (cout,), jnp.float32),
        "b1": 0.1 * jax.random.normal(ks[3], (cout,), jnp.float32),
        "m1": 0.1 * jax.random.normal(ks[4], (cout,), jnp.float32),
        "v1": 1.0 + 0.1 * jnp.abs(jax.random.normal(ks[5], (cout,), jnp.float32)),
        "g2": 1.0 + 0.1 * jax.random.normal(ks[6], (cout,), jnp.float32),
        "b2": 0.1 * jax.random.normal(ks[7], (cout,), jnp.float32),
        "m2": 0.1 * jax.random.normal(ks[8], (cout,), jnp.float32),
        "v2": 1.0 + 0.1 * jnp.abs(jax.random.normal(ks[9], (cout,), jnp.float32)),
    }


if __name__ == "__main__":
    key = jax.random.PRNGKey(0)
    kx, kp = jax.random.split(key)

    N, C, H, W = 2, 4, 16, 16          # in_channels == out_channels, stride=1, downsample=None
    x = jax.random.normal(kx, (N, C, H, W), jnp.float32)
    params = make_params(kp, C, C)

    out = jax.block_until_ready(basic_block_forward(x, params))
    ref = jax.block_until_ready(_reference(x, params))

    np.testing.assert_allclose(np.asarray(out), np.asarray(ref), rtol=5e-2, atol=5e-2)
    assert out.shape == (N, C, H, W)

    print("KERNEL_OK")
</pallas_src>

<mosaic_0001>
module attributes {stable_mosaic.version = 11 : i64} {
  func.func @_basic_block_kernel(%arg0: i32, %arg1: memref<1x16x16x128xbf16, #tpu.memory_space<vmem>>, %arg2: memref<3x384x128xbf16, #tpu.memory_space<vmem>>, %arg3: memref<1x128xf32, #tpu.memory_space<vmem>>, %arg4: memref<3x384x128xbf16, #tpu.memory_space<vmem>>, %arg5: memref<1x128xf32, #tpu.memory_space<vmem>>, %arg6: memref<1x16x16x128xf32, #tpu.memory_space<vmem>>, %arg7: memref<18x18x128xbf16, #tpu.memory_space<vmem>>, %arg8: memref<18x18x128xbf16, #tpu.memory_space<vmem>>) attributes {dimension_semantics = [#tpu.dimension_semantics<parallel>], iteration_bounds = array<i64: 2>, scalar_prefetch = 0 : i64, scratch_operands = 2 : i64, tpu.core_type = #tpu.core_type<tc>, window_params = [{transform_indices = @transform_0, window_bounds = array<i64: 1, 16, 16, 128>}, {pipeline_mode = #tpu.pipeline_mode<synchronous>, transform_indices = @transform_1, window_bounds = array<i64: 3, 384, 128>}, {pipeline_mode = #tpu.pipeline_mode<synchronous>, transform_indices = @transform_2, window_bounds = array<i64: 1, 128>}, {pipeline_mode = #tpu.pipeline_mode<synchronous>, transform_indices = @transform_3, window_bounds = array<i64: 3, 384, 128>}, {pipeline_mode = #tpu.pipeline_mode<synchronous>, transform_indices = @transform_4, window_bounds = array<i64: 1, 128>}, {transform_indices = @transform_5, window_bounds = array<i64: 1, 16, 16, 128>}]} {
    %cst = arith.constant 0.000000e+00 : bf16
    %0 = vector.broadcast %cst : bf16 to vector<1x18x128xbf16>
    %cst_0 = arith.constant 0.000000e+00 : bf16
    %1 = vector.broadcast %cst_0 : bf16 to vector<18x1x128xbf16>
    %c0 = arith.constant 0 : index
    %c0_1 = arith.constant 0 : index
    %c0_2 = arith.constant 0 : index
    %2 = vector.load %arg7[%c0, %c0_1, %c0_2] : memref<18x18x128xbf16, #tpu.memory_space<vmem>>, vector<1x18x128xbf16>
    tpu.vector_store %arg7[%c0, %c0_1, %c0_2], %0 {strides = array<i32>} : memref<18x18x128xbf16, #tpu.memory_space<vmem>>, vector<1x18x128xbf16>,
    %c17 = arith.constant 17 : index
    %c0_3 = arith.constant 0 : index
    %c0_4 = arith.constant 0 : index
    %3 = vector.load %arg7[%c17, %c0_3, %c0_4] : memref<18x18x128xbf16, #tpu.memory_space<vmem>>, vector<1x18x128xbf16>
    tpu.vector_store %arg7[%c17, %c0_3, %c0_4], %0 {strides = array<i32>} : memref<18x18x128xbf16, #tpu.memory_space<vmem>>, vector<1x18x128xbf16>,
    %c0_5 = arith.constant 0 : index
    %c0_6 = arith.constant 0 : index
    %c0_7 = arith.constant 0 : index
    %4 = vector.load %arg7[%c0_5, %c0_6, %c0_7] : memref<18x18x128xbf16, #tpu.memory_space<vmem>>, vector<18x1x128xbf16>
    tpu.vector_store %arg7[%c0_5, %c0_6, %c0_7], %1 {strides = array<i32>} : memref<18x18x128xbf16, #tpu.memory_space<vmem>>, vector<18x1x128xbf16>,
    %c0_8 = arith.constant 0 : index
    %c17_9 = arith.constant 17 : index
    %c0_10 = arith.constant 0 : index
    %5 = vector.load %arg7[%c0_8, %c17_9, %c0_10] : memref<18x18x128xbf16, #tpu.memory_space<vmem>>, vector<18x1x128xbf16>
    tpu.vector_store %arg7[%c0_8, %c17_9, %c0_10], %1 {strides = array<i32>} : memref<18x18x128xbf16, #tpu.memory_space<vmem>>, vector<18x1x128xbf16>,
    %cst_11 = arith.constant 0.000000e+00 : bf16
    %6 = vector.broadcast %cst_11 : bf16 to vector<1x18x128xbf16>
    %cst_12 = arith.constant 0.000000e+00 : bf16
    %7 = vector.broadcast %cst_12 : bf16 to vector<18x1x128xbf16>
    %c0_13 = arith.constant 0 : index
    %c0_14 = arith.constant 0 : index
    %c0_15 = arith.constant 0 : index
    %8 = vector.load %arg8[%c0_13, %c0_14, %c0_15] : memref<18x18x128xbf16, #tpu.memory_space<vmem>>, vector<1x18x128xbf16>
    tpu.vector_store %arg8[%c0_13, %c0_14, %c0_15], %6 {strides = array<i32>} : memref<18x18x128xbf16, #tpu.memory_space<vmem>>, vector<1x18x128xbf16>,
    %c17_16 = arith.constant 17 : index
    %c0_17 = arith.constant 0 : index
    %c0_18 = arith.constant 0 : index
    %9 = vector.load %arg8[%c17_16, %c0_17, %c0_18] : memref<18x18x128xbf16, #tpu.memory_space<vmem>>, vector<1x18x128xbf16>
    tpu.vector_store %arg8[%c17_16, %c0_17, %c0_18], %6 {strides = array<i32>} : memref<18x18x128xbf16, #tpu.memory_space<vmem>>, vector<1x18x128xbf16>,
    %c0_19 = arith.constant 0 : index
    %c0_20 = arith.constant 0 : index
    %c0_21 = arith.constant 0 : index
    %10 = vector.load %arg8[%c0_19, %c0_20, %c0_21] : memref<18x18x128xbf16, #tpu.memory_space<vmem>>, vector<18x1x128xbf16>
    tpu.vector_store %arg8[%c0_19, %c0_20, %c0_21], %7 {strides = array<i32>} : memref<18x18x128xbf16, #tpu.memory_space<vmem>>, vector<18x1x128xbf16>,
    %c0_22 = arith.constant 0 : index
    %c17_23 = arith.constant 17 : index
    %c0_24 = arith.constant 0 : index
    %11 = vector.load %arg8[%c0_22, %c17_23, %c0_24] : memref<18x18x128xbf16, #tpu.memory_space<vmem>>, vector<18x1x128xbf16>
    tpu.vector_store %arg8[%c0_22, %c17_23, %c0_24], %7 {strides = array<i32>} : memref<18x18x128xbf16, #tpu.memory_space<vmem>>, vector<18x1x128xbf16>,
    %c0_25 = arith.constant 0 : index
    %c0_26 = arith.constant 0 : index
    %c0_27 = arith.constant 0 : index
    %c0_28 = arith.constant 0 : index
    %12 = vector.load %arg1[%c0_25, %c0_26, %c0_27, %c0_28] : memref<1x16x16x128xbf16, #tpu.memory_space<vmem>>, vector<1x16x16x128xbf16>
    %13 = vector.shape_cast %12 : vector<1x16x16x128xbf16> to vector<16x16x128xbf16>
    %c1 = arith.constant 1 : index
    %c1_29 = arith.constant 1 : index
    %c0_30 = arith.constant 0 : index
    %14 = vector.load %arg7[%c1, %c1_29, %c0_30] : memref<18x18x128xbf16, #tpu.memory_space<vmem>>, vector<16x16x128xbf16>
    tpu.vector_store %arg7[%c1, %c1_29, %c0_30], %13 {strides = array<i32>} : memref<18x18x128xbf16, #tpu.memory_space<vmem>>, vector<16x16x128xbf16>,
    %c0_31 = arith.constant 0 : index
    %c0_32 = arith.constant 0 : index
    %c0_33 = arith.constant 0 : index
    %15 = vector.load %arg7[%c0_31, %c0_32, %c0_33] : memref<18x18x128xbf16, #tpu.memory_space<vmem>>, vector<18x16x128xbf16>
    %16 = vector.extract_strided_slice %15 {offsets = [0, 0, 0], sizes = [16, 16, 128], strides = [1, 1, 1]} : vector<18x16x128xbf16> to vector<16x16x128xbf16>
    %17 = vector.extract_strided_slice %15 {offsets = [1, 0, 0], sizes = [16, 16, 128], strides = [1, 1, 1]} : vector<18x16x128xbf16> to vector<16x16x128xbf16>
    %18 = vector.extract_strided_slice %15 {offsets = [2, 0, 0], sizes = [16, 16, 128], strides = [1, 1, 1]} : vector<18x16x128xbf16> to vector<16x16x128xbf16>
    %19 = tpu.concatenate %16, %17, %18 in 2 : vector<16x16x128xbf16>, vector<16x16x128xbf16>, vector<16x16x128xbf16> -> vector<16x16x384xbf16>
    %20 = vector.shape_cast %19 : vector<16x16x384xbf16> to vector<256x384xbf16>
    %c0_34 = arith.constant 0 : index
    %c0_35 = arith.constant 0 : index
    %c0_36 = arith.constant 0 : index
    %21 = vector.load %arg2[%c0_34, %c0_35, %c0_36] : memref<3x384x128xbf16, #tpu.memory_space<vmem>>, vector<1x384x128xbf16>
    %22 = vector.shape_cast %21 : vector<1x384x128xbf16> to vector<384x128xbf16>
    %cst_37 = arith.constant dense<0.000000e+00> : vector<256x128xf32>
    %23 = tpu.matmul %20, %22, %cst_37 {dimension_numbers = #tpu.dot_dimension_numbers<[1], [0], [0], [1], [0, 0, 1, 1], [], []>} : vector<256x384xbf16>, vector<384x128xbf16>, vector<256x128xf32> -> vector<256x128xf32>
    %c0_38 = arith.constant 0 : index
    %c1_39 = arith.constant 1 : index
    %c0_40 = arith.constant 0 : index
    %24 = vector.load %arg7[%c0_38, %c1_39, %c0_40] : memref<18x18x128xbf16, #tpu.memory_space<vmem>>, vector<18x16x128xbf16>
    %25 = vector.extract_strided_slice %24 {offsets = [0, 0, 0], sizes = [16, 16, 128], strides = [1, 1, 1]} : vector<18x16x128xbf16> to vector<16x16x128xbf16>
    %26 = vector.extract_strided_slice %24 {offsets = [1, 0, 0], sizes = [16, 16, 128], strides = [1, 1, 1]} : vector<18x16x128xbf16> to vector<16x16x128xbf16>
    %27 = vector.extract_strided_slice %24 {offsets = [2, 0, 0], sizes = [16, 16, 128], strides = [1, 1, 1]} : vector<18x16x128xbf16> to vector<16x16x128xbf16>
    %28 = tpu.concatenate %25, %26, %27 in 2 : vector<16x16x128xbf16>, vector<16x16x128xbf16>, vector<16x16x128xbf16> -> vector<16x16x384xbf16>
    %29 = vector.shape_cast %28 : vector<16x16x384xbf16> to vector<256x384xbf16>
    %c1_41 = arith.constant 1 : index
    %c0_42 = arith.constant 0 : index
    %c0_43 = arith.constant 0 : index
    %30 = vector.load %arg2[%c1_41, %c0_42, %c0_43] : memref<3x384x128xbf16, #tpu.memory_space<vmem>>, vector<1x384x128xbf16>
    %31 = vector.shape_cast %30 : vector<1x384x128xbf16> to vector<384x128xbf16>
    %cst_44 = arith.constant dense<0.000000e+00> : vector<256x128xf32>
    %32 = tpu.matmul %29, %31, %cst_44 {dimension_numbers = #tpu.dot_dimension_numbers<[1], [0], [0], [1], [0, 0, 1, 1], [], []>} : vector<256x384xbf16>, vector<384x128xbf16>, vector<256x128xf32> -> vector<256x128xf32>
    %33 = arith.addf %23, %32 : vector<256x128xf32>
    %c0_45 = arith.constant 0 : index
    %c2 = arith.constant 2 : index
    %c0_46 = arith.constant 0 : index
    %34 = vector.load %arg7[%c0_45, %c2, %c0_46] : memref<18x18x128xbf16, #tpu.memory_space<vmem>>, vector<18x16x128xbf16>
    %35 = vector.extract_strided_slice %34 {offsets = [0, 0, 0], sizes = [16, 16, 128], strides = [1, 1, 1]} : vector<18x16x128xbf16> to vector<16x16x128xbf16>
    %36 = vector.extract_strided_slice %34 {offsets = [1, 0, 0], sizes = [16, 16, 128], strides = [1, 1, 1]} : vector<18x16x128xbf16> to vector<16x16x128xbf16>
    %37 = vector.extract_strided_slice %34 {offsets = [2, 0, 0], sizes = [16, 16, 128], strides = [1, 1, 1]} : vector<18x16x128xbf16> to vector<16x16x128xbf16>
    %38 = tpu.concatenate %35, %36, %37 in 2 : vector<16x16x128xbf16>, vector<16x16x128xbf16>, vector<16x16x128xbf16> -> vector<16x16x384xbf16>
    %39 = vector.shape_cast %38 : vector<16x16x384xbf16> to vector<256x384xbf16>
    %c2_47 = arith.constant 2 : index
    %c0_48 = arith.constant 0 : index
    %c0_49 = arith.constant 0 : index
    %40 = vector.load %arg2[%c2_47, %c0_48, %c0_49] : memref<3x384x128xbf16, #tpu.memory_space<vmem>>, vector<1x384x128xbf16>
    %41 = vector.shape_cast %40 : vector<1x384x128xbf16> to vector<384x128xbf16>
    %cst_50 = arith.constant dense<0.000000e+00> : vector<256x128xf32>
    %42 = tpu.matmul %39, %41, %cst_50 {dimension_numbers = #tpu.dot_dimension_numbers<[1], [0], [0], [1], [0, 0, 1, 1], [], []>} : vector<256x384xbf16>, vector<384x128xbf16>, vector<256x128xf32> -> vector<256x128xf32>
    %43 = arith.addf %33, %42 : vector<256x128xf32>
    %c0_51 = arith.constant 0 : index
    %c0_52 = arith.constant 0 : index
    %44 = vector.load %arg3[%c0_51, %c0_52] : memref<1x128xf32, #tpu.memory_space<vmem>>, vector<1x128xf32>
    %45 = vector.shape_cast %44 : vector<1x128xf32> to vector<128xf32>
    %46 = vector.shape_cast %45 : vector<128xf32> to vector<1x128xf32>
    %47 = vector.broadcast %46 : vector<1x128xf32> to vector<256x128xf32>
    %48 = arith.addf %43, %47 : vector<256x128xf32>
    %cst_53 = arith.constant 0.000000e+00 : f32
    %49 = vector.broadcast %cst_53 : f32 to vector<256x128xf32>
    %50 = arith.maximumf %48, %49 : vector<256x128xf32>
    %51 = vector.shape_cast %50 : vector<256x128xf32> to vector<16x16x128xf32>
    %52 = arith.truncf %51 : vector<16x16x128xf32> to vector<16x16x128xbf16>
    %c1_54 = arith.constant 1 : index
    %c1_55 = arith.constant 1 : index
    %c0_56 = arith.constant 0 : index
    %53 = vector.load %arg8[%c1_54, %c1_55, %c0_56] : memref<18x18x128xbf16, #tpu.memory_space<vmem>>, vector<16x16x128xbf16>
    tpu.vector_store %arg8[%c1_54, %c1_55, %c0_56], %52 {strides = array<i32>} : memref<18x18x128xbf16, #tpu.memory_space<vmem>>, vector<16x16x128xbf16>,
    %c0_57 = arith.constant 0 : index
    %c0_58 = arith.constant 0 : index
    %c0_59 = arith.constant 0 : index
    %54 = vector.load %arg8[%c0_57, %c0_58, %c0_59] : memref<18x18x128xbf16, #tpu.memory_space<vmem>>, vector<18x16x128xbf16>
    %55 = vector.extract_strided_slice %54 {offsets = [0, 0, 0], sizes = [16, 16, 128], strides = [1, 1, 1]} : vector<18x16x128xbf16> to vector<16x16x128xbf16>
    %56 = vector.extract_strided_slice %54 {offsets = [1, 0, 0], sizes = [16, 16, 128], strides = [1, 1, 1]} : vector<18x16x128xbf16> to vector<16x16x128xbf16>
    %57 = vector.extract_strided_slice %54 {offsets = [2, 0, 0], sizes = [16, 16, 128], strides = [1, 1, 1]} : vector<18x16x128xbf16> to vector<16x16x128xbf16>
    %58 = tpu.concatenate %55, %56, %57 in 2 : vector<16x16x128xbf16>, vector<16x16x128xbf16>, vector<16x16x128xbf16> -> vector<16x16x384xbf16>
    %59 = vector.shape_cast %58 : vector<16x16x384xbf16> to vector<256x384xbf16>
    %c0_60 = arith.constant 0 : index
    %c0_61 = arith.constant 0 : index
    %c0_62 = arith.constant 0 : index
    %60 = vector.load %arg4[%c0_60, %c0_61, %c0_62] : memref<3x384x128xbf16, #tpu.memory_space<vmem>>, vector<1x384x128xbf16>
    %61 = vector.shape_cast %60 : vector<1x384x128xbf16> to vector<384x128xbf16>
    %cst_63 = arith.constant dense<0.000000e+00> : vector<256x128xf32>
    %62 = tpu.matmul %59, %61, %cst_63 {dimension_numbers = #tpu.dot_dimension_numbers<[1], [0], [0], [1], [0, 0, 1, 1], [], []>} : vector<256x384xbf16>, vector<384x128xbf16>, vector<256x128xf32> -> vector<256x128xf32>
    %c0_64 = arith.constant 0 : index
    %c1_65 = arith.constant 1 : index
    %c0_66 = arith.constant 0 : index
    %63 = vector.load %arg8[%c0_64, %c1_65, %c0_66] : memref<18x18x128xbf16, #tpu.memory_space<vmem>>, vector<18x16x128xbf16>
    %64 = vector.extract_strided_slice %63 {offsets = [0, 0, 0], sizes = [16, 16, 128], strides = [1, 1, 1]} : vector<18x16x128xbf16> to vector<16x16x128xbf16>
    %65 = vector.extract_strided_slice %63 {offsets = [1, 0, 0], sizes = [16, 16, 128], strides = [1, 1, 1]} : vector<18x16x128xbf16> to vector<16x16x128xbf16>
    %66 = vector.extract_strided_slice %63 {offsets = [2, 0, 0], sizes = [16, 16, 128], strides = [1, 1, 1]} : vector<18x16x128xbf16> to vector<16x16x128xbf16>
    %67 = tpu.concatenate %64, %65, %66 in 2 : vector<16x16x128xbf16>, vector<16x16x128xbf16>, vector<16x16x128xbf16> -> vector<16x16x384xbf16>
    %68 = vector.shape_cast %67 : vector<16x16x384xbf16> to vector<256x384xbf16>
    %c1_67 = arith.constant 1 : index
    %c0_68 = arith.constant 0 : index
    %c0_69 = arith.constant 0 : index
    %69 = vector.load %arg4[%c1_67, %c0_68, %c0_69] : memref<3x384x128xbf16, #tpu.memory_space<vmem>>, vector<1x384x128xbf16>
    %70 = vector.shape_cast %69 : vector<1x384x128xbf16> to vector<384x128xbf16>
    %cst_70 = arith.constant dense<0.000000e+00> : vector<256x128xf32>
    %71 = tpu.matmul %68, %70, %cst_70 {dimension_numbers = #tpu.dot_dimension_numbers<[1], [0], [0], [1], [0, 0, 1, 1], [], []>} : vector<256x384xbf16>, vector<384x128xbf16>, vector<256x128xf32> -> vector<256x128xf32>
    %72 = arith.addf %62, %71 : vector<256x128xf32>
    %c0_71 = arith.constant 0 : index
    %c2_72 = arith.constant 2 : index
    %c0_73 = arith.constant 0 : index
    %73 = vector.load %arg8[%c0_71, %c2_72, %c0_73] : memref<18x18x128xbf16, #tpu.memory_space<vmem>>, vector<18x16x128xbf16>
    %74 = vector.extract_strided_slice %73 {offsets = [0, 0, 0], sizes = [16, 16, 128], strides = [1, 1, 1]} : vector<18x16x128xbf16> to vector<16x16x128xbf16>
    %75 = vector.extract_strided_slice %73 {offsets = [1, 0, 0], sizes = [16, 16, 128], strides = [1, 1, 1]} : vector<18x16x128xbf16> to vector<16x16x128xbf16>
    %76 = vector.extract_strided_slice %73 {offsets = [2, 0, 0], sizes = [16, 16, 128], strides = [1, 1, 1]} : vector<18x16x128xbf16> to vector<16x16x128xbf16>
    %77 = tpu.concatenate %74, %75, %76 in 2 : vector<16x16x128xbf16>, vector<16x16x128xbf16>, vector<16x16x128xbf16> -> vector<16x16x384xbf16>
    %78 = vector.shape_cast %77 : vector<16x16x384xbf16> to vector<256x384xbf16>
    %c2_74 = arith.constant 2 : index
    %c0_75 = arith.constant 0 : index
    %c0_76 = arith.constant 0 : index
    %79 = vector.load %arg4[%c2_74, %c0_75, %c0_76] : memref<3x384x128xbf16, #tpu.memory_space<vmem>>, vector<1x384x128xbf16>
    %80 = vector.shape_cast %79 : vector<1x384x128xbf16> to vector<384x128xbf16>
    %cst_77 = arith.constant dense<0.000000e+00> : vector<256x128xf32>
    %81 = tpu.matmul %78, %80, %cst_77 {dimension_numbers = #tpu.dot_dimension_numbers<[1], [0], [0], [1], [0, 0, 1, 1], [], []>} : vector<256x384xbf16>, vector<384x128xbf16>, vector<256x128xf32> -> vector<256x128xf32>
    %82 = arith.addf %72, %81 : vector<256x128xf32>
    %c0_78 = arith.constant 0 : index
    %c0_79 = arith.constant 0 : index
    %83 = vector.load %arg5[%c0_78, %c0_79] : memref<1x128xf32, #tpu.memory_space<vmem>>, vector<1x128xf32>
    %84 = vector.shape_cast %83 : vector<1x128xf32> to vector<128xf32>
    %85 = vector.shape_cast %84 : vector<128xf32> to vector<1x128xf32>
    %86 = vector.broadcast %85 : vector<1x128xf32> to vector<256x128xf32>
    %87 = arith.addf %82, %86 : vector<256x128xf32>
    %c0_80 = arith.constant 0 : index
    %c0_81 = arith.constant 0 : index
    %c0_82 = arith.constant 0 : index
    %c0_83 = arith.constant 0 : index
    %88 = vector.load %arg1[%c0_80, %c0_81, %c0_82, %c0_83] : memref<1x16x16x128xbf16, #tpu.memory_space<vmem>>, vector<1x16x16x128xbf16>
    %89 = vector.shape_cast %88 : vector<1x16x16x128xbf16> to vector<16x16x128xbf16>
    %90 = arith.extf %89 : vector<16x16x128xbf16> to vector<16x16x128xf32>
    %91 = vector.shape_cast %90 : vector<16x16x128xf32> to vector<256x128xf32>
    %92 = arith.addf %87, %91 : vector<256x128xf32>
    %cst_84 = arith.constant 0.000000e+00 : f32
    %93 = vector.broadcast %cst_84 : f32 to vector<256x128xf32>
    %94 = arith.maximumf %92, %93 : vector<256x128xf32>
    %95 = vector.shape_cast %94 : vector<256x128xf32> to vector<16x16x128xf32>
    %c0_85 = arith.constant 0 : index
    %c0_86 = arith.constant 0 : index
    %c0_87 = arith.constant 0 : index
    %c0_88 = arith.constant 0 : index
    %96 = vector.load %arg6[%c0_85, %c0_86, %c0_87, %c0_88] : memref<1x16x16x128xf32, #tpu.memory_space<vmem>>, vector<1x16x16x128xf32>
    %97 = vector.shape_cast %96 : vector<1x16x16x128xf32> to vector<16x16x128xf32>
    %98 = vector.shape_cast %95 : vector<16x16x128xf32> to vector<1x16x16x128xf32>
    tpu.vector_store %arg6[%c0_85, %c0_86, %c0_87, %c0_88], %98 {strides = array<i32>} : memref<1x16x16x128xf32, #tpu.memory_space<vmem>>, vector<1x16x16x128xf32>,
    return
  }
  func.func @transform_0(%arg0: i32) -> (i32, i32, i32, i32) {
    %c0_i32 = arith.constant 0 : i32
    %c0_i32_0 = arith.constant 0 : i32
    %c0_i32_1 = arith.constant 0 : i32
    %c0_i32_2 = arith.constant 0 : i32
    return %arg0, %c0_i32, %c0_i32_0, %c0_i32_1 : i32, i32, i32, i32
  }
  func.func @transform_1(%arg0: i32) -> (i32, i32, i32) {
    %c0_i32 = arith.constant 0 : i32
    %c0_i32_0 = arith.constant 0 : i32
    %c0_i32_1 = arith.constant 0 : i32
    %c0_i32_2 = arith.constant 0 : i32
    return %c0_i32, %c0_i32_0, %c0_i32_1 : i32, i32, i32
  }
  func.func @transform_2(%arg0: i32) -> (i32, i32) {
    %c0_i32 = arith.constant 0 : i32
    %c0_i32_0 = arith.constant 0 : i32
    %c0_i32_1 = arith.constant 0 : i32
    return %c0_i32, %c0_i32_0 : i32, i32
  }
  func.func @transform_3(%arg0: i32) -> (i32, i32, i32) {
    %c0_i32 = arith.constant 0 : i32
    %c0_i32_0 = arith.constant 0 : i32
    %c0_i32_1 = arith.constant 0 : i32
    %c0_i32_2 = arith.constant 0 : i32
    return %c0_i32, %c0_i32_0, %c0_i32_1 : i32, i32, i32
  }
  func.func @transform_4(%arg0: i32) -> (i32, i32) {
    %c0_i32 = arith.constant 0 : i32
    %c0_i32_0 = arith.constant 0 : i32
    %c0_i32_1 = arith.constant 0 : i32
    return %c0_i32, %c0_i32_0 : i32, i32
  }
  func.func @transform_5(%arg0: i32) -> (i32, i32, i32, i32) {
    %c0_i32 = arith.constant 0 : i32
    %c0_i32_0 = arith.constant 0 : i32
    %c0_i32_1 = arith.constant 0 : i32
    %c0_i32_2 = arith.constant 0 : i32
    return %arg0, %c0_i32, %c0_i32_0, %c0_i32_1 : i32, i32, i32, i32
  }
}

</mosaic_0001>

<bundles_post_ra>
// kernel: tpu_custom_call.1
= control target key start
LH: loop header
LB: loop body
LE: loop exit
PB: predicated region body
PF: predicated region fallthrough
CT: control target
= control target key end

     0   :  { %10 = vsyncpa [#allocation5], 0  ;;  %s10586_s0 = inlined_call_operand.hbm [shape: bf16[2,16,16,128], index: 0, kind: input, shape index: {}]   ;;  %s10587_s1 = inlined_call_operand.hbm [shape: bf16[3,384,128], index: 1, kind: input, shape index: {}]   ;;  %s10588_s2 = inlined_call_operand.vmem [shape: f32[1,128], index: 2, kind: input, shape index: {}]   ;;  %s10589_s3 = inlined_call_operand.hbm [shape: bf16[3,384,128], index: 3, kind: input, shape index: {}]   ;;  %s10590_s4 = inlined_call_operand.vmem [shape: f32[1,128], index: 4, kind: input, shape index: {}]   ;;  %s10591_s5 = inlined_call_operand.hbm [shape: f32[2,16,16,128], index: 5, kind: output, shape index: {}]  }
   0x1   :  { %12 = vsyncpa [#allocation5 + $0x1], 0 }
   0x2   :  { %13 = vsyncpa [#allocation8], 0 }
   0x3   :  { %14 = vsyncpa [#allocation6], 0 }
   0x4   :  { %16 = vsyncpa [#allocation6 + $0x1], 0  ;;  %s8307_s18 = smov 0   ;;  %s8309_s19 = smov 0  }
   0x5   :  { %s8311_s20 = smov 0   ;;  %s8313_s21 = smov 0  }
   0x6 LB: > { %s8328_s22 = sadd.s32 4294967295, %s8266_s21   ;;  %s6224_s23 = sadd.s32 4294967294, %s8266_s21   ;;  %s8266_s21 = sphi %s8313_s21, %s10706_s21   ;;  %s8262_s20 = sphi %s8311_s20, %s10705_s20   ;;  %s8258_s19 = sphi %s8309_s19, %s10704_s19   ;;  %s8254_s18 = sphi %s8307_s18, %s10703_s18  }
   0x7   : > { %p42_p0 = scmp.ne.s32.totalorder %s8258_s19, %s8254_s18  ;;  %p10592_p1 = scmp.eq.s32.totalorder %s8328_s22, 0 }
   0x8   : > { %p150_p2 = scmp.eq.s32.totalorder %s8328_s22, 1  ;;  %p156_p3 = scmp.eq.s32.totalorder %s6224_s23, 1 }
   0x9   : > { %p8337_p4 = por %p10592_p1, %p42_p0  ;;  %p6225_p5 = scmp.ge.s32.totalorder %s8266_s21, 1 }
   0xa   : > { %p8342_p6 = por %p156_p3, %p42_p0  ;;  %p163_p7 = scmp.lt.s32.totalorder %s8266_s21, 3 }
   0xb   : > { %s10604_s24 = scalar_select %p8337_p4, 1, 0 }
   0xc   : > { %s10605_s25 = scalar_select %p8342_p6, 1, 0 }
   0xd   : > { %p8347_p8 = pnand %p6225_p5, %p163_p7  ;;  %s8268_s27 = smov [#allocation7]  }
   0xe   : > { %s175_s28 = sshll.u32 %s8268_s27, 4  ;;  %s8269_s30 = smov [#allocation9]   ;;  %s176_s28 = int_to_ptr.vmem [resolvable:$true] %s175_s28 }
   0xf   : > { %s10606_s26 = scalar_select %p8347_p8, 1, 0 }
  0x10   : > { %p7757_p9 = pneg %p8347_p8  ;;  %s191_s6 = sshll.u32 %s8269_s30, 4  ;;  %s192_s6 = int_to_ptr.vmem [resolvable:$true] %s191_s6 }
  0x11   : > { %s8129_s7 = scalar_lea.vmem %s176_s28, 9216  ;;  %p8137_p5 = scmp.lt.s32.totalorder %s176_s28, %s176_s28 }
  0x12   : > { %p8356_p11 = pnand %p7757_p9, %p10592_p1  ;;  %p8130_p13 = scmp.ne.s32.totalorder %s176_s28, %s8129_s7 }
  0x13   : > { %p8138_p7 = scmp.lt.s32.totalorder %s8129_s7, %s8129_s7 }
  0x14   : > { %p8120_p12 = pneg %p8356_p11 }
  0x15   : > { %p8139_p10 = por %p8138_p7, %p8137_p5 }
  0x16   : > { %p8132_p0 = pnand %p8130_p13, %p8120_p12 }
  0x18   : > { %p8133_p3 = pneg %p8132_p0 }
  0x1a   : > { %p8140_p9 = pnand %p8139_p10, %p8133_p3 }
  0x1c   : > { %8143 = shalt.err (!%p8140_p9)
}
  0x1d   : > { %s10593_s8 = smov 64   ;;  %s8271_s9 = smov 4  }
  0x1e   : > { %7760 = dma.hbm_to_vmem [thread:$0]  (!%p8356_p11), %s10587_s1, 9216, %s176_s28, [#allocation8], %s10593_s8, %s10593_s8, %s8271_s9  }
  0x1f   : > { %s8155_s12 = scalar_lea.vmem %s192_s6, 9216  ;;  %p8163_p10 = scmp.lt.s32.totalorder %s192_s6, %s192_s6 }
  0x20   : > { %p8156_p13 = scmp.ne.s32.totalorder %s192_s6, %s8155_s12  ;;  %p8164_p3 = scmp.lt.s32.totalorder %s8155_s12, %s8155_s12 }
  0x22   : > { %p8158_p0 = pnand %p8156_p13, %p8120_p12  ;;  %p8165_p7 = por %p8164_p3, %p8163_p10 }
  0x24   : > { %p8159_p5 = pneg %p8158_p0 }
  0x26   : > { %p8166_p9 = pnand %p8165_p7, %p8159_p5 }
  0x28   : > { %8169 = shalt.err (!%p8166_p9)
}
  0x29   : > { %7763 = dma.hbm_to_vmem [thread:$0]  (!%p8356_p11), %s10589_s3, 9216, %s192_s6, [#allocation8], %s10593_s8, %s10593_s8, %s8271_s9  }
  0x2a   : > { %s8385_s15 = sadd.s32 1, %s8266_s21   ;;  %s29_s16 = sadd.s32 1, %s8262_s20 }
  0x2b   : > { %s26_s17 = ssub.s32 %s8266_s21, %s8385_s15  ;;  %p36_p12 = scmp.ne.s32.totalorder %s8262_s20, %s8258_s19 }
  0x2c   : > { %p27_p13 = scmp.eq.s32.totalorder %s26_s17, 0  ;;  %p37_p0 = scmp.eq.s32.totalorder %s8266_s21, 0 }
  0x2d   : > { %p8395_p5 = por %p150_p2, %p36_p12  ;;  %p7774_p10 = scmp.lt.s32.totalorder %s8266_s21, 2 }
  0x2e   : > { %s8401_s27 = scalar_select %p27_p13, %s8262_s20, %s29_s16  }
  0x2f   : > { %s10608_s23 = scalar_select %p8395_p5, 1, 0 }
  0x30   : > { %p38_p3 = por %p37_p0, %p36_p12  ;;  %s208_s28 = sand.u32 1, %s8262_s20  }
  0x31   : > { %s6229_s29 = sshll.u32 %s208_s28, 7  ;;  %s6528_s30 = sshll.u32 %s8266_s21, 11 }
  0x32   : > { %s8408_s10 = scalar_lea.hbm %s10586_s0, %s6528_s30  ;;  %s212_s11 = scalar_lea.vmem [#allocation4], %s6229_s29 }
  0x33   : > { %s219_s12 = sshll.u32 %s212_s11, 4  ;;  %p8412_p2 = pnand %p7774_p10, %p38_p3  ;;  %s8410_s12 = int_to_ptr.vmem [resolvable:$true] %s219_s12 }
  0x34   : > { %s8416_s14 = scalar_lea.sflag [#allocation5], %s208_s28  ;;  %s8170_s16 = scalar_lea.hbm %s8408_s10, 2048 }
  0x35   : > { %p8171_p11 = scmp.ne.s32.totalorder %s8408_s10, %s8170_s16  ;;  %p8172_p7 = pneg %p8412_p2 }
  0x36   : > { %s8175_s29 = scalar_lea.hbm %s10586_s0, 4096  ;;  %p8176_p13 = scmp.lt.s32.totalorder %s8408_s10, %s10586_s0 }
  0x37   : > { %p8173_p9 = pnand %p8172_p7, %p8171_p11  ;;  %p8177_p0 = scmp.lt.s32.totalorder %s8175_s29, %s8170_s16 }
  0x39   : > { %p8174_p12 = pneg %p8173_p9  ;;  %p8178_p10 = por %p8177_p0, %p8176_p13 }
  0x3b   : > { %p8179_p3 = pnand %p8178_p10, %p8174_p12 }
  0x3d   : > { %8182 = shalt.err (!%p8179_p3)
}
  0x3e   : > { %s8183_s28 = scalar_lea.vmem %s8410_s12, 2048  ;;  %s8272_s11 = smov [#allocation4]  }
  0x3f   : > { %p8184_p1 = scmp.ne.s32.totalorder %s8410_s12, %s8183_s28  ;;  %s8188_s8 = sshll.u32 %s8272_s11, 4  ;;  %s8189_s8 = int_to_ptr.vmem [resolvable:$false] %s8188_s8 }
  0x40   : > { %s8190_s17 = scalar_lea.vmem %s8189_s8, 4096  ;;  %p8191_p9 = scmp.lt.s32.totalorder %s8410_s12, %s8189_s8 }
  0x41   : > { %p8186_p6 = pnand %p8184_p1, %p8172_p7  ;;  %p8192_p5 = scmp.lt.s32.totalorder %s8190_s17, %s8183_s28 }
  0x43   : > { %p8187_p11 = pneg %p8186_p6  ;;  %p8193_p4 = por %p8192_p5, %p8191_p9 }
  0x45   : > { %p8194_p8 = pnand %p8193_p4, %p8187_p11 }
  0x47   : > { %8197 = shalt.err (!%p8194_p8)
}
  0x48   : > { %s10610_s16 = smov 64   ;;  %p10611_p1 = scmp.ne.s32.totalorder %s10606_s26, 0 }
  0x49   : > { %7767 = dma.hbm_to_vmem [thread:$0]  (!%p8412_p2), %s8408_s10, 2048, %s8410_s12, %s8416_s14, %s10610_s16, %s10610_s16, %s8271_s9  }
  0x4a   : > { %231 = sbr.rel (%p10611_p1) target bundleno = 1153 (0x481), region = 40 }
  0x4f   : > { %s8443_s30 = sand.u32 1, %s8258_s19   ;;  %p10612_p4 = scmp.ne.s32.totalorder %s10604_s24, 0 }
  0x50   : > { %s6233_s8 = sshll.u32 %s8443_s30, 7  ;;  %s234_s29 = scalar_lea.sflag [#allocation5], %s8443_s30 }
  0x51   : > { %s8447_s6 = scalar_lea.vmem [#allocation4], %s6233_s8 }
  0x52   : > { %8241 = dma.done.wait (%p10612_p4), %s234_s29, 2048  }
  0x53   : > { %8243 = vsyncadd (%p10612_p4), %s234_s29, 4294965248  ;;  %p10613_p6 = scmp.eq.s32.totalorder %s8328_s22, 0 }
  0x55   : > { %8245 = dma.done.wait (%p10613_p6), [#allocation8], 18432   ;;  %p10614_p8 = pmov %p10613_p6 }
  0x56   : > { %v8273_v0 = vmov 0   ;;  %v7817_v1 = vld [vmem:[#allocation7 + $0x138] sm:$0xff]   ;;  %v7820_v4 = vld [vmem:[#allocation7 + $0x130] sm:$0xff]   ;;  %vm281_vm0 = vsmask.f32 256  ;;  %v7823_v7 = vld [vmem:[#allocation7 + $0x128] sm:$0xff]  }
  0x57   : > { %8247 = vsyncadd (%p10614_p8), [#allocation8], 4294948864  ;;  %273 = vst [vmem:[#allocation2] sm:$0xf] %v8273_v0  ;;  %v7818_v2 = vld [vmem:[#allocation7 + $0x178] sm:$0xff]   ;;  %6641 = vmatprep.subr.bf16.mxu0 %v7817_v1  ;;  %v7821_v5 = vld [vmem:[#allocation7 + $0x170] sm:$0xff]  }
  0x58   : > { %274 = vst [vmem:[#allocation2 + $0x4] sm:$0xf] %v8273_v0  ;;  %275 = vst [vmem:[#allocation2 + $0x8] sm:$0x1] %v8273_v0  ;;  %v7819_v3 = vld [vmem:[#allocation7 + $0xf8] sm:$0xff]   ;;  %7457 = vmatprep.subr.bf16.mxu1 %v7818_v2  ;;  %v7822_v6 = vld [vmem:[#allocation7 + $0xf0] sm:$0xff]  }
  0x59   : > { %277 = vst [vmem:[#allocation2 + $0xcc] sm:$0xf] %v8273_v0  ;;  %278 = vst [vmem:[#allocation2 + $0xd0] sm:$0xf] %v8273_v0  ;;  %6642 = vmatpush3.bf16.msra.mxu0 %v7819_v3  ;;  %7458 = vmatpush3.bf16.msra.mxu1 %v7818_v2  ;;  %v7824_v8 = vld [vmem:[#allocation7 + $0x168] sm:$0xff]   ;;  %v7826_v10 = vld [vmem:[#allocation7 + $0x120] sm:$0xff]  }
  0x5a   : > { %279 = vst [vmem:[#allocation2 + $0xd4] sm:$0x1] %v8273_v0  ;;  %393 = vst [vmem:[#allocation3] sm:$0xf] %v8273_v0  ;;  %6643 = vmatprep.subr.bf16.mxu0 %v7820_v4  ;;  %7459 = vmatprep.subr.bf16.mxu1 %v7821_v5  ;;  %v7825_v9 = vld [vmem:[#allocation7 + $0xe8] sm:$0xff]   ;;  %v7827_v11 = vld [vmem:[#allocation7 + $0x160] sm:$0xff]  }
  0x5b   : > { %394 = vst [vmem:[#allocation3 + $0x4] sm:$0xf] %v8273_v0  ;;  %395 = vst [vmem:[#allocation3 + $0x8] sm:$0x1] %v8273_v0  ;;  %v7828_v12 = vld [vmem:[#allocation7 + $0xe0] sm:$0xff]   ;;  %vm280_vm1 = vcmask 1040384  }
  0x5c   : > { %397 = vst [vmem:[#allocation3 + $0xcc] sm:$0xf] %v8273_v0  ;;  %398 = vst [vmem:[#allocation3 + $0xd0] sm:$0xf] %v8273_v0  ;;  %v7829_v13 = vld [vmem:[#allocation7 + $0x118] sm:$0xff]   ;;  %v7832_v17 = vld [vmem:[#allocation7 + $0x110] sm:$0xff]  }
  0x5d   : > { %399 = vst [vmem:[#allocation3 + $0xd4] sm:$0x1] %v8273_v0  ;;  %6644 = vmatpush3.bf16.msra.mxu0 %v7822_v6  ;;  %7460 = vmatpush3.bf16.msra.mxu1 %v7821_v5  ;;  %v7830_v14 = vld [vmem:[#allocation7 + $0x158] sm:$0xff]   ;;  %vm8459_vm2 = vmand %vm280_vm1, %vm281_vm0  ;;  %vm337_vm3 = vsmask.f32 7938  ;;  %v7833_v18 = vld [vmem:[#allocation7 + $0x150] sm:$0xff]  }
  0x5e   : > { %6645 = vmatprep.subr.bf16.mxu0 %v7823_v7  ;;  %7461 = vmatprep.subr.bf16.mxu1 %v7824_v8  ;;  %v7831_v16 = vld [vmem:[#allocation7 + $0xd8] sm:$0xff]   ;;  %vm8465_vm4 = vmand %vm280_vm1, %vm337_vm3  ;;  %vm540_vm5 = vsmask.f32 4368  ;;  %v7834_v20 = vld [vmem:[#allocation7 + $0xd0] sm:$0xff]   ;;  %vm863_vm6 = vcmask 1043456   ;;  %v10619_v48 = vmov 0 }
  0x5f   : > { %v7835_v21 = vld [vmem:[#allocation7 + $0x108] sm:$0xff]   ;;  %v7838_v24 = vld [vmem:[#allocation7 + $0x100] sm:$0xff]   ;;  %v286_v26 = vld [vmem:[#allocation2 + $0xc] sm:$0x1]  ;;  %v10622_v60 = vmov 0  ;;  %vm2529_vm10 = vcmask 1046528  }
  0x60   : > { %v7836_v22 = vld [vmem:[#allocation7 + $0x148] sm:$0xff]   ;;  %v7839_v25 = vld [vmem:[#allocation7 + $0x140] sm:$0xff]   ;;  %v287_v29 = vsel %vm8459_vm2, 0, %v286_v26  ;;  %v345_v37 = vld [vmem:[#allocation2 + $0x20] sm:$0x1]  ;;  %s6236_s14 = sshll.u32 %s8443_s30, 8 }
  0x61   : > { %6646 = vmatpush3.bf16.msra.mxu0 %v7825_v9  ;;  %7462 = vmatpush3.bf16.msra.mxu1 %v7824_v8  ;;  %v7837_v23 = vld [vmem:[#allocation7 + $0xc8] sm:$0xff]   ;;  %v342_v27 = vld [vmem:[#allocation2 + $0x14] sm:$0x1]  ;;  %v508_v28 = vld [vmem:[%s8447_s6] sm:$0xf]  ;;  %v346_v41 = vsel %vm8465_vm4, 0, %v345_v37 }
  0x62   : > { %6647 = vmatprep.subr.bf16.mxu0 %v7826_v10  ;;  %7463 = vmatprep.subr.bf16.mxu1 %v7827_v11  ;;  %v343_v30 = vsel %vm8465_vm4, 0, %v342_v27  ;;  %v509_v31 = vld [vmem:[%s8447_s6 + $0x4] sm:$0xf]  ;;  %v543_v32 = vshrl.u32 %v508_v28, 16  ;;  %v546_v33 = vshll.u32 %v508_v28, 16  ;;  %v8481_v47 = vld [vmem:[#allocation7 + $0xb8] sm:$0xff]   ;;  %vm8485_vm7 = vmor %vm281_vm0, %vm540_vm5 }
  0x63   : > { %288 = vst [vmem:[#allocation2 + $0xc] sm:$0x1] %v287_v29  ;;  %344 = vst [vmem:[#allocation2 + $0x14] sm:$0x1] %v343_v30  ;;  %v551_v34 = vshrl.u32 %v509_v31, 16  ;;  %v554_v35 = vshll.u32 %v509_v31, 16 }
  0x64   : > { %v289_v36 = vld [vmem:[#allocation2 + $0x18] sm:$0x1]  ;;  %v7840_v38 = vld [vmem:[#allocation7 + $0xc0] sm:$0xff]   ;;  %v545_v39 = vrot.slane %v543_v32, 7  ;;  %347 = vst [vmem:[#allocation2 + $0x20] sm:$0x1] %v346_v41  ;;  %vm8493_vm8 = vmand %vm863_vm6, %vm337_vm3 }
  0x65   : > { %6648 = vmatpush3.bf16.msra.mxu0 %v7828_v12  ;;  %7464 = vmatpush3.bf16.msra.mxu1 %v7827_v11  ;;  %v290_v40 = vsel %vm8459_vm2, 0, %v289_v36  ;;  %v510_v42 = vld [vmem:[%s8447_s6 + $0x8] sm:$0xf]  ;;  %v553_v43 = vrot.slane %v551_v34, 7  ;;  %v511_v44 = vld [vmem:[%s8447_s6 + $0xc] sm:$0xf] }
  0x66   : > { %6649 = vmatprep.subr.bf16.mxu0 %v7829_v13  ;;  %7465 = vmatprep.subr.bf16.mxu1 %v7830_v14  ;;  %291 = vst [vmem:[#allocation2 + $0x18] sm:$0x1] %v290_v40  ;;  %v560_v45 = vshrl.u32 %v510_v42, 16  ;;  %v563_v46 = vshll.u32 %v510_v42, 16  ;;  %v10620_v48 = vsel %vm8485_vm7, 4294967295, %v10619_v48  ;;  %v548_v49 = vor.u32 %v546_v33, %v545_v39  ;;  %v7850_v54 = vld [vmem:[#allocation7 + $0x78] sm:$0xff]  }
  0x67   : > { %10621 = vst [vmem:[#allocation14_spill] sm:$0xff] %v10620_v48  ;;  %v549_v50 = vrot.slane %v545_v39, 4  ;;  %v568_v51 = vshrl.u32 %v511_v44, 16  ;;  %v571_v52 = vshll.u32 %v511_v44, 16  ;;  %v283_v53 = vld [vmem:[#allocation2] sm:$0x1]  ;;  %v556_v55 = vor.u32 %v554_v35, %v553_v43 }
  0x68   : > { %v558_v56 = vrot.slane %v553_v43, 4  ;;  %v562_v57 = vrot.slane %v560_v45, 7  ;;  %v284_v58 = vsel %vm8459_vm2, 0, %v283_v53  ;;  %v339_v59 = vld [vmem:[#allocation2 + $0x8] sm:$0x1]  ;;  %v10623_v60 = vsel %vm8493_vm8, 4294967295, %v10622_v60 }
  0x69   : > { %6650 = vmatpush3.bf16.msra.mxu0 %v7831_v16  ;;  %7466 = vmatpush3.bf16.msra.mxu1 %v7830_v14  ;;  %10624 = vst [vmem:[#allocation15_spill] sm:$0xff] %v10623_v60  ;;  %v570_v61 = vrot.slane %v568_v51, 7  ;;  %285 = vst [vmem:[#allocation2] sm:$0x1] %v284_v58  ;;  %v340_v62 = vsel %vm8465_vm4, 0, %v339_v59  ;;  %v557_v0 = vsel %vm8485_vm7, %v549_v50, %v556_v55  ;;  %s10387_s7 = scalar_lea.vmem [#allocation10], %s6236_s14 }
  0x6a   : > { %6651 = vmatprep.subr.bf16.mxu0 %v7832_v17  ;;  %7467 = vmatprep.subr.bf16.mxu1 %v7833_v18  ;;  %v292_v63 = vld [vmem:[#allocation2 + $0x24] sm:$0x1]  ;;  %v565_v1 = vor.u32 %v563_v46, %v562_v57  ;;  %v566_v2 = vrot.slane %v562_v57, 4  ;;  %341 = vst [vmem:[#allocation2 + $0x8] sm:$0x1] %v340_v62  ;;  %s6561_s28 = sshll.u32 %s8328_s22, 12 }
  0x6b   : > { %v293_v3 = vsel %vm8459_vm2, 0, %v292_v63  ;;  %v348_v4 = vld [vmem:[#allocation2 + $0x2c] sm:$0x1]  ;;  %v512_v5 = vld [vmem:[%s8447_s6 + $0x10] sm:$0xf]  ;;  %v573_v8 = vor.u32 %v571_v52, %v570_v61  ;;  %v575_v9 = vrot.slane %v570_v61, 4  ;;  %s10540_s8 = scalar_lea.hbm %s10591_s5, %s6561_s28 }
  0x6c   : > { %v865_v6 = vld [vmem:[#allocation2 + $0xc] sm:$0xf]  ;;  %868 = vst [vmem:[#allocation2 + $0x10] sm:$0xf] %v557_v0  ;;  %v869_v7 = vld [vmem:[#allocation2 + $0x14] sm:$0x1] }
  0x6d   : > { %6652 = vmatpush3.bf16.msra.mxu0 %v7834_v20  ;;  %7468 = vmatpush3.bf16.msra.mxu1 %v7833_v18  ;;  %294 = vst [vmem:[#allocation2 + $0x24] sm:$0x1] %v293_v3  ;;  %v349_v10 = vsel %vm8465_vm4, 0, %v348_v4  ;;  %v866_v11 = vsel %vm8493_vm8, %v548_v49, %v865_v6  ;;  %v870_v12 = vsel %vm8459_vm2, %v558_v56, %v869_v7  ;;  %v978_v13 = vld [vmem:[#allocation2 + $0x4] sm:$0xf]  ;;  %v577_v16 = vshrl.u32 %v512_v5, 16 }
  0x6e   : > { %6653 = vmatprep.subr.bf16.mxu0 %v7835_v21  ;;  %7469 = vmatprep.subr.bf16.mxu1 %v7836_v22  ;;  %350 = vst [vmem:[#allocation2 + $0x2c] sm:$0x1] %v349_v10  ;;  %v513_v14 = vld [vmem:[%s8447_s6 + $0x14] sm:$0xf]  ;;  %v580_v17 = vshll.u32 %v512_v5, 16  ;;  %v574_v18 = vsel %vm8485_vm7, %v566_v2, %v573_v8  ;;  %s6132_s11 = sshll.u32 %s10387_s7, 4  ;;  %s10542_s11 = int_to_ptr.vmem [resolvable:$true] %s6132_s11 }
  0x6f   : > { %867 = vst [vmem:[#allocation2 + $0xc] sm:$0xf] %v866_v11  ;;  %871 = vst [vmem:[#allocation2 + $0x14] sm:$0x1] %v870_v12  ;;  %v872_v20 = vld [vmem:[#allocation2 + $0x18] sm:$0xf] }
  0x70   : > { %v876_v21 = vld [vmem:[#allocation2 + $0x20] sm:$0x1]  ;;  %875 = vst [vmem:[#allocation2 + $0x1c] sm:$0xf] %v574_v18  ;;  %v579_v26 = vrot.slane %v577_v16, 7  ;;  %s6119_s29 = scalar_lea.sflag [#allocation6], %s8443_s30 }
  0x71   : > { %6654 = vmatpush3.bf16.msra.mxu0 %v7837_v23  ;;  %7470 = vmatpush3.bf16.msra.mxu1 %v7836_v22  ;;  %v585_v22 = vshrl.u32 %v513_v14, 16  ;;  %v588_v23 = vshll.u32 %v513_v14, 16  ;;  %v977_v28 = vld [vmem:[#allocation2] sm:$0xf]  ;;  %v295_v37 = vld [vmem:[#allocation2 + $0x30] sm:$0x1] }
  0x72   : > { %6655 = vmatprep.subr.bf16.mxu0 %v7838_v24  ;;  %7471 = vmatprep.subr.bf16.mxu1 %v7839_v25  ;;  %v873_v24 = vsel %vm8493_vm8, %v565_v1, %v872_v20  ;;  %v582_v29 = vor.u32 %v580_v17, %v579_v26  ;;  %v583_v30 = vrot.slane %v579_v26, 4  ;;  %v8518_v31 = vcombine.low %v977_v28, %v978_v13  ;;  %v7846_v32 = vld [vmem:[#allocation2 + $0x8] ss:$0 sps:$4 sm:$0x11]   ;;  %v351_v62 = vld [vmem:[#allocation2 + $0x38] sm:$0x1] }
  0x73   : > { %874 = vst [vmem:[#allocation2 + $0x18] sm:$0xf] %v873_v24  ;;  %v587_v27 = vrot.slane %v585_v22, 7  ;;  %v980_v35 = vld [vmem:[#allocation2 + $0x10] sm:$0xf]  ;;  %v1250_v39 = vshll.u32 %v7846_v32, 16 }
  0x74   : > { %v879_v36 = vld [vmem:[#allocation2 + $0x24] sm:$0xf]  ;;  %vm1241_vm9 = vsmask.f32 7424  ;;  %v1243_v43 = vshrl.u32 %v8518_v31, 16  ;;  %v296_v46 = vsel %vm8459_vm2, 0, %v295_v37 }
  0x75   : > { %6656 = vmatpush3.bf16.msra.mxu0 %v7840_v38  ;;  %7472 = vmatpush3.bf16.msra.mxu1 %v7839_v25  ;;  %v877_v25 = vsel %vm8459_vm2, %v575_v9, %v876_v21  ;;  %v590_v33 = vor.u32 %v588_v23, %v587_v27  ;;  %v592_v34 = vrot.slane %v587_v27, 4  ;;  %v1245_v38 = vshll.u32 %v8518_v31, 16  ;;  %v883_v41 = vld [vmem:[#allocation2 + $0x2c] sm:$0x1]  ;;  %297 = vst [vmem:[#allocation2 + $0x30] sm:$0x1] %v296_v46 }
  0x76   : > { %7505 = vmatprep.subr.bf16.mxu0 %v8481_v47  ;;  %6777 = vmatprep.subr.bf16.mxu1 %v7850_v54  ;;  %878 = vst [vmem:[#allocation2 + $0x20] sm:$0x1] %v877_v25  ;;  %v979_v42 = vld [vmem:[#allocation2 + $0xc] sm:$0xf]  ;;  %v880_v44 = vsel %vm8493_vm8, %v582_v29, %v879_v36  ;;  %v1252_v54 = vrot.slane %v1250_v39, 1  ;;  %v352_v6 = vsel %vm8465_vm4, 0, %v351_v62 }
  0x77   : > { %v591_v40 = vsel %vm8485_vm7, %v583_v30, %v590_v33  ;;  %v884_v45 = vsel %vm8459_vm2, %v592_v34, %v883_v41  ;;  %v8530_v49 = vcombine.low %v979_v42, %v980_v35  ;;  %v7842_v50 = vld [vmem:[#allocation2 + $0x14] ss:$0 sps:$4 sm:$0x11]   ;;  %v982_v51 = vld [vmem:[#allocation2 + $0x1c] sm:$0xf]  ;;  %v1247_v52 = vrot.slane %v1245_v38, 1 }
  0x78   : > { %882 = vst [vmem:[#allocation2 + $0x28] sm:$0xf] %v591_v40  ;;  %881 = vst [vmem:[#allocation2 + $0x24] sm:$0xf] %v880_v44  ;;  %v1262_v57 = vshll.u32 %v7842_v50, 16  ;;  %v7862_v16 = vld [vmem:[#allocation7 + $0xb0] sm:$0xff]  }
  0x79   : > { %885 = vst [vmem:[#allocation2 + $0x2c] sm:$0x1] %v884_v45  ;;  %v1255_v55 = vshrl.u32 %v8530_v49, 16  ;;  %v1257_v56 = vshll.u32 %v8530_v49, 16  ;;  %v1248_v61 = vor.u32 %v1247_v52, %v1243_v43  ;;  %v514_v63 = vld [vmem:[%s8447_s6 + $0x18] sm:$0xf] }
  0x7a   : > { %v981_v53 = vld [vmem:[#allocation2 + $0x18] sm:$0xf]  ;;  %v515_v0 = vld [vmem:[%s8447_s6 + $0x1c] sm:$0xf]  ;;  %v1264_v2 = vrot.slane %v1262_v57, 1  ;;  %v594_v7 = vshrl.u32 %v514_v63, 16 }
  0x7b   : > { %v8534_v58 = vcombine.low %v981_v53, %v982_v51  ;;  %v1259_v1 = vrot.slane %v1257_v56, 1  ;;  %v298_v8 = vld [vmem:[#allocation2 + $0x3c] sm:$0x1]  ;;  %353 = vst [vmem:[#allocation2 + $0x38] sm:$0x1] %v352_v6  ;;  %v597_v12 = vshll.u32 %v514_v63, 16  ;;  %v1253_v18 = vsel %vm1241_vm9, %v1248_v61, %v1252_v54 }
  0x7c   : > { %v602_v13 = vshrl.u32 %v515_v0, 16  ;;  %v354_v14 = vld [vmem:[#allocation2 + $0x44] sm:$0x1]  ;;  %v596_v21 = vrot.slane %v594_v7, 7  ;;  %v886_v27 = vld [vmem:[#allocation2 + $0x30] sm:$0xf] }
  0x7d   : > { %v7844_v59 = vld [vmem:[#allocation2 + $0x20] ss:$0 sps:$4 sm:$0x11]   ;;  %v1267_v3 = vshrl.u32 %v8534_v58, 16  ;;  %v1269_v4 = vshll.u32 %v8534_v58, 16  ;;  %v1260_v9 = vor.u32 %v1259_v1, %v1255_v55  ;;  %v605_v30 = vshll.u32 %v515_v0, 16 }
  0x7e   : > { %v1274_v5 = vshll.u32 %v7844_v59, 16  ;;  %v604_v26 = vrot.slane %v602_v13, 7  ;;  %v599_v28 = vor.u32 %v597_v12, %v596_v21  ;;  %v600_v29 = vrot.slane %v596_v21, 4  ;;  %v516_v33 = vld [vmem:[%s8447_s6 + $0x20] sm:$0xf]  ;;  %v8558_v39 = vld [vmem:[#allocation7 + $0xa8] sm:$0xff]  }
  0x7f   : > { %v1271_v10 = vrot.slane %v1269_v4, 1  ;;  %v984_v11 = vld [vmem:[#allocation2 + $0x28] sm:$0xf]  ;;  %v983_v20 = vld [vmem:[#allocation2 + $0x24] sm:$0xf]  ;;  %v8544_v22 = vsel %vm1241_vm9, %v1260_v9, %v1264_v2  ;;  %v299_v32 = vsel %vm8459_vm2, 0, %v298_v8 }
  0x80   : > { %v1276_v17 = vrot.slane %v1274_v5, 1  ;;  %v8546_v24 = vcombine.low %v983_v20, %v984_v11  ;;  %v7848_v25 = vld [vmem:[#allocation2 + $0x2c] ss:$0 sps:$4 sm:$0x11]   ;;  %1701 = vmatprep.mubr.bf16.mxu0 %v8544_v22  ;;  %300 = vst [vmem:[#allocation2 + $0x3c] sm:$0x1] %v299_v32  ;;  %v607_v40 = vor.u32 %v605_v30, %v604_v26  ;;  %v887_v42 = vsel %vm8493_vm8, %v599_v28, %v886_v27 }
  0x81   : > { %v1272_v23 = vor.u32 %v1271_v10, %v1267_v3  ;;  %1702 = vmatmul.mubr.bf16.vlgmr.msra.gmra.mxu0 %v1253_v18  ;;  %v1286_v37 = vshll.u32 %v7848_v25, 16  ;;  %v517_v38 = vld [vmem:[%s8447_s6 + $0x24] sm:$0xf]  ;;  %v609_v41 = vrot.slane %v604_v26, 4  ;;  %v355_v43 = vsel %vm8465_vm4, 0, %v354_v14  ;;  %v7851_v55 = vld [vmem:[#allocation7 + $0x38] sm:$0xff]  }
  0x82   : > { %v1279_v35 = vshrl.u32 %v8546_v24, 16  ;;  %v1281_v36 = vshll.u32 %v8546_v24, 16  ;;  %7506 = vmatpush3.bf16.msra.mxu0 %v8481_v47  ;;  %888 = vst [vmem:[#allocation2 + $0x30] sm:$0xf] %v887_v42  ;;  %356 = vst [vmem:[#allocation2 + $0x44] sm:$0x1] %v355_v43  ;;  %v608_v47 = vsel %vm8485_vm7, %v600_v29, %v607_v40 }
  0x83   : > { %v8553_v34 = vsel %vm1241_vm9, %v1272_v23, %v1276_v17  ;;  %v1288_v45 = vrot.slane %v1286_v37, 1  ;;  %v611_v46 = vshrl.u32 %v516_v33, 16  ;;  %v614_v50 = vshll.u32 %v516_v33, 16  ;;  %7507 = vmatprep.subr.bf16.mxu0 %v7862_v16  ;;  %v890_v51 = vld [vmem:[#allocation2 + $0x38] sm:$0x1]  ;;  %v7856_v63 = vld [vmem:[#allocation7 + $0x70] sm:$0xff]  }
  0x84   : > { %7473 = vmatprep.mubr.bf16.mxu1 %v8553_v34  ;;  %v1283_v44 = vrot.slane %v1281_v36, 1  ;;  %1709 = vmatprep.mubr.bf16.mxu0 %v8553_v34  ;;  %v619_v52 = vshrl.u32 %v517_v38, 16  ;;  %v622_v53 = vshll.u32 %v517_v38, 16  ;;  %889 = vst [vmem:[#allocation2 + $0x34] sm:$0xf] %v608_v47  ;;  %v891_v56 = vsel %vm8459_vm2, %v609_v41, %v890_v51  ;;  %v7857_v6 = vld [vmem:[#allocation7 + $0x30] sm:$0xff]  }
  0x85   : > { %v613_v57 = vrot.slane %v611_v46, 7  ;;  %v301_v59 = vld [vmem:[#allocation2 + $0x48] sm:$0x1]  ;;  %v357_v61 = vld [vmem:[#allocation2 + $0x50] sm:$0x1]  ;;  %v7863_v25 = vld [vmem:[#allocation7 + $0x68] sm:$0xff]  }
  0x86   : > { %v1284_v54 = vor.u32 %v1283_v44, %v1279_v35  ;;  %892 = vst [vmem:[#allocation2 + $0x38] sm:$0x1] %v891_v56  ;;  %v621_v62 = vrot.slane %v619_v52, 7  ;;  %v302_v0 = vsel %vm8459_vm2, 0, %v301_v59  ;;  %v358_v1 = vsel %vm8465_vm4, 0, %v357_v61  ;;  %7508 = vmatpush3.bf16.msra.mxu0 %v7862_v16  ;;  %v7888_v16 = vld [vmem:[#allocation7 + $0xa0] sm:$0xff]  }
  0x87   : > { %v518_v2 = vld [vmem:[%s8447_s6 + $0x28] sm:$0xf]  ;;  %v616_v4 = vor.u32 %v614_v50, %v613_v57  ;;  %v617_v5 = vrot.slane %v613_v57, 4  ;;  %303 = vst [vmem:[#allocation2 + $0x48] sm:$0x1] %v302_v0  ;;  %7509 = vmatprep.subr.bf16.mxu0 %v8558_v39  ;;  %v7869_v44 = vld [vmem:[#allocation7 + $0x60] sm:$0xff]  }
  0x88   : > { %v8577_v3 = vsel %vm1241_vm9, %v1284_v54, %v1288_v45  ;;  %359 = vst [vmem:[#allocation2 + $0x50] sm:$0x1] %v358_v1  ;;  %v519_v7 = vld [vmem:[%s8447_s6 + $0x2c] sm:$0xf]  ;;  %v628_v8 = vshrl.u32 %v518_v2, 16  ;;  %v624_v10 = vor.u32 %v622_v53, %v621_v62  ;;  %v626_v11 = vrot.slane %v621_v62, 4 }
  0x89   : > { %v304_v9 = vld [vmem:[#allocation2 + $0x54] sm:$0x1]  ;;  %7474 = vmatmul.mubr.bf16.vlgmr.msra.gmra.mxu1 %v8577_v3  ;;  %v893_v12 = vld [vmem:[#allocation2 + $0x3c] sm:$0xf]  ;;  %v631_v13 = vshll.u32 %v518_v2, 16  ;;  %v636_v14 = vshrl.u32 %v519_v7, 16  ;;  %1710 = vmatmul.mubr.bf16.gmra.mxu0 %v8544_v22 }
  0x8a   : > { %6778 = vmatpush3.bf16.msra.mxu1 %v7851_v55  ;;  %v894_v17 = vsel %vm8493_vm8, %v616_v4, %v893_v12  ;;  %v630_v18 = vrot.slane %v628_v8, 7  ;;  %v639_v20 = vshll.u32 %v519_v7, 16  ;;  %v305_v21 = vsel %vm8459_vm2, 0, %v304_v9  ;;  %v360_v23 = vld [vmem:[#allocation2 + $0x5c] sm:$0x1]  ;;  %1717 = vmatprep.mubr.bf16.mxu0 %v8577_v3  ;;  %v7870_v59 = vld [vmem:[#allocation7 + $0x20] sm:$0xff]  }
  0x8b   : > { %v985_v26 = vld [vmem:[#allocation2 + $0x30] sm:$0xf]  ;;  %v625_v27 = vsel %vm8485_vm7, %v617_v5, %v624_v10  ;;  %895 = vst [vmem:[#allocation2 + $0x3c] sm:$0xf] %v894_v17  ;;  %v897_v28 = vld [vmem:[#allocation2 + $0x44] sm:$0x1]  ;;  %6779 = vmatprep.subr.bf16.mxu1 %v7856_v63  ;;  %7510 = vmatpush3.bf16.msra.mxu0 %v8558_v39 }
  0x8c   : > { %v638_v22 = vrot.slane %v636_v14, 7  ;;  %306 = vst [vmem:[#allocation2 + $0x54] sm:$0x1] %v305_v21  ;;  %v361_v29 = vsel %vm8465_vm4, 0, %v360_v23  ;;  %896 = vst [vmem:[#allocation2 + $0x40] sm:$0xf] %v625_v27  ;;  %v898_v30 = vsel %vm8459_vm2, %v626_v11, %v897_v28  ;;  %v633_v32 = vor.u32 %v631_v13, %v630_v18  ;;  %7511 = vmatprep.subr.bf16.mxu0 %v7888_v16 }
  0x8d   : > { %v634_v33 = vrot.slane %v630_v18, 4  ;;  %362 = vst [vmem:[#allocation2 + $0x5c] sm:$0x1] %v361_v29  ;;  %v520_v35 = vld [vmem:[%s8447_s6 + $0x30] sm:$0xf]  ;;  %v7864_v37 = vld [vmem:[#allocation7 + $0x28] sm:$0xff]  }
  0x8e   : > { %v521_v36 = vld [vmem:[%s8447_s6 + $0x34] sm:$0xf]  ;;  %v986_v38 = vld [vmem:[#allocation2 + $0x34] sm:$0xf]  ;;  %899 = vst [vmem:[#allocation2 + $0x44] sm:$0x1] %v898_v30  ;;  %v641_v40 = vor.u32 %v639_v20, %v638_v22  ;;  %6780 = vmatpush3.bf16.msra.mxu1 %v7857_v6 }
  0x8f   : > { %v643_v41 = vrot.slane %v638_v22, 4  ;;  %v645_v42 = vshrl.u32 %v520_v35, 16  ;;  %v648_v43 = vshll.u32 %v520_v35, 16  ;;  %v8597_v45 = vcombine.low %v985_v26, %v986_v38  ;;  %v7853_v46 = vld [vmem:[#allocation2 + $0x38] ss:$0 sps:$4 sm:$0x11]   ;;  %6781 = vmatprep.subr.bf16.mxu1 %v7863_v25  ;;  %7512 = vmatpush3.bf16.msra.mxu0 %v7888_v16 }
  0x90   : > { %v653_v50 = vshrl.u32 %v521_v36, 16  ;;  %v642_v47 = vsel %vm8485_vm7, %v634_v33, %v641_v40  ;;  %v900_v51 = vld [vmem:[#allocation2 + $0x48] sm:$0xf]  ;;  %v904_v52 = vld [vmem:[#allocation2 + $0x50] sm:$0x1]  ;;  %v656_v39 = vshll.u32 %v521_v36, 16 }
  0x91   : > { %v647_v53 = vrot.slane %v645_v42, 7  ;;  %v1291_v54 = vshrl.u32 %v8597_v45, 16  ;;  %v1293_v55 = vshll.u32 %v8597_v45, 16  ;;  %v1298_v56 = vshll.u32 %v7853_v46, 16  ;;  %903 = vst [vmem:[#allocation2 + $0x4c] sm:$0xf] %v642_v47  ;;  %1718 = vmatmul.mubr.bf16.gmra.mxu0 %v8553_v34 }
  0x92   : > { %v901_v57 = vsel %vm8493_vm8, %v633_v32, %v900_v51  ;;  %v7897_v61 = vld [vmem:[#allocation7 + $0x98] sm:$0xff]   ;;  %v905_v62 = vsel %vm8459_vm2, %v643_v41, %v904_v52  ;;  %v655_v1 = vrot.slane %v653_v50, 7  ;;  %v987_v5 = vld [vmem:[#allocation2 + $0x3c] sm:$0xf]  ;;  %6782 = vmatpush3.bf16.msra.mxu1 %v7864_v37  ;;  %v7899_v34 = vld [vmem:[#allocation7 + $0x90] sm:$0xff]   ;;  %p10700_p2 = scmp.ne.s32.totalorder %s10608_s23, 0 }
  0x93   : > { %902 = vst [vmem:[#allocation2 + $0x48] sm:$0xf] %v901_v57  ;;  %v650_v63 = vor.u32 %v648_v43, %v647_v53  ;;  %v651_v0 = vrot.slane %v647_v53, 4  ;;  %v1295_v2 = vrot.slane %v1293_v55, 1  ;;  %v1300_v4 = vrot.slane %v1298_v56, 1  ;;  %6783 = vmatprep.subr.bf16.mxu1 %v7869_v44  ;;  %v7876_v12 = vld [vmem:[#allocation7 + $0x58] sm:$0xff]   ;;  %7513 = vmatprep.subr.bf16.mxu0 %v7897_v61 }
  0x94   : > { %906 = vst [vmem:[#allocation2 + $0x50] sm:$0x1] %v905_v62  ;;  %v907_v6 = vld [vmem:[#allocation2 + $0x54] sm:$0xf]  ;;  %v988_v7 = vld [vmem:[#allocation2 + $0x40] sm:$0xf]  ;;  %v658_v8 = vor.u32 %v656_v39, %v655_v1  ;;  %7514 = vmatpush3.bf16.msra.mxu0 %v7897_v61 }
  0x95   : > { %v660_v9 = vrot.slane %v655_v1, 4  ;;  %v908_v10 = vsel %vm8493_vm8, %v650_v63, %v907_v6  ;;  %v911_v11 = vld [vmem:[#allocation2 + $0x5c] sm:$0x1]  ;;  %v1296_v13 = vor.u32 %v1295_v2, %v1291_v54  ;;  %v8610_v14 = vcombine.low %v987_v5, %v988_v7  ;;  %v7855_v16 = vld [vmem:[#allocation2 + $0x44] ss:$0 sps:$4 sm:$0x11]   ;;  %7515 = vmatprep.subr.bf16.mxu0 %v7899_v34 }
  0x96   : > { %909 = vst [vmem:[#allocation2 + $0x54] sm:$0xf] %v908_v10  ;;  %v7877_v17 = vld [vmem:[#allocation7 + $0x18] sm:$0xff]   ;;  %v659_v18 = vsel %vm8485_vm7, %v651_v0, %v658_v8  ;;  %v1310_v26 = vshll.u32 %v7855_v16, 16  ;;  %v307_v27 = vld [vmem:[#allocation2 + $0x60] sm:$0x1]  ;;  %6784 = vmatpush3.bf16.msra.mxu1 %v7870_v59 }
  0x97   : > { %v912_v20 = vsel %vm8459_vm2, %v660_v9, %v911_v11  ;;  %v8617_v21 = vsel %vm1241_vm9, %v1296_v13, %v1300_v4  ;;  %v1303_v23 = vshrl.u32 %v8610_v14, 16  ;;  %v1305_v25 = vshll.u32 %v8610_v14, 16  ;;  %910 = vst [vmem:[#allocation2 + $0x58] sm:$0xf] %v659_v18  ;;  %v7882_v28 = vld [vmem:[#allocation7 + $0x50] sm:$0xff]   ;;  %v7901_v32 = vld [vmem:[#allocation7 + $0x88] sm:$0xff]   ;;  %6785 = vmatprep.subr.bf16.mxu1 %v7876_v12 }
  0x98   : > { %913 = vst [vmem:[#allocation2 + $0x5c] sm:$0x1] %v912_v20  ;;  %7477 = vmatprep.mubr.bf16.mxu1 %v8617_v21  ;;  %v990_v22 = vld [vmem:[#allocation2 + $0x4c] sm:$0xf]  ;;  %1725 = vmatprep.mubr.bf16.mxu0 %v8617_v21  ;;  %v308_v29 = vsel %vm8459_vm2, 0, %v307_v27  ;;  %v1312_v35 = vrot.slane %v1310_v26, 1 }
  0x99   : > { %v363_v30 = vld [vmem:[#allocation2 + $0x68] sm:$0x1]  ;;  %v1307_v33 = vrot.slane %v1305_v25, 1  ;;  %309 = vst [vmem:[#allocation2 + $0x60] sm:$0x1] %v308_v29  ;;  %v7883_v38 = vld [vmem:[#allocation7 + $0x10] sm:$0xff]   ;;  %7516 = vmatpush3.bf16.msra.mxu0 %v7899_v34 }
  0x9a   : > { %v989_v36 = vld [vmem:[#allocation2 + $0x48] sm:$0xf]  ;;  %v364_v37 = vsel %vm8465_vm4, 0, %v363_v30  ;;  %v7889_v42 = vld [vmem:[#allocation7 + $0x48] sm:$0xff]   ;;  %7517 = vmatprep.subr.bf16.mxu0 %v7901_v32  ;;  %v523_v46 = vld [vmem:[%s8447_s6 + $0x3c] sm:$0xf]  ;;  %1726 = vmatmul.mubr.bf16.gmra.mxu0 %v8577_v3 }
  0x9b   : > { %v8627_v40 = vcombine.low %v989_v36, %v990_v22  ;;  %v7859_v41 = vld [vmem:[#allocation2 + $0x50] ss:$0 sps:$4 sm:$0x11]   ;;  %365 = vst [vmem:[#allocation2 + $0x68] sm:$0x1] %v364_v37  ;;  %v1308_v43 = vor.u32 %v1307_v33, %v1303_v23  ;;  %6786 = vmatpush3.bf16.msra.mxu1 %v7877_v17  ;;  %v670_v56 = vshrl.u32 %v523_v46, 16 }
  0x9c   : > { %v522_v44 = vld [vmem:[%s8447_s6 + $0x38] sm:$0xf]  ;;  %v310_v50 = vld [vmem:[#allocation2 + $0x6c] sm:$0x1]  ;;  %v1322_v52 = vshll.u32 %v7859_v41, 16  ;;  %6787 = vmatprep.subr.bf16.mxu1 %v7882_v28  ;;  %v673_v57 = vshll.u32 %v523_v46, 16 }
  0x9d   : > { %v1315_v47 = vshrl.u32 %v8627_v40, 16  ;;  %v1317_v51 = vshll.u32 %v8627_v40, 16  ;;  %v991_v53 = vld [vmem:[#allocation2 + $0x54] sm:$0xf]  ;;  %v662_v39 = vshrl.u32 %v522_v44, 16  ;;  %v8635_v54 = vsel %vm1241_vm9, %v1308_v43, %v1312_v35  ;;  %7518 = vmatpush3.bf16.msra.mxu0 %v7901_v32  ;;  %v7890_v9 = vld [vmem:[#allocation7 + $0x8] sm:$0xff]  }
  0x9e   : > { %v665_v55 = vshll.u32 %v522_v44, 16  ;;  %v366_v59 = vld [vmem:[#allocation2 + $0x74] sm:$0x1]  ;;  %7478 = vmatmul.mubr.bf16.gmra.mxu1 %v8635_v54  ;;  %v1324_v61 = vrot.slane %v1322_v52, 1  ;;  %v992_v62 = vld [vmem:[#allocation2 + $0x58] sm:$0xf]  ;;  %1733 = vmatprep.mubr.bf16.mxu0 %v8635_v54 }
  0x9f   : > { %v1319_v3 = vrot.slane %v1317_v51, 1  ;;  %v8639_v63 = vcombine.low %v991_v53, %v992_v62  ;;  %v7861_v0 = vld [vmem:[#allocation2 + $0x5c] ss:$0 sps:$4 sm:$0x11]   ;;  %v664_v1 = vrot.slane %v662_v39, 7  ;;  %v672_v2 = vrot.slane %v670_v56, 7  ;;  %6788 = vmatpush3.bf16.msra.mxu1 %v7883_v38 }
  0xa0   : > { %v311_v4 = vsel %vm8459_vm2, 0, %v310_v50  ;;  %v914_v6 = vld [vmem:[#allocation2 + $0x60] sm:$0xf]  ;;  %v367_v7 = vsel %vm8465_vm4, 0, %v366_v59  ;;  %v524_v8 = vld [vmem:[%s8447_s6 + $0x40] sm:$0xf]  ;;  %6789 = vmatprep.subr.bf16.mxu1 %v7889_v42 }
  0xa1   : > { %v1320_v5 = vor.u32 %v1319_v3, %v1315_v47  ;;  %312 = vst [vmem:[#allocation2 + $0x6c] sm:$0x1] %v311_v4  ;;  %v1327_v10 = vshrl.u32 %v8639_v63, 16  ;;  %v1329_v11 = vshll.u32 %v8639_v63, 16  ;;  %v1334_v12 = vshll.u32 %v7861_v0, 16  ;;  %v7895_v17 = vld [vmem:[#allocation7 + $0x40] sm:$0xff]  }
  0xa2   : > { %v667_v13 = vor.u32 %v665_v55, %v664_v1  ;;  %v918_v16 = vld [vmem:[#allocation2 + $0x68] sm:$0x1]  ;;  %368 = vst [vmem:[#allocation2 + $0x74] sm:$0x1] %v367_v7  ;;  %v668_v18 = vrot.slane %v664_v1, 4  ;;  %v675_v20 = vor.u32 %v673_v57, %v672_v2  ;;  %v677_v23 = vrot.slane %v672_v2, 4  ;;  %1734 = vmatmul.mubr.bf16.gmra.mxu0 %v8617_v21 }
  0xa3   : > { %v8649_v34 = vsel %vm1241_vm9, %v1320_v5, %v1324_v61  ;;  %v525_v25 = vld [vmem:[%s8447_s6 + $0x44] sm:$0xf]  ;;  %v1331_v26 = vrot.slane %v1329_v11, 1  ;;  %v1336_v27 = vrot.slane %v1334_v12, 1  ;;  %v679_v22 = vshrl.u32 %v524_v8, 16  ;;  %6790 = vmatpush3.bf16.msra.mxu1 %v7890_v9  ;;  %v8666_v50 = vld [vmem:[#allocation7 + $0x238] sm:$0xff]  }
  0xa4   : > { %7481 = vmatprep.mubr.bf16.mxu1 %v8649_v34  ;;  %v915_v28 = vsel %vm8493_vm8, %v667_v13, %v914_v6  ;;  %v7896_v29 = vld [vmem:[#allocation7] sm:$0xff]   ;;  %v676_v30 = vsel %vm8485_vm7, %v668_v18, %v675_v20  ;;  %v919_v32 = vsel %vm8459_vm2, %v677_v23, %v918_v16  ;;  %v682_v33 = vshll.u32 %v524_v8, 16  ;;  %1741 = vmatprep.mubr.bf16.mxu0 %v8649_v34  ;;  %v313_v38 = vld [vmem:[#allocation2 + $0x78] sm:$0x1]  ;;  %v369_v41 = vld [vmem:[#allocation2 + $0x80] sm:$0x1] }
  0xa5   : > { %916 = vst [vmem:[#allocation2 + $0x60] sm:$0xf] %v915_v28  ;;  %v687_v35 = vshrl.u32 %v525_v25, 16  ;;  %v1332_v36 = vor.u32 %v1331_v26, %v1327_v10  ;;  %917 = vst [vmem:[#allocation2 + $0x64] sm:$0xf] %v676_v30  ;;  %v681_v37 = vrot.slane %v679_v22, 7  ;;  %6791 = vmatprep.subr.bf16.mxu1 %v7895_v17 }
  0xa6   : > { %920 = vst [vmem:[#allocation2 + $0x68] sm:$0x1] %v919_v32  ;;  %v690_v21 = vshll.u32 %v525_v25, 16  ;;  %v314_v43 = vsel %vm8459_vm2, 0, %v313_v38  ;;  %v370_v44 = vsel %vm8465_vm4, 0, %v369_v41  ;;  %v7903_v62 = vld [vmem:[#allocation7 + $0x80] sm:$0xff]  }
  0xa7   : > { %v689_v42 = vrot.slane %v687_v35, 7  ;;  %v526_v46 = vld [vmem:[%s8447_s6 + $0x48] sm:$0xf]  ;;  %v8669_v47 = vsel %vm1241_vm9, %v1332_v36, %v1336_v27  ;;  %v684_v51 = vor.u32 %v682_v33, %v681_v37  ;;  %v685_v52 = vrot.slane %v681_v37, 4  ;;  %315 = vst [vmem:[#allocation2 + $0x78] sm:$0x1] %v314_v43  ;;  %6792 = vmatpush3.bf16.msra.mxu1 %v7896_v29  ;;  %7519 = vmatprep.subr.bf16.mxu0 %v7903_v62 }
  0xa8   : > { %v921_v53 = vld [vmem:[#allocation2 + $0x6c] sm:$0xf]  ;;  %371 = vst [vmem:[#allocation2 + $0x80] sm:$0x1] %v370_v44  ;;  %v527_v39 = vld [vmem:[%s8447_s6 + $0x4c] sm:$0xf]  ;;  %7482 = vmatmul.mubr.bf16.gmra.mxu1 %v8669_v47  ;;  %7553 = vmatprep.subr.bf16.mxu1 %v8666_v50 }
  0xa9   : > { %v696_v55 = vshrl.u32 %v526_v46, 16  ;;  %v692_v56 = vor.u32 %v690_v21, %v689_v42  ;;  %v694_v57 = vrot.slane %v689_v42, 4  ;;  %v925_v59 = vld [vmem:[#allocation2 + $0x74] sm:$0x1]  ;;  %v699_v3 = vshll.u32 %v526_v46, 16  ;;  %7520 = vmatpush3.bf16.msra.mxu0 %v7903_v62  ;;  %s8274_s22 = smov [#allocation10]  }
  0xaa   : > { %v704_v61 = vshrl.u32 %v527_v39, 16  ;;  %v922_v0 = vsel %vm8493_vm8, %v684_v51, %v921_v53  ;;  %v707_v2 = vshll.u32 %v527_v39, 16  ;;  %v316_v4 = vld [vmem:[#allocation2 + $0x84] sm:$0x1]  ;;  %v372_v5 = vld [vmem:[#allocation2 + $0x8c] sm:$0x1]  ;;  %1742 = vmatmul.mubr.bf16.gmra.mxu0 %v8635_v54 }
  0xab   : > { %v698_v1 = vrot.slane %v696_v55, 7  ;;  %v693_v6 = vsel %vm8485_vm7, %v685_v52, %v692_v56  ;;  %923 = vst [vmem:[#allocation2 + $0x6c] sm:$0xf] %v922_v0  ;;  %v926_v7 = vsel %vm8459_vm2, %v694_v57, %v925_v59  ;;  %v317_v9 = vsel %vm8459_vm2, 0, %v316_v4  ;;  %v528_v10 = vld [vmem:[%s8447_s6 + $0x50] sm:$0xf]  ;;  %1749 = vmatprep.mubr.bf16.mxu0 %v8669_v47 }
  0xac   : > { %v706_v8 = vrot.slane %v704_v61, 7  ;;  %v529_v11 = vld [vmem:[%s8447_s6 + $0x54] sm:$0xf]  ;;  %v993_v12 = vld [vmem:[#allocation2 + $0x60] sm:$0xf]  ;;  %v373_v17 = vsel %vm8465_vm4, 0, %v372_v5 }
  0xad   : > { %924 = vst [vmem:[#allocation2 + $0x70] sm:$0xf] %v693_v6  ;;  %927 = vst [vmem:[#allocation2 + $0x74] sm:$0x1] %v926_v7  ;;  %v701_v13 = vor.u32 %v699_v3, %v698_v1  ;;  %v702_v16 = vrot.slane %v698_v1, 4  ;;  %v713_v18 = vshrl.u32 %v528_v10, 16 }
  0xae   : > { %318 = vst [vmem:[#allocation2 + $0x84] sm:$0x1] %v317_v9  ;;  %v994_v20 = vld [vmem:[#allocation2 + $0x64] sm:$0xf]  ;;  %v709_v23 = vor.u32 %v707_v2, %v706_v8  ;;  %v711_v25 = vrot.slane %v706_v8, 4  ;;  %v716_v26 = vshll.u32 %v528_v10, 16 }
  0xaf   : > { %374 = vst [vmem:[#allocation2 + $0x8c] sm:$0x1] %v373_v17  ;;  %v8688_v27 = vcombine.low %v993_v12, %v994_v20  ;;  %v7866_v28 = vld [vmem:[#allocation2 + $0x68] ss:$0 sps:$4 sm:$0x11]   ;;  %v715_v22 = vrot.slane %v713_v18, 7 }
  0xb0   : > { %v721_v29 = vshrl.u32 %v529_v11, 16  ;;  %v724_v30 = vshll.u32 %v529_v11, 16  ;;  %v710_v32 = vsel %vm8485_vm7, %v702_v16, %v709_v23  ;;  %v928_v33 = vld [vmem:[#allocation2 + $0x78] sm:$0xf]  ;;  %v932_v35 = vld [vmem:[#allocation2 + $0x80] sm:$0x1] }
  0xb1   : > { %v1339_v54 = vshrl.u32 %v8688_v27, 16  ;;  %v1341_v36 = vshll.u32 %v8688_v27, 16  ;;  %v1346_v37 = vshll.u32 %v7866_v28, 16  ;;  %v929_v21 = vsel %vm8493_vm8, %v701_v13, %v928_v33  ;;  %931 = vst [vmem:[#allocation2 + $0x7c] sm:$0xf] %v710_v32  ;;  %s8202_s24 = sshll.u32 %s8274_s22, 4  ;;  %s8203_s24 = int_to_ptr.vmem [resolvable:$false] %s8202_s24 }
  0xb2   : > { %930 = vst [vmem:[#allocation2 + $0x78] sm:$0xf] %v929_v21  ;;  %v933_v38 = vsel %vm8459_vm2, %v711_v25, %v932_v35  ;;  %v718_v41 = vor.u32 %v716_v26, %v715_v22  ;;  %v719_v42 = vrot.slane %v715_v22, 4  ;;  %v723_v43 = vrot.slane %v721_v29, 7  ;;  %v995_v51 = vld [vmem:[#allocation2 + $0x6c] sm:$0xf]  ;;  %1750 = vmatmul.mubr.bf16.gmra.mxu0 %v8649_v34  ;;  %p8205_p13 = scmp.lt.s32.totalorder %s10542_s11, %s8203_s24 }
  0xb3   : > { %v1343_v44 = vrot.slane %v1341_v36, 1  ;;  %v1348_v46 = vrot.slane %v1346_v37, 1  ;;  %934 = vst [vmem:[#allocation2 + $0x80] sm:$0x1] %v933_v38  ;;  %v319_v0 = vld [vmem:[#allocation2 + $0x90] sm:$0x1] }
  0xb4   : > { %v996_v52 = vld [vmem:[#allocation2 + $0x70] sm:$0xf]  ;;  %v726_v53 = vor.u32 %v724_v30, %v723_v43  ;;  %v728_v39 = vrot.slane %v723_v43, 4  ;;  %v7868_v57 = vld [vmem:[#allocation2 + $0x74] ss:$0 sps:$4 sm:$0x11]  }
  0xb5   : > { %v1344_v55 = vor.u32 %v1343_v44, %v1339_v54  ;;  %v8698_v56 = vcombine.low %v995_v51, %v996_v52  ;;  %v935_v59 = vld [vmem:[#allocation2 + $0x84] sm:$0xf]  ;;  %v1358_v5 = vshll.u32 %v7868_v57, 16  ;;  %v375_v34 = vld [vmem:[#allocation2 + $0x98] sm:$0x1]  ;;  %v320_v8 = vsel %vm8459_vm2, 0, %v319_v0 }
  0xb6   : > { %v727_v3 = vsel %vm8485_vm7, %v719_v42, %v726_v53  ;;  %v936_v61 = vsel %vm8493_vm8, %v718_v41, %v935_v59  ;;  %v939_v62 = vld [vmem:[#allocation2 + $0x8c] sm:$0x1]  ;;  %v376_v9 = vsel %vm8465_vm4, 0, %v375_v34  ;;  %v530_v10 = vld [vmem:[%s8447_s6 + $0x58] sm:$0xf]  ;;  %s8204_s26 = scalar_lea.vmem %s8203_s24, 8192 }
  0xb7   : > { %v8706_v1 = vsel %vm1241_vm9, %v1344_v55, %v1348_v46  ;;  %v1351_v2 = vshrl.u32 %v8698_v56, 16  ;;  %v1353_v4 = vshll.u32 %v8698_v56, 16  ;;  %937 = vst [vmem:[#allocation2 + $0x84] sm:$0xf] %v936_v61  ;;  %938 = vst [vmem:[#allocation2 + $0x88] sm:$0xf] %v727_v3  ;;  %v940_v7 = vsel %vm8459_vm2, %v728_v39, %v939_v62 }
  0xb8   : > { %7485 = vmatprep.mubr.bf16.mxu1 %v8706_v1  ;;  %v998_v6 = vld [vmem:[#allocation2 + $0x7c] sm:$0xf]  ;;  %1757 = vmatprep.mubr.bf16.mxu0 %v8706_v1  ;;  %v1360_v12 = vrot.slane %v1358_v5, 1  ;;  %941 = vst [vmem:[#allocation2 + $0x8c] sm:$0x1] %v940_v7  ;;  %v730_v20 = vshrl.u32 %v530_v10, 16 }
  0xb9   : > { %v1355_v11 = vrot.slane %v1353_v4, 1  ;;  %v997_v13 = vld [vmem:[#allocation2 + $0x78] sm:$0xf]  ;;  %321 = vst [vmem:[#allocation2 + $0x90] sm:$0x1] %v320_v8  ;;  %v733_v25 = vshll.u32 %v530_v10, 16 }
  0xba   : > { %377 = vst [vmem:[#allocation2 + $0x98] sm:$0x1] %v376_v9  ;;  %v531_v16 = vld [vmem:[%s8447_s6 + $0x5c] sm:$0xf]  ;;  %v8720_v17 = vcombine.low %v997_v13, %v998_v6  ;;  %v322_v22 = vld [vmem:[#allocation2 + $0x9c] sm:$0x1]  ;;  %1758 = vmatmul.mubr.bf16.gmra.mxu0 %v8669_v47 }
  0xbb   : > { %v7872_v18 = vld [vmem:[#allocation2 + $0x80] ss:$0 sps:$4 sm:$0x11]   ;;  %v1356_v23 = vor.u32 %v1355_v11, %v1351_v2  ;;  %v738_v26 = vshrl.u32 %v531_v16, 16  ;;  %v741_v28 = vshll.u32 %v531_v16, 16  ;;  %v7905_v29 = vld [vmem:[#allocation7 + $0x1f8] sm:$0xff]  }
  0xbc   : > { %v1363_v30 = vshrl.u32 %v8720_v17, 16  ;;  %v1365_v32 = vshll.u32 %v8720_v17, 16  ;;  %v1370_v33 = vshll.u32 %v7872_v18, 16  ;;  %v732_v35 = vrot.slane %v730_v20, 7  ;;  %v378_v54 = vld [vmem:[#allocation2 + $0xa4] sm:$0x1]  ;;  %6913 = vmatprep.subr.bf16.mxu0 %v7905_v29 }
  0xbd   : > { %v8725_v36 = vsel %vm1241_vm9, %v1356_v23, %v1360_v12  ;;  %v740_v37 = vrot.slane %v738_v26, 7  ;;  %v323_v21 = vsel %vm8459_vm2, 0, %v322_v22  ;;  %v379_v38 = vsel %vm8465_vm4, 0, %v378_v54  ;;  %v532_v41 = vld [vmem:[%s8447_s6 + $0x60] sm:$0xf] }
  0xbe   : > { %7486 = vmatmul.mubr.bf16.gmra.mxu1 %v8725_v36  ;;  %v1367_v42 = vrot.slane %v1365_v32, 1  ;;  %v1372_v43 = vrot.slane %v1370_v33, 1  ;;  %v999_v44 = vld [vmem:[#allocation2 + $0x84] sm:$0xf]  ;;  %v1000_v46 = vld [vmem:[#allocation2 + $0x88] sm:$0xf]  ;;  %v735_v51 = vor.u32 %v733_v25, %v732_v35  ;;  %1765 = vmatprep.mubr.bf16.mxu0 %v8725_v36 }
  0xbf   : > { %324 = vst [vmem:[#allocation2 + $0x9c] sm:$0x1] %v323_v21  ;;  %380 = vst [vmem:[#allocation2 + $0xa4] sm:$0x1] %v379_v38  ;;  %v8735_v52 = vcombine.low %v999_v44, %v1000_v46  ;;  %v736_v53 = vrot.slane %v732_v35, 4  ;;  %v743_v39 = vor.u32 %v741_v28, %v740_v37  ;;  %v745_v55 = vrot.slane %v740_v37, 4 }
  0xc0   : > { %v533_v57 = vld [vmem:[%s8447_s6 + $0x64] sm:$0xf]  ;;  %v1368_v59 = vor.u32 %v1367_v42, %v1363_v30  ;;  %v7874_v47 = vld [vmem:[#allocation2 + $0x8c] ss:$0 sps:$4 sm:$0x11]   ;;  %v747_v3 = vshrl.u32 %v532_v41, 16 }
  0xc1   : > { %v1375_v61 = vshrl.u32 %v8735_v52, 16  ;;  %v1377_v62 = vshll.u32 %v8735_v52, 16  ;;  %v744_v0 = vsel %vm8485_vm7, %v736_v53, %v743_v39  ;;  %v942_v2 = vld [vmem:[#allocation2 + $0x90] sm:$0xf]  ;;  %v946_v4 = vld [vmem:[#allocation2 + $0x98] sm:$0x1] }
  0xc2   : > { %v8743_v5 = vsel %vm1241_vm9, %v1368_v59, %v1372_v43  ;;  %v1382_v34 = vshll.u32 %v7874_v47, 16  ;;  %v943_v6 = vsel %vm8493_vm8, %v735_v51, %v942_v2  ;;  %945 = vst [vmem:[#allocation2 + $0x94] sm:$0xf] %v744_v0  ;;  %v947_v7 = vsel %vm8459_vm2, %v745_v55, %v946_v4  ;;  %v325_v16 = vld [vmem:[#allocation2 + $0xa8] sm:$0x1]  ;;  %1766 = vmatmul.mubr.bf16.gmra.mxu0 %v8706_v1 }
  0xc3   : > { %7489 = vmatprep.mubr.bf16.mxu1 %v8743_v5  ;;  %v1379_v8 = vrot.slane %v1377_v62, 1  ;;  %944 = vst [vmem:[#allocation2 + $0x90] sm:$0xf] %v943_v6  ;;  %948 = vst [vmem:[#allocation2 + $0x98] sm:$0x1] %v947_v7  ;;  %v749_v9 = vrot.slane %v747_v3, 7  ;;  %1773 = vmatprep.mubr.bf16.mxu0 %v8743_v5 }
  0xc4   : > { %v750_v10 = vshll.u32 %v532_v41, 16  ;;  %v755_v11 = vshrl.u32 %v533_v57, 16  ;;  %v1384_v12 = vrot.slane %v1382_v34, 1  ;;  %v758_v13 = vshll.u32 %v533_v57, 16  ;;  %v381_v18 = vld [vmem:[#allocation2 + $0xb0] sm:$0x1] }
  0xc5   : > { %v1380_v20 = vor.u32 %v1379_v8, %v1375_v61  ;;  %v753_v25 = vrot.slane %v749_v9, 4  ;;  %v326_v29 = vsel %vm8459_vm2, 0, %v325_v16  ;;  %v382_v30 = vsel %vm8465_vm4, 0, %v381_v18  ;;  %v534_v32 = vld [vmem:[%s8447_s6 + $0x68] sm:$0xf] }
  0xc6   : > { %v752_v23 = vor.u32 %v750_v10, %v749_v9  ;;  %v757_v26 = vrot.slane %v755_v11, 7  ;;  %v949_v28 = vld [vmem:[#allocation2 + $0x9c] sm:$0xf]  ;;  %v953_v22 = vld [vmem:[#allocation2 + $0xa4] sm:$0x1]  ;;  %v764_v41 = vshrl.u32 %v534_v32, 16 }
  0xc7   : > { %v535_v33 = vld [vmem:[%s8447_s6 + $0x6c] sm:$0xf]  ;;  %v8759_v35 = vsel %vm1241_vm9, %v1380_v20, %v1384_v12  ;;  %327 = vst [vmem:[#allocation2 + $0xa8] sm:$0x1] %v326_v29  ;;  %383 = vst [vmem:[#allocation2 + $0xb0] sm:$0x1] %v382_v30 }
  0xc8   : > { %v760_v54 = vor.u32 %v758_v13, %v757_v26  ;;  %v762_v37 = vrot.slane %v757_v26, 4  ;;  %v950_v21 = vsel %vm8493_vm8, %v752_v23, %v949_v28  ;;  %v328_v1 = vld [vmem:[#allocation2 + $0xb4] sm:$0x1]  ;;  %v384_v38 = vld [vmem:[#allocation2 + $0xbc] sm:$0x1]  ;;  %7490 = vmatmul.mubr.bf16.gmra.mxu1 %v8759_v35  ;;  %v767_v42 = vshll.u32 %v534_v32, 16 }
  0xc9   : > { %951 = vst [vmem:[#allocation2 + $0x9c] sm:$0xf] %v950_v21  ;;  %v772_v43 = vshrl.u32 %v535_v33, 16  ;;  %v775_v44 = vshll.u32 %v535_v33, 16  ;;  %v536_v46 = vld [vmem:[%s8447_s6 + $0x70] sm:$0xf] }
  0xca   : > { %v1002_v51 = vld [vmem:[#allocation2 + $0x94] sm:$0xf]  ;;  %v761_v53 = vsel %vm8485_vm7, %v753_v25, %v760_v54  ;;  %v954_v39 = vsel %vm8459_vm2, %v762_v37, %v953_v22  ;;  %v329_v55 = vsel %vm8459_vm2, 0, %v328_v1  ;;  %v385_v57 = vsel %vm8465_vm4, 0, %v384_v38  ;;  %v537_v59 = vld [vmem:[%s8447_s6 + $0x74] sm:$0xf]  ;;  %1774 = vmatmul.mubr.bf16.gmra.mxu0 %v8725_v36 }
  0xcb   : > { %v1001_v47 = vld [vmem:[#allocation2 + $0x90] sm:$0xf]  ;;  %952 = vst [vmem:[#allocation2 + $0xa0] sm:$0xf] %v761_v53  ;;  %955 = vst [vmem:[#allocation2 + $0xa4] sm:$0x1] %v954_v39  ;;  %1781 = vmatprep.mubr.bf16.mxu0 %v8759_v35 }
  0xcc   : > { %v766_v3 = vrot.slane %v764_v41, 7  ;;  %v774_v61 = vrot.slane %v772_v43, 7  ;;  %330 = vst [vmem:[#allocation2 + $0xb4] sm:$0x1] %v329_v55  ;;  %386 = vst [vmem:[#allocation2 + $0xbc] sm:$0x1] %v385_v57  ;;  %v8774_v62 = vcombine.low %v1001_v47, %v1002_v51 }
  0xcd   : > { %v7879_v0 = vld [vmem:[#allocation2 + $0x98] ss:$0 sps:$4 sm:$0x11]   ;;  %v781_v2 = vshrl.u32 %v536_v46, 16  ;;  %v784_v4 = vshll.u32 %v536_v46, 16  ;;  %v789_v34 = vshrl.u32 %v537_v59, 16 }
  0xce   : > { %v769_v6 = vor.u32 %v767_v42, %v766_v3  ;;  %v770_v7 = vrot.slane %v766_v3, 4  ;;  %v777_v8 = vor.u32 %v775_v44, %v774_v61  ;;  %v779_v9 = vrot.slane %v774_v61, 4  ;;  %v956_v18 = vld [vmem:[#allocation2 + $0xa8] sm:$0xf]  ;;  %v960_v20 = vld [vmem:[#allocation2 + $0xb0] sm:$0x1] }
  0xcf   : > { %v1387_v10 = vshrl.u32 %v8774_v62, 16  ;;  %v1389_v11 = vshll.u32 %v8774_v62, 16  ;;  %v1394_v12 = vshll.u32 %v7879_v0, 16  ;;  %v783_v13 = vrot.slane %v781_v2, 7  ;;  %v331_v53 = vld [vmem:[#allocation2 + $0xc0] sm:$0x1] }
  0xd0   : > { %v778_v16 = vsel %vm8485_vm7, %v770_v7, %v777_v8  ;;  %v791_v23 = vrot.slane %v789_v34, 7  ;;  %v792_v25 = vshll.u32 %v537_v59, 16  ;;  %v1003_v22 = vld [vmem:[#allocation2 + $0x9c] sm:$0xf]  ;;  %v957_v29 = vsel %vm8493_vm8, %v769_v6, %v956_v18  ;;  %v387_v39 = vld [vmem:[#allocation2 + $0xc8] sm:$0x1] }
  0xd1   : > { %v1391_v26 = vrot.slane %v1389_v11, 1  ;;  %v1396_v28 = vrot.slane %v1394_v12, 1  ;;  %959 = vst [vmem:[#allocation2 + $0xac] sm:$0xf] %v778_v16  ;;  %v961_v30 = vsel %vm8459_vm2, %v779_v9, %v960_v20  ;;  %958 = vst [vmem:[#allocation2 + $0xa8] sm:$0xf] %v957_v29  ;;  %v786_v36 = vor.u32 %v784_v4, %v783_v13 }
  0xd2   : > { %962 = vst [vmem:[#allocation2 + $0xb0] sm:$0x1] %v961_v30  ;;  %v787_v32 = vrot.slane %v783_v13, 4  ;;  %v794_v33 = vor.u32 %v792_v25, %v791_v23  ;;  %v796_v54 = vrot.slane %v791_v23, 4  ;;  %v1004_v21 = vld [vmem:[#allocation2 + $0xa0] sm:$0xf]  ;;  %1782 = vmatmul.mubr.bf16.gmra.mxu0 %v8743_v5 }
  0xd3   : > { %v1392_v37 = vor.u32 %v1391_v26, %v1387_v10  ;;  %v963_v1 = vld [vmem:[#allocation2 + $0xb4] sm:$0xf]  ;;  %v8786_v38 = vcombine.low %v1003_v22, %v1004_v21  ;;  %v7881_v41 = vld [vmem:[#allocation2 + $0xa4] ss:$0 sps:$4 sm:$0x11]   ;;  %v332_v3 = vsel %vm8459_vm2, 0, %v331_v53 }
  0xd4   : > { %v795_v42 = vsel %vm8485_vm7, %v787_v32, %v794_v33  ;;  %v964_v43 = vsel %vm8493_vm8, %v786_v36, %v963_v1  ;;  %v967_v44 = vld [vmem:[#allocation2 + $0xbc] sm:$0x1]  ;;  %v538_v55 = vld [vmem:[%s8447_s6 + $0x78] sm:$0xf]  ;;  %v1406_v47 = vshll.u32 %v7881_v41, 16  ;;  %v388_v0 = vsel %vm8465_vm4, 0, %v387_v39 }
  0xd5   : > { %v8793_v46 = vsel %vm1241_vm9, %v1392_v37, %v1396_v28  ;;  %965 = vst [vmem:[#allocation2 + $0xb4] sm:$0xf] %v964_v43  ;;  %966 = vst [vmem:[#allocation2 + $0xb8] sm:$0xf] %v795_v42  ;;  %v968_v51 = vsel %vm8459_vm2, %v796_v54, %v967_v44  ;;  %v1399_v57 = vshrl.u32 %v8786_v38, 16  ;;  %v1401_v59 = vshll.u32 %v8786_v38, 16 }
  0xd6   : > { %7493 = vmatprep.mubr.bf16.mxu1 %v8793_v46  ;;  %969 = vst [vmem:[#allocation2 + $0xbc] sm:$0x1] %v968_v51  ;;  %v539_v61 = vld [vmem:[%s8447_s6 + $0x7c] sm:$0xf]  ;;  %333 = vst [vmem:[#allocation2 + $0xc0] sm:$0x1] %v332_v3  ;;  %1789 = vmatprep.mubr.bf16.mxu0 %v8793_v46 }
  0xd7   : > { %v798_v2 = vshrl.u32 %v538_v55, 16  ;;  %v801_v4 = vshll.u32 %v538_v55, 16  ;;  %v806_v34 = vshrl.u32 %v539_v61, 16  ;;  %v334_v6 = vld [vmem:[#allocation2 + $0xcc] sm:$0x1]  ;;  %v1403_v7 = vrot.slane %v1401_v59, 1 }
  0xd8   : > { %v1408_v8 = vrot.slane %v1406_v47, 1  ;;  %v1006_v9 = vld [vmem:[#allocation2 + $0xac] sm:$0xf]  ;;  %389 = vst [vmem:[#allocation2 + $0xc8] sm:$0x1] %v388_v0  ;;  %v809_v10 = vshll.u32 %v539_v61, 16 }
  0xd9   : > { %v335_v11 = vsel %vm8459_vm2, 0, %v334_v6  ;;  %v1005_v12 = vld [vmem:[#allocation2 + $0xa8] sm:$0xf]  ;;  %v800_v13 = vrot.slane %v798_v2, 7  ;;  %v808_v16 = vrot.slane %v806_v34, 7  ;;  %v1404_v18 = vor.u32 %v1403_v7, %v1399_v57 }
  0xda   : > { %336 = vst [vmem:[#allocation2 + $0xcc] sm:$0x1] %v335_v11  ;;  %v8810_v20 = vcombine.low %v1005_v12, %v1006_v9  ;;  %v7885_v23 = vld [vmem:[#allocation2 + $0xb0] ss:$0 sps:$4 sm:$0x11]   ;;  %1790 = vmatmul.mubr.bf16.gmra.mxu0 %v8759_v35 }
  0xdb   : > { %v390_v25 = vld [vmem:[#allocation2 + $0xd4] sm:$0x1]  ;;  %v804_v5 = vrot.slane %v800_v13, 4  ;;  %v811_v26 = vor.u32 %v809_v10, %v808_v16  ;;  %v1409_v28 = vsel %vm1241_vm9, %v1404_v18, %v1408_v8  ;;  %v1418_v30 = vshll.u32 %v7885_v23, 16  ;;  %v1012_v32 = vld [vmem:[#allocation2 + $0xd0] sm:$0xf] }
  0xdc   : > { %v1411_v22 = vshrl.u32 %v8810_v20, 16  ;;  %v1413_v29 = vshll.u32 %v8810_v20, 16  ;;  %v1007_v36 = vld [vmem:[#allocation2 + $0xb4] sm:$0xf]  ;;  %7494 = vmatmul.mubr.bf16.gmra.mxu1 %v1409_v28  ;;  %v1008_v33 = vld [vmem:[#allocation2 + $0xb8] sm:$0xf]  ;;  %v803_v54 = vor.u32 %v801_v4, %v800_v13  ;;  %1797 = vmatprep.mubr.bf16.mxu0 %v1409_v28 }
  0xdd   : > { %v812_v37 = vsel %vm8485_vm7, %v804_v5, %v811_v26  ;;  %v813_v21 = vrot.slane %v808_v16, 4  ;;  %v391_v1 = vsel %vm8465_vm4, 0, %v390_v25  ;;  %v1420_v42 = vrot.slane %v1418_v30, 1  ;;  %v7887_v44 = vld [vmem:[#allocation2 + $0xbc] ss:$0 sps:$4 sm:$0x11]  }
  0xde   : > { %v1415_v41 = vrot.slane %v1413_v29, 1  ;;  %v8819_v43 = vcombine.low %v1007_v36, %v1008_v33  ;;  %973 = vst [vmem:[#allocation2 + $0xc4] sm:$0xf] %v812_v37  ;;  %392 = vst [vmem:[#allocation2 + $0xd4] sm:$0x1] %v391_v1  ;;  %v1430_v59 = vshll.u32 %v7887_v44, 16 }
  0xdf   : > { %v970_v51 = vld [vmem:[#allocation2 + $0xc0] sm:$0xf]  ;;  %v974_v53 = vld [vmem:[#allocation2 + $0xc8] sm:$0x1]  ;;  %v7910_v1 = vld [vmem:[#allocation7 + $0x1e8] sm:$0xff]  }
  0xe0   : > { %v1416_v39 = vor.u32 %v1415_v41, %v1411_v22  ;;  %v1423_v55 = vshrl.u32 %v8819_v43, 16  ;;  %v1425_v57 = vshll.u32 %v8819_v43, 16  ;;  %v971_v3 = vsel %vm8493_vm8, %v803_v54, %v970_v51  ;;  %v7900_v33 = vld [vmem:[#allocation7 + $0x230] sm:$0xff]   ;;  %v7904_v54 = vld [vmem:[#allocation7 + $0x220] sm:$0xff]   ;;  %v7906_v37 = vld [vmem:[#allocation7 + $0x1b8] sm:$0xff]  }
  0xe1   : > { %v1011_v47 = vld [vmem:[#allocation2 + $0xcc] sm:$0xf]  ;;  %v975_v61 = vsel %vm8459_vm2, %v813_v21, %v974_v53  ;;  %v1432_v35 = vrot.slane %v1430_v59, 1  ;;  %972 = vst [vmem:[#allocation2 + $0xc0] sm:$0xf] %v971_v3  ;;  %v7912_v41 = vld [vmem:[#allocation7 + $0x210] sm:$0xff]  }
  0xe2   : > { %v8828_v0 = vcombine.low %v1011_v47, %v1012_v32  ;;  %v1421_v2 = vsel %vm1241_vm9, %v1416_v39, %v1420_v42  ;;  %v1427_v4 = vrot.slane %v1425_v57, 1  ;;  %976 = vst [vmem:[#allocation2 + $0xc8] sm:$0x1] %v975_v61  ;;  %1798 = vmatmul.mubr.bf16.gmra.mxu0 %v8793_v46  ;;  %v7907_v21 = vld [vmem:[#allocation7 + $0x218] sm:$0xff]   ;;  %v7911_v42 = vld [vmem:[#allocation7 + $0x1a8] sm:$0xff]   ;;  %v7914_v51 = vld [vmem:[#allocation7 + $0x1a0] sm:$0xff]  }
  0xe3   : > { %7497 = vmatprep.mubr.bf16.mxu1 %v1421_v2  ;;  %1805 = vmatprep.mubr.bf16.mxu0 %v1421_v2  ;;  %v7917_v44 = vld [vmem:[#allocation7 + $0x208] sm:$0xff]   ;;  %v7915_v53 = vld [vmem:[#allocation7 + $0x1d8] sm:$0xff]   ;;  %v7922_v39 = vld [vmem:[#allocation7 + $0x200] sm:$0xff]  }
  0xe4   : > { %v1449_v34 = vshll.u32 %v8828_v0, 16  ;;  %v1428_v6 = vor.u32 %v1427_v4, %v1423_v55  ;;  %v1447_v10 = vshrl.u32 %v8828_v0, 16  ;;  %v7916_v55 = vld [vmem:[#allocation7 + $0x198] sm:$0xff]   ;;  %v7919_v57 = vld [vmem:[#allocation7 + $0x190] sm:$0xff]   ;;  %v7920_v59 = vld [vmem:[#allocation7 + $0x1c8] sm:$0xff]  }
  0xe5   : > { %v1010_v7 = vld [vmem:[#allocation2 + $0xc4] sm:$0xf]  ;;  %v7894_v9 = vld [vmem:[#allocation2 + $0xd4] ss:$0 sps:$4 sm:$0x11]   ;;  %v7921_v47 = vld [vmem:[#allocation7 + $0x188] sm:$0xff]  }
  0xe6   : > { %v1433_v8 = vsel %vm1241_vm9, %v1428_v6, %v1432_v35  ;;  %v1451_v11 = vrot.slane %v1449_v34, 1  ;;  %v1454_v12 = vshll.u32 %v7894_v9, 16  ;;  %v7923_v3 = vld [vmem:[#allocation7 + $0x1c0] sm:$0xff]   ;;  %v2457_v35 = vld [vmem:[#allocation2] sm:$0xe] }
  0xe7   : > { %7498 = vmatmul.mubr.bf16.gmra.mxu1 %v1433_v8  ;;  %v8068_v4 = vld [vmem:[#allocation2 + $0x14] ss:$0 sps:$4 sm:$0x11]   ;;  %v2459_v34 = vld [vmem:[#allocation2 + $0x18] sm:$0xe] }
  0xe8   : > { %v1009_v13 = vld [vmem:[#allocation2 + $0xc0] sm:$0xf]  ;;  %v1456_v26 = vrot.slane %v1454_v12, 1  ;;  %v1452_v22 = vor.u32 %v1451_v11, %v1447_v10  ;;  %v8069_v6 = vld [vmem:[#allocation2 + $0x4] sm:$0xf] }
  0xe9   : > { %v8835_v16 = vcombine.low %v1009_v13, %v1010_v7  ;;  %v7892_v18 = vld [vmem:[#allocation2 + $0xc8] ss:$0 sps:$4 sm:$0x11]   ;;  %v6321_v7 = vcombine.low %v2457_v35, %v8069_v6  ;;  %v2463_v6 = vld [vmem:[#allocation2 + $0x48] sm:$0xe] }
  0xea   : > { %v1442_v5 = vshll.u32 %v7892_v18, 16  ;;  %1806 = vmatmul.mubr.bf16.gmra.mxu0 %v1409_v28  ;;  %v1457_v46 = vsel %vm1241_vm9, %v1452_v22, %v1456_v26  ;;  %v7902_v28 = vld [vmem:[#allocation7 + $0x228] sm:$0xff]   ;;  %v8071_v11 = vld [vmem:[#allocation2 + $0x8] ss:$0 sps:$4 sm:$0x11]  }
  0xeb   : > { %v1435_v23 = vshrl.u32 %v8835_v16, 16  ;;  %v1437_v25 = vshll.u32 %v8835_v16, 16  ;;  %1813 = vmatprep.mubr.bf16.mxu0 %v1433_v8  ;;  %v2530_v10 = vrot.slane %v6321_v7, 1  ;;  %v2531_v12 = vrot.slane %v8071_v11, 1  ;;  %v8073_v26 = vld [vmem:[#allocation2 + $0x28] sm:$0xf] }
  0xec   : > { %v1444_v30 = vrot.slane %v1442_v5, 1  ;;  %v8072_v18 = vld [vmem:[#allocation2 + $0x20] ss:$0 sps:$4 sm:$0x11]   ;;  %v8079_v11 = vld [vmem:[#allocation2 + $0x4c] sm:$0xf] }
  0xed   : > { %v1439_v29 = vrot.slane %v1437_v25, 1  ;;  %v2460_v25 = vld [vmem:[#allocation2 + $0x24] sm:$0xe] }
  0xee   : > { %v6324_v22 = vcombine.low %v2460_v25, %v8073_v26  ;;  %v8080_v25 = vld [vmem:[#allocation2 + $0x50] ss:$0 sps:$4 sm:$0x11]  }
  0xef   : > { %v1440_v36 = vor.u32 %v1439_v29, %v1435_v23  ;;  %v2537_v23 = vrot.slane %v8072_v18, 1 }
  0xf1   : > { %v1445_v32 = vsel %vm1241_vm9, %v1440_v36, %v1444_v30  ;;  %v2539_v36 = vrot.slane %v6324_v22, 1 }
  0xf2   : > { %7501 = vmatprep.mubr.bf16.mxu1 %v1445_v32  ;;  %1814 = vmatmul.mubr.bf16.gmra.mxu0 %v1421_v2 }
  0xf3   : > { %7502 = vmatmul.mubr.bf16.gmra.mxu1 %v1457_v46  ;;  %1821 = vmatprep.mubr.bf16.mxu0 %v1445_v32  ;;  %v8074_v46 = vld [vmem:[#allocation2 + $0x2c] ss:$0 sps:$4 sm:$0x11]  }
  0xf4   : > { %2167 = vmatprep.mubr.bf16.mxu1 %v8530_v49  ;;  %v2540_v32 = vrot.slane %v8074_v46, 1 }
  0xfa   : > { %1822 = vmatmul.mubr.bf16.gmra.mxu0 %v1433_v8  ;;  %v8070_v8 = vld [vmem:[#allocation2 + $0x1c] sm:$0xf] }
  0xfb   : > { %2168 = vmatmul.mubr.bf16.vlgmr.msra.gmra.mxu1 %v8518_v31  ;;  %7521 = vmatprep.mubr.bf16.mxu0 %v8534_v58  ;;  %v7908_v31 = vld [vmem:[#allocation7 + $0x1f0] sm:$0xff]   ;;  %v6323_v9 = vcombine.low %v2459_v34, %v8070_v8 }
  0xfc   : > { %7554 = vmatpush3.bf16.msra.mxu1 %v8666_v50  ;;  %2175 = vmatprep.mubr.bf16.mxu1 %v8534_v58  ;;  %v7909_v50 = vld [vmem:[#allocation7 + $0x1b0] sm:$0xff]  }
  0xfd   : > { %7555 = vmatprep.subr.bf16.mxu1 %v7900_v33  ;;  %v2536_v13 = vrot.slane %v6323_v9, 1 }
  0xff   : > { %v8882_v5 = vsel %vm2529_vm10, %v2536_v13, %v2537_v23 }
 0x100   : > { %7556 = vmatpush3.bf16.msra.mxu1 %v7900_v33  ;;  %v2461_v33 = vld [vmem:[#allocation2 + $0x30] sm:$0xe] }
 0x101   : > { %7557 = vmatprep.subr.bf16.mxu1 %v7902_v28 }
 0x102   : > { %7522 = vmatmul.mubr.bf16.vlgmr.msra.gmra.mxu0 %v8546_v24 }
 0x103   : > { %2176 = vmatmul.mubr.bf16.gmra.mxu1 %v8530_v49  ;;  %6914 = vmatpush3.bf16.msra.mxu0 %v7906_v37  ;;  %v7913_v49 = vld [vmem:[#allocation7 + $0x1e0] sm:$0xff]  }
 0x104   : > { %2183 = vmatprep.mubr.bf16.mxu1 %v8546_v24  ;;  %7558 = vmatpush3.bf16.msra.mxu1 %v7902_v28 }
 0x105   : > { %7559 = vmatprep.subr.bf16.mxu1 %v7904_v54  ;;  %7525 = vmatprep.mubr.bf16.mxu0 %v8597_v45 }
 0x106   : > { %6915 = vmatprep.subr.bf16.mxu0 %v7908_v31 }
 0x107   : > { %6916 = vmatpush3.bf16.msra.mxu0 %v7909_v50  ;;  %v8075_v50 = vld [vmem:[#allocation2 + $0x34] sm:$0xf] }
 0x108   : > { %7560 = vmatpush3.bf16.msra.mxu1 %v7904_v54  ;;  %6917 = vmatprep.subr.bf16.mxu0 %v7910_v1  ;;  %v6325_v1 = vcombine.low %v2461_v33, %v8075_v50  ;;  %v8081_v33 = vld [vmem:[#allocation2 + $0x58] sm:$0xf] }
 0x109   : > { %7561 = vmatprep.subr.bf16.mxu1 %v7907_v21 }
 0x10a   : > { %7526 = vmatmul.mubr.bf16.gmra.mxu0 %v8610_v14 }
 0x10b   : > { %2184 = vmatmul.mubr.bf16.gmra.mxu1 %v8534_v58  ;;  %7529 = vmatprep.mubr.bf16.mxu0 %v8627_v40  ;;  %v7918_v58 = vld [vmem:[#allocation7 + $0x1d0] sm:$0xff]  }
 0x10c   : > { %2191 = vmatprep.mubr.bf16.mxu1 %v8597_v45  ;;  %7562 = vmatpush3.bf16.msra.mxu1 %v7907_v21  ;;  %v8890_v21 = vsel %vm2529_vm10, %v2539_v36, %v2540_v32 }
 0x10d   : > { %7563 = vmatprep.subr.bf16.mxu1 %v7912_v41  ;;  %6918 = vmatpush3.bf16.msra.mxu0 %v7911_v42 }
 0x10e   : > { %6919 = vmatprep.subr.bf16.mxu0 %v7913_v49 }
 0x110   : > { %7564 = vmatpush3.bf16.msra.mxu1 %v7912_v41 }
 0x111   : > { %7565 = vmatprep.subr.bf16.mxu1 %v7917_v44  ;;  %6920 = vmatpush3.bf16.msra.mxu0 %v7914_v51  ;;  %v2542_v51 = vrot.slane %v6325_v1, 1 }
 0x112   : > { %6921 = vmatprep.subr.bf16.mxu0 %v7915_v53  ;;  %7530 = vmatmul.mubr.bf16.gmra.mxu0 %v8639_v63  ;;  %v8076_v53 = vld [vmem:[#allocation2 + $0x38] ss:$0 sps:$4 sm:$0x11]  }
 0x113   : > { %2192 = vmatmul.mubr.bf16.gmra.mxu1 %v8546_v24  ;;  %7533 = vmatprep.mubr.bf16.mxu0 %v8688_v27  ;;  %v7924_v24 = vld [vmem:[#allocation7 + $0x180] sm:$0xff]  }
 0x114   : > { %2199 = vmatprep.mubr.bf16.mxu1 %v8610_v14  ;;  %7566 = vmatpush3.bf16.msra.mxu1 %v7917_v44 }
 0x115   : > { %7567 = vmatprep.subr.bf16.mxu1 %v7922_v39  ;;  %6922 = vmatpush3.bf16.msra.mxu0 %v7916_v55 }
 0x116   : > { %6923 = vmatprep.subr.bf16.mxu0 %v7918_v58  ;;  %v2462_v58 = vld [vmem:[#allocation2 + $0x3c] sm:$0xe] }
 0x118   : > { %7568 = vmatpush3.bf16.msra.mxu1 %v7922_v39  ;;  %v2543_v39 = vrot.slane %v8076_v53, 1 }
 0x119   : > { %6924 = vmatpush3.bf16.msra.mxu0 %v7919_v57 }
 0x11a   : > { %6925 = vmatprep.subr.bf16.mxu0 %v7920_v59  ;;  %7534 = vmatmul.mubr.bf16.gmra.mxu0 %v8698_v56 }
 0x11b   : > { %2200 = vmatmul.mubr.bf16.gmra.mxu1 %v8597_v45  ;;  %7537 = vmatprep.mubr.bf16.mxu0 %v8720_v17  ;;  %v2458_v45 = vld [vmem:[#allocation2 + $0xc] sm:$0xe] }
 0x11c   : > { %2207 = vmatprep.mubr.bf16.mxu1 %v8627_v40 }
 0x11d   : > { %6926 = vmatpush3.bf16.msra.mxu0 %v7921_v47 }
 0x11e   : > { %6927 = vmatprep.subr.bf16.mxu0 %v7923_v3  ;;  %v8900_v3 = vsel %vm2529_vm10, %v2542_v51, %v2543_v39  ;;  %v2465_v39 = vld [vmem:[#allocation2 + $0x60] sm:$0xe] }
 0x121   : > { %6928 = vmatpush3.bf16.msra.mxu0 %v7924_v24  ;;  %v8077_v24 = vld [vmem:[#allocation2 + $0x40] sm:$0xf] }
 0x122   : > { %7538 = vmatmul.mubr.bf16.gmra.mxu0 %v8735_v52 }
 0x123   : > { %2208 = vmatmul.mubr.bf16.gmra.mxu1 %v8610_v14  ;;  %7541 = vmatprep.mubr.bf16.mxu0 %v8774_v62  ;;  %v8067_v14 = vld [vmem:[#allocation2 + $0x10] sm:$0xf] }
 0x124   : > { %2215 = vmatprep.mubr.bf16.mxu1 %v8639_v63  ;;  %v6322_v61 = vcombine.low %v2458_v45, %v8067_v14  ;;  %v6326_v45 = vcombine.low %v2462_v58, %v8077_v24 }
 0x126   : > { %v2533_v2 = vrot.slane %v6322_v61, 1 }
 0x12a   : > { %7542 = vmatmul.mubr.bf16.gmra.mxu0 %v8786_v38 }
 0x12b   : > { %2216 = vmatmul.mubr.bf16.gmra.mxu1 %v8627_v40  ;;  %7545 = vmatprep.mubr.bf16.mxu0 %v8810_v20  ;;  %v2534_v40 = vrot.slane %v8068_v4, 1  ;;  %v2545_v4 = vrot.slane %v6326_v45, 1 }
 0x12c   : > { %2223 = vmatprep.mubr.bf16.mxu1 %v8688_v27 }
 0x132   : > { %7546 = vmatmul.mubr.bf16.gmra.mxu0 %v8819_v43 }
 0x133   : > { %2224 = vmatmul.mubr.bf16.gmra.mxu1 %v8639_v63  ;;  %7549 = vmatprep.mubr.bf16.mxu0 %v8835_v16  ;;  %v2535_v63 = vsel %vm2529_vm10, %v2533_v2, %v2534_v40  ;;  %v8078_v40 = vld [vmem:[#allocation2 + $0x44] ss:$0 sps:$4 sm:$0x11]  }
 0x134   : > { %2231 = vmatprep.mubr.bf16.mxu1 %v8698_v56  ;;  %v2546_v35 = vrot.slane %v8078_v40, 1 }
 0x136   : > { %v8911_v9 = vsel %vm2529_vm10, %v2545_v4, %v2546_v35 }
 0x13a   : > { %7550 = vmatmul.mubr.bf16.gmra.mxu0 %v8828_v0 }
 0x13b   : > { %2232 = vmatmul.mubr.bf16.gmra.mxu1 %v8688_v27  ;;  %2827 = vmatprep.mubr.bf16.mxu0 %v2535_v63  ;;  %v2532_v27 = vsel %vm2529_vm10, %v2530_v10, %v2531_v12  ;;  %v6327_v12 = vcombine.low %v2463_v6, %v8079_v11  ;;  %v8084_v6 = vld [vmem:[#allocation2 + $0x68] ss:$0 sps:$4 sm:$0x11]  }
 0x13c   : > { %2239 = vmatprep.mubr.bf16.mxu1 %v8720_v17 }
 0x141   : > { %v6657_v0 = vpop.f32.mrf.mxu0 }
 0x142   : > { %2828 = vmatmul.mubr.bf16.vlgmr.msra.gmra.mxu0 %v2532_v27  ;;  %v2548_v27 = vrot.slane %v6327_v12, 1 }
 0x143   : > { %2240 = vmatmul.mubr.bf16.gmra.mxu1 %v8698_v56  ;;  %2835 = vmatprep.mubr.bf16.mxu0 %v8882_v5  ;;  %v6658_v29 = vpop.f32.mrf.mxu0 }
 0x144   : > { %2247 = vmatprep.mubr.bf16.mxu1 %v8735_v52  ;;  %v6659_v30 = vadd.f32 %v6658_v29, %v6657_v0  ;;  %v2549_v0 = vrot.slane %v8080_v25, 1  ;;  %v2464_v29 = vld [vmem:[#allocation2 + $0x54] sm:$0xe] }
 0x145   : > { %v6660_v56 = vpop.f32.mrf.mxu0 }
 0x147   : > { %v6661_v28 = vpop.f32.mrf.mxu0 }
 0x148   : > { %v8887_v37 = vadd.f32 %v6661_v28, %v6660_v56  ;;  %v8922_v56 = vsel %vm2529_vm10, %v2548_v27, %v2549_v0  ;;  %v6328_v28 = vcombine.low %v2464_v29, %v8081_v33 }
 0x149   : > { %v7475_v54 = vpop.f32.mrf.mxu1  ;;  %v6663_v31 = vpop.f32.mrf.mxu0 }
 0x14a   : > { %2836 = vmatmul.mubr.bf16.gmra.mxu0 %v2535_v63 }
 0x14b   : > { %2248 = vmatmul.mubr.bf16.gmra.mxu1 %v8720_v17  ;;  %v1864_v41 = vpop.f32.mrf.mxu1  ;;  %2843 = vmatprep.mubr.bf16.mxu0 %v8890_v21  ;;  %v6664_v17 = vpop.f32.mrf.mxu0 }
 0x14c   : > { %2255 = vmatprep.mubr.bf16.mxu1 %v8774_v62  ;;  %v8893_v42 = vadd.f32 %v6659_v30, %v1864_v41  ;;  %v6665_v49 = vadd.f32 %v6664_v17, %v6663_v31  ;;  %v2551_v17 = vrot.slane %v6328_v28, 1 }
 0x14d   : > { %v6666_v44 = vpop.f32.mrf.mxu0  ;;  %v7476_v47 = vpop.f32.mrf.mxu1 }
 0x14e   : > { %v8896_v55 = vadd.f32 %v7475_v54, %v6665_v49  ;;  %v8082_v49 = vld [vmem:[#allocation2 + $0x5c] ss:$0 sps:$4 sm:$0x11]  }
 0x14f   : > { %v6667_v57 = vpop.f32.mrf.mxu0  ;;  %v8908_v63 = vpop.f32.mrf.mxu1 }
 0x150   : > { %v6668_v59 = vadd.f32 %v6667_v57, %v6666_v44  ;;  %v2552_v44 = vrot.slane %v8082_v49, 1 }
 0x151   : > { %v6669_v14 = vpop.f32.mrf.mxu0 }
 0x152   : > { %2844 = vmatmul.mubr.bf16.gmra.mxu0 %v8882_v5  ;;  %v8903_v61 = vadd.f32 %v7476_v47, %v6668_v59  ;;  %v8933_v47 = vsel %vm2529_vm10, %v2551_v17, %v2552_v44 }
 0x153   : > { %2256 = vmatmul.mubr.bf16.gmra.mxu1 %v8735_v52  ;;  %2851 = vmatprep.mubr.bf16.mxu0 %v8900_v3  ;;  %v6670_v52 = vpop.f32.mrf.mxu0 }
 0x154   : > { %2263 = vmatprep.mubr.bf16.mxu1 %v8786_v38  ;;  %v6671_v2 = vadd.f32 %v6670_v52, %v6669_v14  ;;  %v8083_v14 = vld [vmem:[#allocation2 + $0x64] sm:$0xf] }
 0x155   : > { %v6672_v34 = vpop.f32.mrf.mxu0  ;;  %v6329_v52 = vcombine.low %v2465_v39, %v8083_v14 }
 0x157   : > { %v6673_v7 = vpop.f32.mrf.mxu0 }
 0x158   : > { %v6674_v8 = vadd.f32 %v6673_v7, %v6672_v34  ;;  %v2554_v34 = vrot.slane %v6329_v52, 1  ;;  %v2555_v7 = vrot.slane %v8084_v6, 1 }
 0x15a   : > { %v6675_v10 = vpop.f32.mrf.mxu0  ;;  %2852 = vmatmul.mubr.bf16.gmra.mxu0 %v8890_v21 }
 0x15b   : > { %2264 = vmatmul.mubr.bf16.gmra.mxu1 %v8774_v62  ;;  %2859 = vmatprep.mubr.bf16.mxu0 %v8911_v9 }
 0x15c   : > { %2271 = vmatprep.mubr.bf16.mxu1 %v8810_v20  ;;  %v6676_v13 = vpop.f32.mrf.mxu0 }
 0x15d   : > { %v6677_v62 = vadd.f32 %v6676_v13, %v6675_v10  ;;  %v2466_v10 = vld [vmem:[#allocation2 + $0x6c] sm:$0xe]  ;;  %v2556_v13 = vsel %vm2529_vm10, %v2554_v34, %v2555_v7 }
 0x15e   : > { %v7479_v18 = vpop.f32.mrf.mxu1  ;;  %v6678_v23 = vpop.f32.mrf.mxu0 }
 0x15f   : > { %v8916_v22 = vadd.f32 %v7479_v18, %v6677_v62  ;;  %v8085_v18 = vld [vmem:[#allocation2 + $0x70] sm:$0xf] }
 0x160   : > { %v1880_v26 = vpop.f32.mrf.mxu1  ;;  %v6679_v36 = vpop.f32.mrf.mxu0  ;;  %v6330_v62 = vcombine.low %v2466_v10, %v8085_v18  ;;  %v8090_v10 = vld [vmem:[#allocation2 + $0x8c] ss:$0 sps:$4 sm:$0x11]   ;;  %v2469_v18 = vld [vmem:[#allocation2 + $0x90] sm:$0xe] }
 0x161   : > { %v8919_v30 = vadd.f32 %v6671_v2, %v1880_v26  ;;  %v6680_v32 = vadd.f32 %v6679_v36, %v6678_v23  ;;  %v8086_v26 = vld [vmem:[#allocation2 + $0x74] ss:$0 sps:$4 sm:$0x11]  }
 0x162   : > { %v7480_v46 = vpop.f32.mrf.mxu1  ;;  %v6681_v54 = vpop.f32.mrf.mxu0  ;;  %2860 = vmatmul.mubr.bf16.gmra.mxu0 %v8900_v3  ;;  %v2558_v29 = vrot.slane %v8086_v26, 1  ;;  %v8091_v26 = vld [vmem:[#allocation2 + $0x94] sm:$0xf] }
 0x163   : > { %2272 = vmatmul.mubr.bf16.gmra.mxu1 %v8786_v38  ;;  %v8925_v31 = vadd.f32 %v7480_v46, %v6680_v32  ;;  %2867 = vmatprep.mubr.bf16.mxu0 %v8922_v56 }
 0x164   : > { %2279 = vmatprep.mubr.bf16.mxu1 %v8819_v43  ;;  %v1883_v38 = vpop.f32.mrf.mxu1  ;;  %v6682_v1 = vpop.f32.mrf.mxu0 }
 0x165   : > { %v8928_v50 = vadd.f32 %v6674_v8, %v1883_v38  ;;  %v6683_v41 = vadd.f32 %v6682_v1, %v6681_v54  ;;  %v8087_v54 = vld [vmem:[#allocation2 + $0x7c] sm:$0xf] }
 0x166   : > { %v6684_v51 = vpop.f32.mrf.mxu0 }
 0x168   : > { %v7483_v53 = vpop.f32.mrf.mxu1  ;;  %v6685_v58 = vpop.f32.mrf.mxu0 }
 0x169   : > { %v6686_v59 = vadd.f32 %v6685_v58, %v6684_v51 }
 0x16a   : > { %v1896_v57 = vpop.f32.mrf.mxu1  ;;  %v6687_v45 = vpop.f32.mrf.mxu0  ;;  %2868 = vmatmul.mubr.bf16.gmra.mxu0 %v8911_v9 }
 0x16b   : > { %2280 = vmatmul.mubr.bf16.gmra.mxu1 %v8810_v20  ;;  %v8935_v24 = vadd.f32 %v6683_v41, %v1896_v57  ;;  %2875 = vmatprep.mubr.bf16.mxu0 %v8933_v47  ;;  %v2468_v57 = vld [vmem:[#allocation2 + $0x84] sm:$0xe] }
 0x16c   : > { %2287 = vmatprep.mubr.bf16.mxu1 %v8835_v16  ;;  %v7484_v2 = vpop.f32.mrf.mxu1  ;;  %v6688_v20 = vpop.f32.mrf.mxu0 }
 0x16d   : > { %v6689_v40 = vadd.f32 %v6688_v20, %v6687_v45  ;;  %v8089_v20 = vld [vmem:[#allocation2 + $0x88] sm:$0xf] }
 0x16e   : > { %v1899_v4 = vpop.f32.mrf.mxu1  ;;  %v6690_v35 = vpop.f32.mrf.mxu0 }
 0x16f   : > { %v8939_v16 = vadd.f32 %v6686_v59, %v1899_v4  ;;  %v8942_v8 = vadd.f32 %v7483_v53, %v6689_v40  ;;  %v8088_v53 = vld [vmem:[#allocation2 + $0x80] ss:$0 sps:$4 sm:$0x11]   ;;  %v6332_v4 = vcombine.low %v2468_v57, %v8089_v20  ;;  %v8095_v20 = vld [vmem:[#allocation2 + $0xa4] ss:$0 sps:$4 sm:$0x11]  }
 0x170   : > { %v6691_v11 = vpop.f32.mrf.mxu0 }
 0x171   : > { %v6692_v12 = vadd.f32 %v6691_v11, %v6690_v35  ;;  %v2563_v7 = vrot.slane %v6332_v4, 1  ;;  %v2570_v4 = vrot.slane %v8095_v20, 1 }
 0x172   : > { %v6693_v23 = vpop.f32.mrf.mxu0  ;;  %2876 = vmatmul.mubr.bf16.gmra.mxu0 %v8922_v56 }
 0x173   : > { %2288 = vmatmul.mubr.bf16.gmra.mxu1 %v8819_v43  ;;  %v8947_v27 = vadd.f32 %v7484_v2, %v6692_v12  ;;  %2883 = vmatprep.mubr.bf16.mxu0 %v2556_v13  ;;  %v2557_v43 = vrot.slane %v6330_v62, 1 }
 0x174   : > { %7569 = vmatprep.mubr.bf16.mxu1 %v8882_v5  ;;  %v6694_v25 = vpop.f32.mrf.mxu0  ;;  %v2467_v5 = vld [vmem:[#allocation2 + $0x78] sm:$0xe] }
 0x175   : > { %v6695_v0 = vadd.f32 %v6694_v25, %v6693_v23  ;;  %v2559_v33 = vsel %vm2529_vm10, %v2557_v43, %v2558_v29  ;;  %v6331_v38 = vcombine.low %v2467_v5, %v8087_v54  ;;  %v6333_v29 = vcombine.low %v2469_v18, %v8091_v26  ;;  %v2470_v54 = vld [vmem:[#allocation2 + $0x9c] sm:$0xe] }
 0x176   : > { %v6696_v36 = vpop.f32.mrf.mxu0 }
 0x177   : > { %v2560_v51 = vrot.slane %v6331_v38, 1 }
 0x178   : > { %v6697_v46 = vpop.f32.mrf.mxu0 }
 0x179   : > { %v6698_v32 = vadd.f32 %v6697_v46, %v6696_v36 }
 0x17a   : > { %v6699_v28 = vpop.f32.mrf.mxu0  ;;  %2884 = vmatmul.mubr.bf16.gmra.mxu0 %v8933_v47 }
 0x17b   : > { %7570 = vmatmul.mubr.bf16.vlgmr.msra.gmra.mxu1 %v8890_v21  ;;  %2891 = vmatprep.mubr.bf16.mxu0 %v2559_v33 }
 0x17c   : > { %7573 = vmatprep.mubr.bf16.mxu1 %v8900_v3  ;;  %v6700_v41 = vpop.f32.mrf.mxu0  ;;  %v2561_v3 = vrot.slane %v8088_v53, 1  ;;  %v2471_v53 = vld [vmem:[#allocation2 + $0xa8] sm:$0xe] }
 0x17d   : > { %v6701_v49 = vadd.f32 %v6700_v41, %v6699_v28 }
 0x17e   : > { %v7487_v1 = vpop.f32.mrf.mxu1  ;;  %v6702_v21 = vpop.f32.mrf.mxu0  ;;  %v2562_v2 = vsel %vm2529_vm10, %v2560_v51, %v2561_v3 }
 0x17f   : > { %v8956_v58 = vadd.f32 %v7487_v1, %v6701_v49  ;;  %v8093_v49 = vld [vmem:[#allocation2 + $0xa0] sm:$0xf] }
 0x180   : > { %v1912_v17 = vpop.f32.mrf.mxu1  ;;  %v6703_v59 = vpop.f32.mrf.mxu0 }
 0x181   : > { %v8953_v44 = vadd.f32 %v6695_v0, %v1912_v17  ;;  %v6704_v14 = vadd.f32 %v6703_v59, %v6702_v21  ;;  %v6334_v21 = vcombine.low %v2470_v54, %v8093_v49  ;;  %v8094_v59 = vld [vmem:[#allocation2 + $0xac] sm:$0xf] }
 0x182   : > { %v7488_v39 = vpop.f32.mrf.mxu1  ;;  %v6705_v40 = vpop.f32.mrf.mxu0  ;;  %2892 = vmatmul.mubr.bf16.gmra.mxu0 %v2556_v13 }
 0x183   : > { %7574 = vmatmul.mubr.bf16.gmra.mxu1 %v8911_v9  ;;  %v8962_v35 = vadd.f32 %v7488_v39, %v6704_v14  ;;  %2899 = vmatprep.mubr.bf16.mxu0 %v2562_v2  ;;  %v2569_v14 = vrot.slane %v6334_v21, 1 }
 0x184   : > { %7577 = vmatprep.mubr.bf16.mxu1 %v8922_v56  ;;  %v1915_v45 = vpop.f32.mrf.mxu1  ;;  %v6706_v9 = vpop.f32.mrf.mxu0  ;;  %v2564_v56 = vrot.slane %v8090_v10, 1 }
 0x185   : > { %v8959_v52 = vadd.f32 %v6698_v32, %v1915_v45  ;;  %v6707_v6 = vadd.f32 %v6706_v9, %v6705_v40  ;;  %v2566_v32 = vrot.slane %v6333_v29, 1  ;;  %v6335_v45 = vcombine.low %v2471_v53, %v8094_v59  ;;  %v2474_v59 = vld [vmem:[#allocation2 + $0xcc] sm:$0xe] }
 0x186   : > { %v6708_v11 = vpop.f32.mrf.mxu0  ;;  %v2565_v0 = vsel %vm2529_vm10, %v2563_v7, %v2564_v56  ;;  %v8096_v7 = vld [vmem:[#allocation2 + $0xb0] ss:$0 sps:$4 sm:$0x11]   ;;  %v2472_v56 = vld [vmem:[#allocation2 + $0xb4] sm:$0xe] }
 0x187   : > { %v2573_v10 = vrot.slane %v8096_v7, 1  ;;  %v8101_v7 = vld [vmem:[#allocation2 + $0xd0] sm:$0xf] }
 0x188   : > { %v7491_v34 = vpop.f32.mrf.mxu1  ;;  %v6709_v23 = vpop.f32.mrf.mxu0 }
 0x189   : > { %v8967_v25 = vadd.f32 %v6709_v23, %v6708_v11  ;;  %v2473_v23 = vld [vmem:[#allocation2 + $0xc0] sm:$0xe] }
 0x18a   : > { %v1928_v12 = vpop.f32.mrf.mxu1  ;;  %v6711_v43 = vpop.f32.mrf.mxu0  ;;  %2900 = vmatmul.mubr.bf16.gmra.mxu0 %v2559_v33 }
 0x18b   : > { %7578 = vmatmul.mubr.bf16.gmra.mxu1 %v8933_v47  ;;  %v8965_v62 = vadd.f32 %v6707_v6, %v1928_v12  ;;  %2907 = vmatprep.mubr.bf16.mxu0 %v2565_v0  ;;  %v8092_v47 = vld [vmem:[#allocation2 + $0x98] ss:$0 sps:$4 sm:$0x11]   ;;  %v2571_v12 = vsel %vm2529_vm10, %v2569_v14, %v2570_v4  ;;  %v7942_v4 = vld [vmem:[#allocation9 + $0x138] sm:$0xff]  }
 0x18c   : > { %7581 = vmatprep.mubr.bf16.mxu1 %v2556_v13  ;;  %v6712_v36 = vpop.f32.mrf.mxu0  ;;  %v2567_v28 = vrot.slane %v8092_v47, 1  ;;  %v7492_v38 = vpop.f32.mrf.mxu1  ;;  %v8098_v47 = vld [vmem:[#allocation2 + $0xc4] sm:$0xf]  ;;  %7049 = vmatprep.subr.bf16.mxu1 %v7942_v4 }
 0x18d   : > { %v6713_v5 = vadd.f32 %v6712_v36, %v6711_v43  ;;  %v8097_v36 = vld [vmem:[#allocation2 + $0xb8] sm:$0xf] }
 0x18e   : > { %v6714_v46 = vpop.f32.mrf.mxu0  ;;  %v2568_v17 = vsel %vm2529_vm10, %v2566_v32, %v2567_v28  ;;  %v8975_v39 = vpop.f32.mrf.mxu1  ;;  %v6337_v28 = vcombine.low %v2473_v23, %v8098_v47 }
 0x18f   : > { %v8970_v13 = vadd.f32 %v7491_v34, %v6713_v5  ;;  %v6336_v5 = vcombine.low %v2472_v56, %v8097_v36 }
 0x190   : > { %v6715_v1 = vpop.f32.mrf.mxu0  ;;  %v2578_v53 = vrot.slane %v6337_v28, 1 }
 0x191   : > { %v6716_v41 = vadd.f32 %v6715_v1, %v6714_v46 }
 0x192   : > { %v6717_v51 = vpop.f32.mrf.mxu0  ;;  %2908 = vmatmul.mubr.bf16.gmra.mxu0 %v2562_v2 }
 0x193   : > { %7582 = vmatmul.mubr.bf16.gmra.mxu1 %v2559_v33  ;;  %v8973_v3 = vadd.f32 %v7492_v38, %v6716_v41  ;;  %2915 = vmatprep.mubr.bf16.mxu0 %v2568_v17  ;;  %v8099_v41 = vld [vmem:[#allocation2 + $0xbc] ss:$0 sps:$4 sm:$0x11]  }
 0x194   : > { %7585 = vmatprep.mubr.bf16.mxu1 %v2562_v2  ;;  %v6718_v33 = vpop.f32.mrf.mxu0  ;;  %v2572_v2 = vrot.slane %v6335_v45, 1  ;;  %v2576_v49 = vrot.slane %v8099_v41, 1 }
 0x195   : > { %v6719_v57 = vadd.f32 %v6718_v33, %v6717_v51  ;;  %v8100_v33 = vld [vmem:[#allocation2 + $0xc8] ss:$0 sps:$4 sm:$0x11]  }
 0x196   : > { %v6720_v40 = vpop.f32.mrf.mxu0  ;;  %v8983_v32 = vsel %vm2529_vm10, %v2572_v2, %v2573_v10  ;;  %v6338_v10 = vcombine.low %v2474_v59, %v8101_v7 }
 0x198   : > { %v6721_v34 = vpop.f32.mrf.mxu0  ;;  %v2581_v36 = vrot.slane %v6338_v10, 1 }
 0x199   : > { %v8977_v6 = vadd.f32 %v6721_v34, %v6720_v40  ;;  %v7943_v40 = vld [vmem:[#allocation9 + $0xf8] sm:$0xff]  }
 0x19a   : > { %v6723_v18 = vpop.f32.mrf.mxu0  ;;  %2916 = vmatmul.mubr.bf16.gmra.mxu0 %v2565_v0  ;;  %7050 = vmatpush3.bf16.msra.mxu1 %v7943_v40 }
 0x19b   : > { %7586 = vmatmul.mubr.bf16.gmra.mxu1 %v2565_v0  ;;  %2923 = vmatprep.mubr.bf16.mxu0 %v2571_v12  ;;  %v2575_v0 = vrot.slane %v6336_v5, 1  ;;  %v8102_v5 = vld [vmem:[#allocation2 + $0xd4] ss:$0 sps:$4 sm:$0x11]  }
 0x19c   : > { %v7495_v9 = vpop.f32.mrf.mxu1  ;;  %7589 = vmatprep.mubr.bf16.mxu1 %v2568_v17  ;;  %v6724_v29 = vpop.f32.mrf.mxu0 }
 0x19d   : > { %v6725_v46 = vadd.f32 %v6724_v29, %v6723_v18  ;;  %v2577_v34 = vsel %vm2529_vm10, %v2575_v0, %v2576_v49  ;;  %v7946_v0 = vld [vmem:[#allocation9 + $0xf0] sm:$0xff]  }
 0x19e   : > { %v1944_v11 = vpop.f32.mrf.mxu1  ;;  %v6726_v38 = vpop.f32.mrf.mxu0 }
 0x19f   : > { %v8980_v43 = vadd.f32 %v6719_v57, %v1944_v11  ;;  %v8987_v1 = vadd.f32 %v7495_v9, %v6725_v46  ;;  %v2579_v57 = vrot.slane %v8100_v33, 1  ;;  %v2582_v46 = vrot.slane %v8102_v5, 1 }
 0x1a0   : > { %v7496_v26 = vpop.f32.mrf.mxu1  ;;  %v6727_v21 = vpop.f32.mrf.mxu0 }
 0x1a1   : > { %v6728_v51 = vadd.f32 %v6727_v21, %v6726_v38  ;;  %v2580_v11 = vsel %vm2529_vm10, %v2578_v53, %v2579_v57  ;;  %v7945_v38 = vld [vmem:[#allocation9 + $0x130] sm:$0xff]   ;;  %v2583_v49 = vsel %vm2529_vm10, %v2581_v36, %v2582_v46 }
 0x1a2   : > { %v8985_v54 = vpop.f32.mrf.mxu1  ;;  %v6729_v14 = vpop.f32.mrf.mxu0  ;;  %2924 = vmatmul.mubr.bf16.gmra.mxu0 %v2568_v17  ;;  %v7944_v17 = vld [vmem:[#allocation9 + $0x178] sm:$0xff]   ;;  %7051 = vmatprep.subr.bf16.mxu1 %v7945_v38 }
 0x1a3   : > { %7590 = vmatmul.mubr.bf16.gmra.mxu1 %v2571_v12  ;;  %v8990_v20 = vadd.f32 %v7496_v26, %v6728_v51  ;;  %2931 = vmatprep.mubr.bf16.mxu0 %v8983_v32 }
 0x1a4   : > { %7593 = vmatprep.mubr.bf16.mxu1 %v8983_v32  ;;  %v6730_v2 = vpop.f32.mrf.mxu0  ;;  %7601 = vmatprep.subr.bf16.mxu0 %v7944_v17 }
 0x1a5   : > { %v6731_v56 = vadd.f32 %v6730_v2, %v6729_v14  ;;  %7602 = vmatpush3.bf16.msra.mxu0 %v7944_v17  ;;  %7052 = vmatpush3.bf16.msra.mxu1 %v7946_v0 }
 0x1a6   : > { %v8995_v18 = vpop.f32.mrf.mxu0 }
 0x1a7   : > { %v7499_v45 = vpop.f32.mrf.mxu1 }
 0x1a8   : > { %v8999_v29 = vpop.f32.mrf.mxu0 }
 0x1a9   : > { %v1960_v9 = vpop.f32.mrf.mxu1 }
 0x1aa   : > { %v8997_v26 = vadd.f32 %v6731_v56, %v1960_v9  ;;  %v6735_v47 = vpop.f32.mrf.mxu0  ;;  %2932 = vmatmul.mubr.bf16.gmra.mxu0 %v2571_v12  ;;  %v7947_v56 = vld [vmem:[#allocation9 + $0x128] sm:$0xff]  }
 0x1ab   : > { %v7500_v23 = vpop.f32.mrf.mxu1  ;;  %7594 = vmatmul.mubr.bf16.gmra.mxu1 %v2577_v34  ;;  %2939 = vmatprep.mubr.bf16.mxu0 %v2577_v34 }
 0x1ac   : > { %7597 = vmatprep.mubr.bf16.mxu1 %v2580_v11  ;;  %v6736_v41 = vpop.f32.mrf.mxu0  ;;  %7053 = vmatprep.subr.bf16.mxu1 %v7947_v56 }
 0x1ad   : > { %v9001_v28 = vpop.f32.mrf.mxu1  ;;  %v6737_v21 = vadd.f32 %v6736_v41, %v6735_v47  ;;  %v403_v47 = vld [vmem:[#allocation3 + $0xc] sm:$0x1] }
 0x1ae   : > { %v6738_v51 = vpop.f32.mrf.mxu0  ;;  %v404_v0 = vsel %vm8459_vm2, 0, %v403_v47 }
 0x1af   : > { %v9004_v33 = vadd.f32 %v7499_v45, %v6737_v21  ;;  %v7948_v45 = vld [vmem:[#allocation9 + $0xe8] sm:$0xff]   ;;  %405 = vst [vmem:[#allocation3 + $0xc] sm:$0x1] %v404_v0  ;;  %v457_v0 = vld [vmem:[#allocation3 + $0x14] sm:$0x1] }
 0x1b0   : > { %v6739_v57 = vpop.f32.mrf.mxu0  ;;  %7054 = vmatpush3.bf16.msra.mxu1 %v7948_v45 }
 0x1b1   : > { %v6740_v14 = vadd.f32 %v6739_v57, %v6738_v51  ;;  %v1868_v57 = vadd.f32 %v8887_v37, %v8908_v63 }
 0x1b2   : > { %v6741_v12 = vpop.f32.mrf.mxu0  ;;  %2940 = vmatmul.mubr.bf16.gmra.mxu0 %v8983_v32 }
 0x1b3   : > { %v7503_v53 = vpop.f32.mrf.mxu1  ;;  %7598 = vmatmul.mubr.bf16.gmra.mxu1 %v2583_v49  ;;  %v9007_v40 = vadd.f32 %v7500_v23, %v6740_v14  ;;  %2947 = vmatprep.mubr.bf16.mxu0 %v2580_v11  ;;  %v7949_v11 = vld [vmem:[#allocation9 + $0x170] sm:$0xff]  }
 0x1b4   : > { %v6742_v9 = vpop.f32.mrf.mxu0  ;;  %7603 = vmatprep.subr.bf16.mxu0 %v7949_v11 }
 0x1b5   : > { %v1976_v59 = vpop.f32.mrf.mxu1  ;;  %v6743_v7 = vadd.f32 %v6742_v9, %v6741_v12  ;;  %7604 = vmatpush3.bf16.msra.mxu0 %v7949_v11 }
 0x1b6   : > { %v9011_v10 = vpop.f32.mrf.mxu0 }
 0x1b7   : > { %v7504_v4 = vpop.f32.mrf.mxu1  ;;  %v9013_v36 = vadd.f32 %v6743_v7, %v1976_v59 }
 0x1b8   : > { %v9015_v5 = vpop.f32.mrf.mxu0 }
 0x1b9   : > { %v9009_v2 = vpop.f32.mrf.mxu1 }
 0x1ba   : > { %v6747_v23 = vpop.f32.mrf.mxu0  ;;  %2948 = vmatmul.mubr.bf16.gmra.mxu0 %v2577_v34 }
 0x1bb   : > { %v6793_v17 = vpop.f32.mrf.mxu1 }
 0x1bc   : > { %v6748_v41 = vpop.f32.mrf.mxu0 }
 0x1bd   : > { %v6794_v46 = vpop.f32.mrf.mxu1  ;;  %v6749_v51 = vadd.f32 %v6748_v41, %v6747_v23 }
 0x1be   : > { %v6795_v32 = vadd.f32 %v6794_v46, %v6793_v17  ;;  %v6750_v14 = vpop.f32.mrf.mxu0 }
 0x1bf   : > { %v6796_v38 = vpop.f32.mrf.mxu1  ;;  %v9022_v12 = vadd.f32 %v7503_v53, %v6749_v51 }
 0x1c0   : > { %v2170_v49 = vadd.f32 %v6795_v32, %v8893_v42  ;;  %v6751_v9 = vpop.f32.mrf.mxu0 }
 0x1c1   : > { %v6797_v21 = vpop.f32.mrf.mxu1  ;;  %v6752_v45 = vadd.f32 %v6751_v9, %v6750_v14  ;;  %v406_v14 = vld [vmem:[#allocation3 + $0x18] sm:$0x1] }
 0x1c2   : > { %v6798_v59 = vadd.f32 %v6797_v21, %v6796_v38  ;;  %v7523_v42 = vpop.f32.mrf.mxu0  ;;  %v458_v21 = vsel %vm8465_vm4, 0, %v457_v0  ;;  %v7950_v9 = vld [vmem:[#allocation9 + $0x120] sm:$0xff]   ;;  %v7953_v0 = vld [vmem:[#allocation9 + $0xd8] sm:$0xff]  }
 0x1c3   : > { %v6799_v34 = vpop.f32.mrf.mxu1  ;;  %v9026_v32 = vadd.f32 %v7504_v4, %v6752_v45  ;;  %459 = vst [vmem:[#allocation3 + $0x14] sm:$0x1] %v458_v21  ;;  %v407_v45 = vsel %vm8459_vm2, 0, %v406_v14  ;;  %7055 = vmatprep.subr.bf16.mxu1 %v7950_v9 }
 0x1c4   : > { %v9024_v7 = vadd.f32 %v6798_v59, %v1868_v57  ;;  %v2330_v11 = vpop.f32.mrf.mxu0  ;;  %408 = vst [vmem:[#allocation3 + $0x18] sm:$0x1] %v407_v45 }
 0x1c5   : > { %v6800_v56 = vpop.f32.mrf.mxu1  ;;  %v9029_v37 = vadd.f32 %v2330_v11, %v2170_v49 }
 0x1c6   : > { %v6801_v17 = vadd.f32 %v6800_v56, %v6799_v34  ;;  %v7524_v53 = vpop.f32.mrf.mxu0  ;;  %v7951_v56 = vld [vmem:[#allocation9 + $0xe0] sm:$0xff]  }
 0x1c7   : > { %v6802_v46 = vpop.f32.mrf.mxu1  ;;  %7056 = vmatpush3.bf16.msra.mxu1 %v7951_v56 }
 0x1c8   : > { %v2178_v23 = vadd.f32 %v6801_v17, %v8896_v55  ;;  %v9036_v57 = vpop.f32.mrf.mxu0 }
 0x1c9   : > { %v6803_v47 = vpop.f32.mrf.mxu1 }
 0x1ca   : > { %v6804_v63 = vadd.f32 %v6803_v47, %v6802_v46  ;;  %v9031_v38 = vadd.f32 %v7523_v42, %v2178_v23  ;;  %v7527_v49 = vpop.f32.mrf.mxu0  ;;  %v460_v47 = vld [vmem:[#allocation3 + $0x20] sm:$0x1] }
 0x1cb   : > { %v6805_v41 = vpop.f32.mrf.mxu1 }
 0x1cc   : > { %v2181_v51 = vadd.f32 %v6804_v63, %v8903_v61  ;;  %v2346_v42 = vpop.f32.mrf.mxu0 }
 0x1cd   : > { %v6806_v4 = vpop.f32.mrf.mxu1 }
 0x1ce   : > { %v6807_v55 = vadd.f32 %v6806_v4, %v6805_v41  ;;  %v9038_v59 = vadd.f32 %v7524_v53, %v2181_v51  ;;  %v7528_v11 = vpop.f32.mrf.mxu0  ;;  %v7952_v53 = vld [vmem:[#allocation9 + $0x118] sm:$0xff]   ;;  %v461_v41 = vsel %vm8465_vm4, 0, %v460_v47  ;;  %v7954_v51 = vld [vmem:[#allocation9 + $0x168] sm:$0xff]   ;;  %v463_v47 = vld [vmem:[#allocation3 + $0x2c] sm:$0x1] }
 0x1cf   : > { %v6808_v34 = vpop.f32.mrf.mxu1  ;;  %462 = vst [vmem:[#allocation3 + $0x20] sm:$0x1] %v461_v41  ;;  %v409_v4 = vld [vmem:[#allocation3 + $0x24] sm:$0x1]  ;;  %7057 = vmatprep.subr.bf16.mxu1 %v7952_v53  ;;  %7605 = vmatprep.subr.bf16.mxu0 %v7954_v51  ;;  %v454_v41 = vld [vmem:[#allocation3 + $0x8] sm:$0x1] }
 0x1d0   : > { %v2186_v17 = vadd.f32 %v6807_v55, %v8919_v30  ;;  %v9050_v30 = vpop.f32.mrf.mxu0  ;;  %v410_v14 = vsel %vm8459_vm2, 0, %v409_v4  ;;  %7058 = vmatpush3.bf16.msra.mxu1 %v7953_v0  ;;  %7606 = vmatpush3.bf16.msra.mxu0 %v7954_v51  ;;  %v455_v51 = vsel %vm8465_vm4, 0, %v454_v41  ;;  %v7959_v41 = vld [vmem:[#allocation9 + $0x160] sm:$0xff]  }
 0x1d1   : > { %v6809_v61 = vpop.f32.mrf.mxu1  ;;  %411 = vst [vmem:[#allocation3 + $0x24] sm:$0x1] %v410_v14  ;;  %456 = vst [vmem:[#allocation3 + $0x8] sm:$0x1] %v455_v51  ;;  %7607 = vmatprep.subr.bf16.mxu0 %v7959_v41 }
 0x1d2   : > { %v6810_v46 = vadd.f32 %v6809_v61, %v6808_v34  ;;  %v9043_v23 = vadd.f32 %v2346_v42, %v2186_v17  ;;  %v400_v34 = vld [vmem:[#allocation3] sm:$0x1]  ;;  %v9054_v56 = vpop.f32.mrf.mxu0  ;;  %v7955_v61 = vld [vmem:[#allocation9 + $0x110] sm:$0xff]  }
 0x1d3   : > { %v6811_v63 = vpop.f32.mrf.mxu1  ;;  %7059 = vmatprep.subr.bf16.mxu1 %v7955_v61 }
 0x1d4   : > { %10625 = vst [vmem:[#allocation16_spill] sm:$0xff] %v9043_v23  ;;  %v9048_v21 = vadd.f32 %v6810_v46, %v8928_v50  ;;  %v401_v50 = vsel %vm8459_vm2, 0, %v400_v34  ;;  %v2362_v42 = vpop.f32.mrf.mxu0  ;;  %v7956_v46 = vld [vmem:[#allocation9 + $0xd0] sm:$0xff]   ;;  %7608 = vmatpush3.bf16.msra.mxu0 %v7959_v41 }
 0x1d5   : > { %v6812_v55 = vpop.f32.mrf.mxu1  ;;  %402 = vst [vmem:[#allocation3] sm:$0x1] %v401_v50  ;;  %7060 = vmatpush3.bf16.msra.mxu1 %v7956_v46  ;;  %v412_v50 = vld [vmem:[#allocation3 + $0x30] sm:$0x1] }
 0x1d6   : > { %v6813_v9 = vadd.f32 %v6812_v55, %v6811_v63  ;;  %v464_v63 = vsel %vm8465_vm4, 0, %v463_v47  ;;  %v9063_v55 = vpop.f32.mrf.mxu0  ;;  %v7957_v47 = vld [vmem:[#allocation9 + $0x108] sm:$0xff]   ;;  %v413_v61 = vsel %vm8459_vm2, 0, %v412_v50 }
 0x1d7   : > { %v6814_v45 = vpop.f32.mrf.mxu1  ;;  %465 = vst [vmem:[#allocation3 + $0x2c] sm:$0x1] %v464_v63  ;;  %v466_v63 = vld [vmem:[#allocation3 + $0x38] sm:$0x1]  ;;  %414 = vst [vmem:[#allocation3 + $0x30] sm:$0x1] %v413_v61  ;;  %7061 = vmatprep.subr.bf16.mxu1 %v7957_v47 }
 0x1d8   : > { %v2194_v17 = vadd.f32 %v6813_v9, %v8916_v22  ;;  %v9068_v34 = vpop.f32.mrf.mxu0 }
 0x1d9   : > { %v6815_v53 = vpop.f32.mrf.mxu1 }
 0x1da   : > { %v6816_v0 = vadd.f32 %v6815_v53, %v6814_v45  ;;  %v9061_v4 = vadd.f32 %v7527_v49, %v2194_v17  ;;  %v9072_v17 = vpop.f32.mrf.mxu0  ;;  %v7958_v53 = vld [vmem:[#allocation9 + $0xc8] sm:$0xff]  }
 0x1db   : > { %v6817_v22 = vpop.f32.mrf.mxu1  ;;  %7062 = vmatpush3.bf16.msra.mxu1 %v7958_v53  ;;  %v469_v53 = vld [vmem:[#allocation3 + $0x44] sm:$0x1] }
 0x1dc   : > { %10626 = vst [vmem:[#allocation17_spill] sm:$0xff] %v9061_v4  ;;  %v2197_v14 = vadd.f32 %v6816_v0, %v8925_v31  ;;  %v467_v31 = vsel %vm8465_vm4, 0, %v466_v63  ;;  %v415_v0 = vld [vmem:[#allocation3 + $0x3c] sm:$0x1]  ;;  %v470_v41 = vsel %vm8465_vm4, 0, %v469_v53 }
 0x1dd   : > { %v6818_v9 = vpop.f32.mrf.mxu1  ;;  %468 = vst [vmem:[#allocation3 + $0x38] sm:$0x1] %v467_v31  ;;  %v7961_v63 = vld [vmem:[#allocation9 + $0xc0] sm:$0xff]   ;;  %471 = vst [vmem:[#allocation3 + $0x44] sm:$0x1] %v470_v41 }
 0x1de   : > { %v6819_v45 = vadd.f32 %v6818_v9, %v6817_v22  ;;  %v9070_v49 = vadd.f32 %v7528_v11, %v2197_v14  ;;  %v9079_v22 = vpop.f32.mrf.mxu0  ;;  %v416_v11 = vsel %vm8459_vm2, 0, %v415_v0  ;;  %v7960_v9 = vld [vmem:[#allocation9 + $0x100] sm:$0xff]   ;;  %v7964_v0 = vld [vmem:[#allocation9 + $0x158] sm:$0xff]  }
 0x1df   : > { %v6820_v46 = vpop.f32.mrf.mxu1  ;;  %417 = vst [vmem:[#allocation3 + $0x3c] sm:$0x1] %v416_v11  ;;  %7063 = vmatprep.subr.bf16.mxu1 %v7960_v9  ;;  %v418_v11 = vld [vmem:[#allocation3 + $0x48] sm:$0x1]  ;;  %7609 = vmatprep.subr.bf16.mxu0 %v7964_v0 }
 0x1e0   : > { %10627 = vst [vmem:[#allocation18_spill] sm:$0xff] %v9070_v49  ;;  %v2202_v51 = vadd.f32 %v6819_v45, %v8935_v24  ;;  %v9085_v61 = vpop.f32.mrf.mxu0  ;;  %7064 = vmatpush3.bf16.msra.mxu1 %v7961_v63  ;;  %7610 = vmatpush3.bf16.msra.mxu0 %v7964_v0  ;;  %v472_v63 = vld [vmem:[#allocation3 + $0x50] sm:$0x1] }
 0x1e1   : > { %v6821_v14 = vpop.f32.mrf.mxu1 }
 0x1e2   : > { %v6822_v50 = vadd.f32 %v6821_v14, %v6820_v46  ;;  %v9083_v47 = vadd.f32 %v2362_v42, %v2202_v51  ;;  %v9090_v45 = vpop.f32.mrf.mxu0  ;;  %v9096_v14 = vld [vmem:[#allocation9 + $0xb8] sm:$0xff]  }
 0x1e3   : > { %v6823_v48 = vpop.f32.mrf.mxu1  ;;  %10629 = vst [vmem:[#allocation20_spill] sm:$0xff] %v9096_v14  ;;  %7649 = vmatprep.subr.bf16.mxu1 %v9096_v14  ;;  %v7971_v14 = vld [vmem:[#allocation9 + $0x148] sm:$0xff]  }
 0x1e4   : > { %10628 = vst [vmem:[#allocation19_spill] sm:$0xff] %v9083_v47  ;;  %v9088_v24 = vadd.f32 %v6822_v50, %v8939_v16  ;;  %v9094_v42 = vpop.f32.mrf.mxu0  ;;  %v419_v50 = vsel %vm8459_vm2, 0, %v418_v11 }
 0x1e5   : > { %v6824_v31 = vpop.f32.mrf.mxu1  ;;  %420 = vst [vmem:[#allocation3 + $0x48] sm:$0x1] %v419_v50 }
 0x1e6   : > { %v6825_v46 = vadd.f32 %v6824_v31, %v6823_v48  ;;  %v9099_v9 = vpop.f32.mrf.mxu0  ;;  %v473_v48 = vsel %vm8465_vm4, 0, %v472_v63  ;;  %v7968_v31 = vld [vmem:[#allocation9 + $0x150] sm:$0xff]  }
 0x1e7   : > { %v6826_v51 = vpop.f32.mrf.mxu1  ;;  %474 = vst [vmem:[#allocation3 + $0x50] sm:$0x1] %v473_v48  ;;  %7611 = vmatprep.subr.bf16.mxu0 %v7968_v31  ;;  %v421_v48 = vld [vmem:[#allocation3 + $0x54] sm:$0x1] }
 0x1e8   : > { %v2210_v16 = vadd.f32 %v6825_v46, %v8942_v8  ;;  %v9109_v8 = vpop.f32.mrf.mxu0  ;;  %7612 = vmatpush3.bf16.msra.mxu0 %v7968_v31  ;;  %v422_v31 = vsel %vm8459_vm2, 0, %v421_v48 }
 0x1e9   : > { %v6827_v53 = vpop.f32.mrf.mxu1  ;;  %7613 = vmatprep.subr.bf16.mxu0 %v7971_v14  ;;  %423 = vst [vmem:[#allocation3 + $0x54] sm:$0x1] %v422_v31  ;;  %v424_v31 = vld [vmem:[#allocation3 + $0x60] sm:$0x1] }
 0x1ea   : > { %v6828_v41 = vadd.f32 %v6827_v53, %v6826_v51  ;;  %v9107_v47 = vadd.f32 %v9054_v56, %v2210_v16  ;;  %v9112_v11 = vpop.f32.mrf.mxu0 }
 0x1eb   : > { %v6829_v46 = vpop.f32.mrf.mxu1 }
 0x1ec   : > { %10630 = vst [vmem:[#allocation21_spill] sm:$0xff] %v9107_v47  ;;  %v2213_v0 = vadd.f32 %v6828_v41, %v8947_v27  ;;  %v9117_v51 = vpop.f32.mrf.mxu0  ;;  %7614 = vmatpush3.bf16.msra.mxu0 %v7971_v14  ;;  %v475_v27 = vld [vmem:[#allocation3 + $0x5c] sm:$0x1] }
 0x1ed   : > { %v6830_v50 = vpop.f32.mrf.mxu1 }
 0x1ee   : > { %v6831_v49 = vadd.f32 %v6830_v50, %v6829_v46  ;;  %v9115_v63 = vadd.f32 %v9063_v55, %v2213_v0  ;;  %v9120_v53 = vpop.f32.mrf.mxu0  ;;  %v476_v46 = vsel %vm8465_vm4, 0, %v475_v27  ;;  %v7972_v55 = vld [vmem:[#allocation9 + $0x140] sm:$0xff]  }
 0x1ef   : > { %v6832_v56 = vpop.f32.mrf.mxu1  ;;  %477 = vst [vmem:[#allocation3 + $0x5c] sm:$0x1] %v476_v46  ;;  %7615 = vmatprep.subr.bf16.mxu0 %v7972_v55 }
 0x1f0   : > { %10631 = vst [vmem:[#allocation22_spill] sm:$0xff] %v9115_v63  ;;  %v2218_v16 = vadd.f32 %v6831_v49, %v8953_v44  ;;  %v9129_v63 = vpop.f32.mrf.mxu0  ;;  %7616 = vmatpush3.bf16.msra.mxu0 %v7972_v55  ;;  %v425_v55 = vsel %vm8459_vm2, 0, %v424_v31 }
 0x1f1   : > { %v6833_v41 = vpop.f32.mrf.mxu1  ;;  %426 = vst [vmem:[#allocation3 + $0x60] sm:$0x1] %v425_v55 }
 0x1f2   : > { %v6834_v0 = vadd.f32 %v6833_v41, %v6832_v56  ;;  %v9127_v50 = vadd.f32 %v9079_v22, %v2218_v16  ;;  %v9134_v14 = vpop.f32.mrf.mxu0 }
 0x1f3   : > { %v6835_v44 = vpop.f32.mrf.mxu1 }
 0x1f4   : > { %10632 = vst [vmem:[#allocation23_spill] sm:$0xff] %v9127_v50  ;;  %v9132_v49 = vadd.f32 %v6834_v0, %v8959_v52  ;;  %v9136_v27 = vpop.f32.mrf.mxu0  ;;  %v478_v0 = vld [vmem:[#allocation3 + $0x68] sm:$0x1] }
 0x1f5   : > { %v6836_v48 = vpop.f32.mrf.mxu1 }
 0x1f6   : > { %v6837_v47 = vadd.f32 %v6836_v48, %v6835_v44  ;;  %v9139_v16 = vpop.f32.mrf.mxu0  ;;  %v479_v48 = vsel %vm8465_vm4, 0, %v478_v0 }
 0x1f7   : > { %v6838_v56 = vpop.f32.mrf.mxu1  ;;  %480 = vst [vmem:[#allocation3 + $0x68] sm:$0x1] %v479_v48 }
 0x1f8   : > { %v2226_v22 = vadd.f32 %v6837_v47, %v8956_v58  ;;  %v9144_v52 = vpop.f32.mrf.mxu0 }
 0x1f9   : > { %v6839_v41 = vpop.f32.mrf.mxu1 }
 0x1fa   : > { %v6840_v46 = vadd.f32 %v6839_v41, %v6838_v56  ;;  %v9142_v50 = vadd.f32 %v9072_v17, %v2226_v22  ;;  %v9151_v47 = vpop.f32.mrf.mxu0 }
 0x1fb   : > { %v6841_v44 = vpop.f32.mrf.mxu1 }
 0x1fc   : > { %10633 = vst [vmem:[#allocation24_spill] sm:$0xff] %v9142_v50  ;;  %v2229_v58 = vadd.f32 %v6840_v46, %v8962_v35  ;;  %v9156_v22 = vpop.f32.mrf.mxu0  ;;  %v427_v50 = vld [vmem:[#allocation3 + $0x6c] sm:$0x1]  ;;  %v1932_v46 = vadd.f32 %v8967_v25, %v8975_v39  ;;  %v430_v39 = vld [vmem:[#allocation3 + $0x78] sm:$0x1] }
 0x1fd   : > { %v6842_v56 = vpop.f32.mrf.mxu1  ;;  %v428_v55 = vsel %vm8459_vm2, 0, %v427_v50 }
 0x1fe   : > { %v6843_v41 = vadd.f32 %v6842_v56, %v6841_v44  ;;  %v9154_v17 = vadd.f32 %v9085_v61, %v2229_v58  ;;  %v9161_v0 = vpop.f32.mrf.mxu0  ;;  %429 = vst [vmem:[#allocation3 + $0x6c] sm:$0x1] %v428_v55  ;;  %v481_v58 = vld [vmem:[#allocation3 + $0x74] sm:$0x1] }
 0x1ff   : > { %v6844_v31 = vpop.f32.mrf.mxu1  ;;  %v482_v50 = vsel %vm8465_vm4, 0, %v481_v58 }
 0x200   : > { %10634 = vst [vmem:[#allocation25_spill] sm:$0xff] %v9154_v17  ;;  %v2234_v60 = vadd.f32 %v6843_v41, %v8965_v62  ;;  %v9168_v48 = vpop.f32.mrf.mxu0  ;;  %483 = vst [vmem:[#allocation3 + $0x74] sm:$0x1] %v482_v50  ;;  %v484_v50 = vld [vmem:[#allocation3 + $0x80] sm:$0x1] }
 0x201   : > { %v6845_v35 = vpop.f32.mrf.mxu1 }
 0x202   : > { %v6846_v44 = vadd.f32 %v6845_v35, %v6844_v31  ;;  %v9166_v61 = vadd.f32 %v9099_v9, %v2234_v60  ;;  %v9174_v62 = vpop.f32.mrf.mxu0  ;;  %v431_v31 = vsel %vm8459_vm2, 0, %v430_v39 }
 0x203   : > { %v6847_v56 = vpop.f32.mrf.mxu1  ;;  %10636 = vst [vmem:[#allocation27_spill] sm:$0xff] %v9174_v62  ;;  %432 = vst [vmem:[#allocation3 + $0x78] sm:$0x1] %v431_v31 }
 0x204   : > { %10635 = vst [vmem:[#allocation26_spill] sm:$0xff] %v9166_v61  ;;  %v9172_v17 = vadd.f32 %v6846_v44, %v1932_v46  ;;  %v9176_v23 = vpop.f32.mrf.mxu0 }
 0x205   : > { %v6848_v41 = vpop.f32.mrf.mxu1 }
 0x206   : > { %v6849_v55 = vadd.f32 %v6848_v41, %v6847_v56  ;;  %v9179_v9 = vpop.f32.mrf.mxu0 }
 0x207   : > { %v6850_v25 = vpop.f32.mrf.mxu1 }
 0x208   : > { %v2242_v60 = vadd.f32 %v6849_v55, %v8970_v13  ;;  %v9186_v58 = vpop.f32.mrf.mxu0  ;;  %v485_v13 = vsel %vm8465_vm4, 0, %v484_v50  ;;  %v1948_v50 = vadd.f32 %v8977_v6, %v8985_v54 }
 0x209   : > { %v6851_v35 = vpop.f32.mrf.mxu1  ;;  %486 = vst [vmem:[#allocation3 + $0x80] sm:$0x1] %v485_v13 }
 0x20a   : > { %v6852_v46 = vadd.f32 %v6851_v35, %v6850_v25  ;;  %v9184_v44 = vadd.f32 %v9094_v42, %v2242_v60  ;;  %v9189_v61 = vpop.f32.mrf.mxu0 }
 0x20b   : > { %v6853_v56 = vpop.f32.mrf.mxu1 }
 0x20c   : > { %10637 = vst [vmem:[#allocation28_spill] sm:$0xff] %v9184_v44  ;;  %v2245_v41 = vadd.f32 %v6852_v46, %v8973_v3  ;;  %v9196_v25 = vpop.f32.mrf.mxu0  ;;  %v433_v44 = vld [vmem:[#allocation3 + $0x84] sm:$0x1] }
 0x20d   : > { %v6854_v55 = vpop.f32.mrf.mxu1  ;;  %v434_v46 = vsel %vm8459_vm2, 0, %v433_v44 }
 0x20e   : > { %v6855_v39 = vadd.f32 %v6854_v55, %v6853_v56  ;;  %v9194_v31 = vadd.f32 %v9109_v8, %v2245_v41  ;;  %v9199_v35 = vpop.f32.mrf.mxu0  ;;  %435 = vst [vmem:[#allocation3 + $0x84] sm:$0x1] %v434_v46  ;;  %v487_v41 = vld [vmem:[#allocation3 + $0x8c] sm:$0x1] }
 0x20f   : > { %v6856_v42 = vpop.f32.mrf.mxu1 }
 0x210   : > { %10638 = vst [vmem:[#allocation29_spill] sm:$0xff] %v9194_v31  ;;  %v2250_v60 = vadd.f32 %v6855_v39, %v8980_v43  ;;  %v9208_v8 = vpop.f32.mrf.mxu0  ;;  %v488_v43 = vsel %vm8465_vm4, 0, %v487_v41 }
 0x211   : > { %v6857_v3 = vpop.f32.mrf.mxu1  ;;  %489 = vst [vmem:[#allocation3 + $0x8c] sm:$0x1] %v488_v43 }
 0x212   : > { %v6858_v13 = vadd.f32 %v6857_v3, %v6856_v42  ;;  %v9206_v56 = vadd.f32 %v9120_v53, %v2250_v60  ;;  %v9214_v31 = vpop.f32.mrf.mxu0  ;;  %v436_v3 = vld [vmem:[#allocation3 + $0x90] sm:$0x1] }
 0x213   : > { %v6859_v55 = vpop.f32.mrf.mxu1 }
 0x214   : > { %10639 = vst [vmem:[#allocation30_spill] sm:$0xff] %v9206_v56  ;;  %v9212_v39 = vadd.f32 %v6858_v13, %v1948_v50  ;;  %v9216_v6 = vpop.f32.mrf.mxu0  ;;  %v437_v13 = vsel %vm8459_vm2, 0, %v436_v3 }
 0x215   : > { %v6860_v44 = vpop.f32.mrf.mxu1  ;;  %438 = vst [vmem:[#allocation3 + $0x90] sm:$0x1] %v437_v13 }
 0x216   : > { %v6861_v4 = vadd.f32 %v6860_v44, %v6859_v55  ;;  %v9219_v42 = vpop.f32.mrf.mxu0  ;;  %v490_v55 = vld [vmem:[#allocation3 + $0x98] sm:$0x1] }
 0x217   : > { %v6862_v54 = vpop.f32.mrf.mxu1 }
 0x218   : > { %v2258_v53 = vadd.f32 %v6861_v4, %v8987_v1  ;;  %v9224_v50 = vpop.f32.mrf.mxu0  ;;  %v491_v1 = vsel %vm8465_vm4, 0, %v490_v55 }
 0x219   : > { %v6863_v60 = vpop.f32.mrf.mxu1  ;;  %492 = vst [vmem:[#allocation3 + $0x98] sm:$0x1] %v491_v1 }
 0x21a   : > { %v6864_v46 = vadd.f32 %v6863_v60, %v6862_v54  ;;  %v9222_v56 = vadd.f32 %v9117_v51, %v2258_v53  ;;  %v9229_v44 = vpop.f32.mrf.mxu0  ;;  %v6734_v51 = vadd.f32 %v8999_v29, %v8995_v18 }
 0x21b   : > { %v6865_v41 = vpop.f32.mrf.mxu1 }
 0x21c   : > { %10640 = vst [vmem:[#allocation31_spill] sm:$0xff] %v9222_v56  ;;  %v2261_v43 = vadd.f32 %v6864_v46, %v8990_v20  ;;  %v9238_v60 = vpop.f32.mrf.mxu0  ;;  %v439_v46 = vld [vmem:[#allocation3 + $0x9c] sm:$0x1]  ;;  %v1964_v1 = vadd.f32 %v6734_v51, %v9001_v28 }
 0x21d   : > { %v6866_v4 = vpop.f32.mrf.mxu1  ;;  %v440_v55 = vsel %vm8459_vm2, 0, %v439_v46 }
 0x21e   : > { %v6867_v54 = vadd.f32 %v6866_v4, %v6865_v41  ;;  %v9236_v53 = vadd.f32 %v9129_v63, %v2261_v43  ;;  %v9241_v20 = vpop.f32.mrf.mxu0  ;;  %441 = vst [vmem:[#allocation3 + $0x9c] sm:$0x1] %v440_v55  ;;  %v493_v43 = vld [vmem:[#allocation3 + $0xa4] sm:$0x1] }
 0x21f   : > { %v6868_v3 = vpop.f32.mrf.mxu1 }
 0x220   : > { %10641 = vst [vmem:[#allocation32_spill] sm:$0xff] %v9236_v53  ;;  %v2266_v13 = vadd.f32 %v6867_v54, %v8997_v26  ;;  %v9249_v29 = vpop.f32.mrf.mxu0  ;;  %v494_v54 = vsel %vm8465_vm4, 0, %v493_v43 }
 0x221   : > { %v6869_v56 = vpop.f32.mrf.mxu1  ;;  %495 = vst [vmem:[#allocation3 + $0xa4] sm:$0x1] %v494_v54 }
 0x222   : > { %v6870_v62 = vadd.f32 %v6869_v56, %v6868_v3  ;;  %v9247_v18 = vadd.f32 %v9139_v16, %v2266_v13  ;;  %v9253_v26 = vpop.f32.mrf.mxu0  ;;  %v442_v3 = vld [vmem:[#allocation3 + $0xa8] sm:$0x1] }
 0x223   : > { %v6871_v63 = vpop.f32.mrf.mxu1 }
 0x224   : > { %10642 = vst [vmem:[#allocation33_spill] sm:$0xff] %v9247_v18  ;;  %v9251_v41 = vadd.f32 %v6870_v62, %v1964_v1  ;;  %v9257_v53 = vpop.f32.mrf.mxu0  ;;  %v3749_v1 = vld [vmem:[#allocation3] sm:$0xf]  ;;  %v3750_v18 = vld [vmem:[#allocation3 + $0x4] sm:$0xf] }
 0x225   : > { %v6872_v4 = vpop.f32.mrf.mxu1 }
 0x226   : > { %v6873_v46 = vadd.f32 %v6872_v4, %v6871_v63  ;;  %v9260_v56 = vpop.f32.mrf.mxu0  ;;  %v443_v63 = vsel %vm8459_vm2, 0, %v442_v3  ;;  %v496_v4 = vld [vmem:[#allocation3 + $0xb0] sm:$0x1] }
 0x227   : > { %v6874_v28 = vpop.f32.mrf.mxu1  ;;  %444 = vst [vmem:[#allocation3 + $0xa8] sm:$0x1] %v443_v63 }
 0x228   : > { %v2274_v16 = vadd.f32 %v6873_v46, %v9004_v33  ;;  %v9265_v55 = vpop.f32.mrf.mxu0  ;;  %v497_v46 = vsel %vm8465_vm4, 0, %v496_v4  ;;  %v445_v4 = vld [vmem:[#allocation3 + $0xb4] sm:$0x1] }
 0x229   : > { %v6875_v51 = vpop.f32.mrf.mxu1  ;;  %10644 = vst [vmem:[#allocation35_spill] sm:$0xff] %v9265_v55  ;;  %498 = vst [vmem:[#allocation3 + $0xb0] sm:$0x1] %v497_v46 }
 0x22a   : > { %v6876_v62 = vadd.f32 %v6875_v51, %v6874_v28  ;;  %v9263_v13 = vadd.f32 %v9136_v27, %v2274_v16  ;;  %v9270_v54 = vpop.f32.mrf.mxu0  ;;  %v9274_v27 = vcombine.low %v3749_v1, %v3750_v18  ;;  %v6746_v16 = vadd.f32 %v9015_v5, %v9011_v10  ;;  %v7966_v18 = vld [vmem:[#allocation3 + $0x8] ss:$0 sps:$4 sm:$0x11]  }
 0x22b   : > { %v6877_v43 = vpop.f32.mrf.mxu1  ;;  %10645 = vst [vmem:[#allocation36_spill] sm:$0xff] %v9270_v54  ;;  %v7991_v54 = vld [vmem:[#allocation9 + $0x78] sm:$0xff]   ;;  %v446_v10 = vsel %vm8459_vm2, 0, %v445_v4 }
 0x22c   : > { %10643 = vst [vmem:[#allocation34_spill] sm:$0xff] %v9263_v13  ;;  %v2277_v33 = vadd.f32 %v6876_v62, %v9007_v40  ;;  %v9281_v63 = vpop.f32.mrf.mxu0  ;;  %v4016_v1 = vshll.u32 %v9274_v27, 16  ;;  %v1980_v5 = vadd.f32 %v6746_v16, %v9009_v2  ;;  %7185 = vmatprep.subr.bf16.mxu0 %v7991_v54  ;;  %447 = vst [vmem:[#allocation3 + $0xb4] sm:$0x1] %v446_v10  ;;  %v4014_v2 = vshrl.u32 %v9274_v27, 16 }
 0x22d   : > { %v6878_v28 = vpop.f32.mrf.mxu1  ;;  %v6937_v10 = vadd.f32 %v9199_v35, %v9196_v25 }
 0x22e   : > { %v6879_v51 = vadd.f32 %v6878_v28, %v6877_v43  ;;  %v9279_v3 = vadd.f32 %v9144_v52, %v2277_v33  ;;  %v9284_v62 = vpop.f32.mrf.mxu0 }
 0x22f   : > { %v6880_v13 = vpop.f32.mrf.mxu1 }
 0x230   : > { %10646 = vst [vmem:[#allocation37_spill] sm:$0xff] %v9279_v3  ;;  %v2282_v40 = vadd.f32 %v6879_v51, %v9013_v36  ;;  %v9293_v33 = vpop.f32.mrf.mxu0  ;;  %v499_v36 = vld [vmem:[#allocation3 + $0xbc] sm:$0x1] }
 0x231   : > { %v6881_v55 = vpop.f32.mrf.mxu1  ;;  %v500_v28 = vsel %vm8465_vm4, 0, %v499_v36 }
 0x232   : > { %v6882_v52 = vadd.f32 %v6881_v55, %v6880_v13  ;;  %v9291_v43 = vadd.f32 %v9161_v0, %v2282_v40  ;;  %v9297_v3 = vpop.f32.mrf.mxu0  ;;  %501 = vst [vmem:[#allocation3 + $0xbc] sm:$0x1] %v500_v28  ;;  %v4018_v13 = vrot.slane %v4016_v1, 1  ;;  %v4021_v55 = vshll.u32 %v7966_v18, 16 }
 0x233   : > { %v6883_v46 = vpop.f32.mrf.mxu1  ;;  %10648 = vst [vmem:[#allocation39_spill] sm:$0xff] %v9297_v3  ;;  %v6931_v18 = vadd.f32 %v9179_v9, %v9176_v23  ;;  %v9321_v23 = vadd.f32 %v9068_v34, %v9088_v24  ;;  %v9338_v24 = vadd.f32 %v9090_v45, %v9132_v49 }
 0x234   : > { %10647 = vst [vmem:[#allocation38_spill] sm:$0xff] %v9291_v43  ;;  %v2285_v51 = vadd.f32 %v6882_v52, %v1980_v5  ;;  %v9300_v16 = vpop.f32.mrf.mxu0  ;;  %v4019_v5 = vor.u32 %v4018_v13, %v4014_v2  ;;  %v4023_v52 = vrot.slane %v4021_v55, 1  ;;  %v448_v13 = vld [vmem:[#allocation3 + $0xc0] sm:$0x1]  ;;  %v6943_v55 = vadd.f32 %v9219_v42, %v9216_v6 }
 0x235   : > { %v6884_v4 = vpop.f32.mrf.mxu1  ;;  %v6952_v6 = vadd.f32 %v9253_v26, %v9249_v29  ;;  %v9382_v29 = vadd.f32 %v9284_v62, %v9281_v63 }
 0x236   : > { %v6885_v0 = vadd.f32 %v6884_v4, %v6883_v46  ;;  %v6966_v43 = vpop.f32.mrf.mxu0  ;;  %v2334_v46 = vadd.f32 %v9036_v57, %v9024_v7  ;;  %v6934_v7 = vadd.f32 %v9189_v61, %v9186_v58  ;;  %v9326_v57 = vsel %vm1241_vm9, %v4019_v5, %v4023_v52  ;;  %v10650_v5 = vld [vmem:[#allocation35_spill] sm:$0xff] }
 0x237   : > { %v6886_v40 = vpop.f32.mrf.mxu1  ;;  %v9342_v61 = vadd.f32 %v9112_v11, %v9172_v17  ;;  %v6946_v17 = vadd.f32 %v9229_v44, %v9224_v50 }
 0x238   : > { %v2290_v54 = vadd.f32 %v6885_v0, %v9022_v12  ;;  %v6968_v1 = vpop.f32.mrf.mxu0  ;;  %v9314_v12 = vadd.f32 %v9050_v30, %v9048_v21  ;;  %v502_v21 = vld [vmem:[#allocation3 + $0xc8] sm:$0x1] }
 0x239   : > { %v6887_v36 = vpop.f32.mrf.mxu1  ;;  %v503_v34 = vsel %vm8465_vm4, 0, %v502_v21 }
 0x23a   : > { %v9306_v28 = vadd.f32 %v9156_v22, %v2290_v54  ;;  %v6888_v3 = vadd.f32 %v6887_v36, %v6886_v40  ;;  %v6940_v22 = vadd.f32 %v9214_v31, %v9208_v8  ;;  %v6969_v2 = vpop.f32.mrf.mxu0  ;;  %504 = vst [vmem:[#allocation3 + $0xc8] sm:$0x1] %v503_v34  ;;  %v6949_v40 = vadd.f32 %v9241_v20, %v9238_v60  ;;  %v10651_v60 = vld [vmem:[#allocation36_spill] sm:$0xff] }
 0x23b   : > { %v7571_v4 = vpop.f32.mrf.mxu1  ;;  %v9378_v20 = vadd.f32 %v10651_v60, %v10650_v5 }
 0x23c   : > { %v2293_v25 = vadd.f32 %v6888_v3, %v9026_v32  ;;  %v2999_v35 = vadd.f32 %v7571_v4, %v6937_v10  ;;  %v449_v32 = vsel %vm8459_vm2, 0, %v448_v13  ;;  %v6971_v3 = vpop.f32.mrf.mxu0 }
 0x23d   : > { %v2990_v9 = vpop.f32.mrf.mxu1  ;;  %450 = vst [vmem:[#allocation3 + $0xc0] sm:$0x1] %v449_v32 }
 0x23e   : > { %v9331_v30 = vadd.f32 %v9168_v48, %v2293_v25  ;;  %v2991_v31 = vadd.f32 %v6931_v18, %v2990_v9  ;;  %v3119_v8 = vadd.f32 %v2999_v35, %v9031_v38  ;;  %v9346_v48 = vadd.f32 %v9134_v14, %v9212_v39  ;;  %v9351_v38 = vld [vmem:[%s10588_s2] ss:$0 sm:$0xff]  ;;  %v6972_v14 = vpop.f32.mrf.mxu0 }
 0x23f   : > { %v7572_v58 = vpop.f32.mrf.mxu1  ;;  %v9361_v39 = vadd.f32 %v9151_v47, %v9251_v41  ;;  %v10649_v47 = vld [vmem:[#allocation27_spill] sm:$0xff]  ;;  %v9390_v35 = vadd.f32 %v6966_v43, %v9300_v16  ;;  %v9394_v13 = vadd.f32 %v6972_v14, %v6971_v3 }
 0x240   : > { %v3117_v45 = vadd.f32 %v2991_v31, %v9029_v37  ;;  %v3158_v49 = vadd.f32 %v9351_v38, %v3119_v8  ;;  %v3002_v11 = vadd.f32 %v7572_v58, %v6940_v22  ;;  %v9369_v37 = vadd.f32 %v9260_v56, %v9257_v53  ;;  %v6974_v10 = vpop.f32.mrf.mxu0  ;;  %v10652_v53 = vld [vmem:[#allocation39_spill] sm:$0xff]  ;;  %v10653_v8 = vld [vmem:[#allocation17_spill] sm:$0xff] }
 0x241   : > { %v2993_v0 = vpop.f32.mrf.mxu1  ;;  %v9374_v41 = vadd.f32 %v10649_v47, %v2285_v51  ;;  %v9386_v26 = vadd.f32 %v10652_v53, %v9293_v33  ;;  %v9392_v22 = vadd.f32 %v6969_v2, %v6968_v1 }
 0x242   : > { %v3156_v42 = vadd.f32 %v9351_v38, %v3117_v45  ;;  %v2994_v54 = vadd.f32 %v6934_v7, %v2993_v0  ;;  %v3190_v50 = vmax.f32 %v3158_v49, 0.0  ;;  %v3120_v44 = vadd.f32 %v3002_v11, %v9038_v59  ;;  %v6975_v51 = vpop.f32.mrf.mxu0  ;;  %v10654_v45 = vld [vmem:[#allocation16_spill] sm:$0xff] }
 0x243   : > { %v7575_v36 = vpop.f32.mrf.mxu1  ;;  %v9397_v9 = vadd.f32 %v6975_v51, %v6974_v10  ;;  %v3637_v10 = vld [vmem:[#allocation3 + $0xc] sm:$0xf] }
 0x244   : > { %v3188_v56 = vmax.f32 %v3156_v42, 0.0  ;;  %v3118_v52 = vadd.f32 %v2994_v54, %v2334_v46  ;;  %v6531_v59 = vpack.c.bf16 %v3190_v50, %v3190_v50  ;;  %v3159_v18 = vadd.f32 %v9351_v38, %v3120_v44  ;;  %v9399_v46 = vpop.f32.mrf.mxu0 }
 0x245   : > { %v3006_v4 = vpop.f32.mrf.mxu1  ;;  %v3015_v25 = vadd.f32 %v7575_v36, %v6949_v40 }
 0x246   : > { %v6529_v63 = vpack.c.bf16 %v3188_v56, %v3188_v56  ;;  %v3157_v62 = vadd.f32 %v9351_v38, %v3118_v52  ;;  %v3334_v33 = vshrl.u32 %v6531_v59, 16  ;;  %v3337_v7 = vshll.u32 %v6531_v59, 16  ;;  %v9402_v3 = vpop.f32.mrf.mxu0 }
 0x247   : > { %v3191_v32 = vmax.f32 %v3159_v18, 0.0  ;;  %v7576_v21 = vpop.f32.mrf.mxu1  ;;  %v3007_v31 = vadd.f32 %v6943_v55, %v3006_v4  ;;  %v3123_v34 = vadd.f32 %v3015_v25, %v10653_v8  ;;  %v3644_v55 = vld [vmem:[#allocation3 + $0x18] sm:$0xf] }
 0x248   : > { %v3317_v43 = vshrl.u32 %v6529_v63, 16  ;;  %v3320_v16 = vshll.u32 %v6529_v63, 16  ;;  %v3189_v1 = vmax.f32 %v3157_v62, 0.0  ;;  %v3336_v2 = vrot.slane %v3334_v33, 7  ;;  %v9406_v44 = vpop.f32.mrf.mxu0 }
 0x249   : > { %v6532_v58 = vpack.c.bf16 %v3191_v32, %v3191_v32  ;;  %v3121_v49 = vadd.f32 %v3007_v31, %v10654_v45  ;;  %v3009_v11 = vpop.f32.mrf.mxu1  ;;  %v3162_v14 = vadd.f32 %v9351_v38, %v3123_v34  ;;  %v3018_v0 = vadd.f32 %v7576_v21, %v6952_v6  ;;  %v10656_v31 = vld [vmem:[#allocation18_spill] sm:$0xff] }
 0x24a   : > { %v3319_v40 = vrot.slane %v3317_v43, 7  ;;  %v6530_v42 = vpack.c.bf16 %v3189_v1, %v3189_v1  ;;  %v3339_v54 = vor.u32 %v3337_v7, %v3336_v2  ;;  %v3340_v50 = vrot.slane %v3336_v2, 4  ;;  %v9409_v51 = vpop.f32.mrf.mxu0  ;;  %v3641_v43 = vld [vmem:[#allocation3 + $0x14] sm:$0x1] }
 0x24b   : > { %v3342_v47 = vshrl.u32 %v6532_v58, 16  ;;  %v3345_v36 = vshll.u32 %v6532_v58, 16  ;;  %v3160_v5 = vadd.f32 %v9351_v38, %v3121_v49  ;;  %v3010_v60 = vadd.f32 %v6946_v17, %v3009_v11  ;;  %v7579_v53 = vpop.f32.mrf.mxu1  ;;  %v3648_v17 = vld [vmem:[#allocation3 + $0x20] sm:$0x1] }
 0x24c   : > { %v3322_v56 = vor.u32 %v3320_v16, %v3319_v40  ;;  %v3323_v52 = vrot.slane %v3319_v40, 4  ;;  %v3325_v59 = vshrl.u32 %v6530_v42, 16  ;;  %v3328_v18 = vshll.u32 %v6530_v42, 16  ;;  %v9417_v34 = vpop.f32.mrf.mxu0 }
 0x24d   : > { %v3645_v4 = vsel %vm8493_vm8, %v3339_v54, %v3644_v55  ;;  %v3344_v25 = vrot.slane %v3342_v47, 7  ;;  %v3192_v63 = vmax.f32 %v3160_v5, 0.0  ;;  %v3122_v62 = vadd.f32 %v3010_v60, %v9314_v12  ;;  %v3022_v33 = vpop.f32.mrf.mxu1 }
 0x24e   : > { %v3638_v7 = vsel %vm8493_vm8, %v3322_v56, %v3637_v10  ;;  %v3327_v32 = vrot.slane %v3325_v59, 7  ;;  %3646 = vst [vmem:[#allocation3 + $0x18] sm:$0xf] %v3645_v4  ;;  %v3194_v21 = vmax.f32 %v3162_v14, 0.0  ;;  %v3124_v8 = vadd.f32 %v3018_v0, %v10656_v31  ;;  %v9421_v42 = vpop.f32.mrf.mxu0 }
 0x24f   : > { %3639 = vst [vmem:[#allocation3 + $0xc] sm:$0xf] %v3638_v7  ;;  %v3347_v16 = vor.u32 %v3345_v36, %v3344_v25  ;;  %v3349_v1 = vrot.slane %v3344_v25, 4  ;;  %v6533_v2 = vpack.c.bf16 %v3192_v63, %v3192_v63  ;;  %v3161_v58 = vadd.f32 %v9351_v38, %v3122_v62  ;;  %v7580_v12 = vpop.f32.mrf.mxu1  ;;  %v3651_v63 = vld [vmem:[#allocation3 + $0x24] sm:$0xf] }
 0x250   : > { %v3330_v45 = vor.u32 %v3328_v18, %v3327_v32  ;;  %v3332_v49 = vrot.slane %v3327_v32, 4  ;;  %v6535_v11 = vpack.c.bf16 %v3194_v21, %v3194_v21  ;;  %v3163_v40 = vadd.f32 %v9351_v38, %v3124_v8  ;;  %v9431_v59 = vpop.f32.mrf.mxu0 }
 0x251   : > { %v3348_v0 = vsel %vm8485_vm7, %v3340_v50, %v3347_v16  ;;  %v3649_v54 = vsel %vm8459_vm2, %v3349_v1, %v3648_v17  ;;  %v3351_v55 = vshrl.u32 %v6533_v2, 16  ;;  %v3354_v10 = vshll.u32 %v6533_v2, 16  ;;  %v3025_v56 = vpop.f32.mrf.mxu1  ;;  %v10658_v1 = vld [vmem:[#allocation19_spill] sm:$0xff] }
 0x252   : > { %v3331_v47 = vsel %vm8485_vm7, %v3323_v52, %v3330_v45  ;;  %v3642_v36 = vsel %vm8459_vm2, %v3332_v49, %v3641_v43  ;;  %3647 = vst [vmem:[#allocation3 + $0x1c] sm:$0xf] %v3348_v0  ;;  %3650 = vst [vmem:[#allocation3 + $0x20] sm:$0x1] %v3649_v54  ;;  %v3193_v5 = vmax.f32 %v3161_v58, 0.0  ;;  %v3368_v60 = vshrl.u32 %v6535_v11, 16  ;;  %v9438_v21 = vpop.f32.mrf.mxu0 }
 0x253   : > { %3640 = vst [vmem:[#allocation3 + $0x10] sm:$0xf] %v3331_v47  ;;  %3643 = vst [vmem:[#allocation3 + $0x14] sm:$0x1] %v3642_v36  ;;  %v3353_v50 = vrot.slane %v3351_v55, 7  ;;  %v3371_v18 = vshll.u32 %v6535_v11, 16  ;;  %v3023_v25 = vadd.f32 %v9369_v37, %v3022_v33  ;;  %v3026_v7 = vadd.f32 %v9378_v20, %v3025_v56  ;;  %v9436_v17 = vpop.f32.mrf.mxu1 }
 0x254   : > { %v3195_v4 = vmax.f32 %v3163_v40, 0.0  ;;  %v6534_v62 = vpack.c.bf16 %v3193_v5, %v3193_v5  ;;  %v3370_v52 = vrot.slane %v3368_v60, 7  ;;  %v3031_v32 = vadd.f32 %v7579_v53, %v9382_v29  ;;  %v3658_v43 = vld [vmem:[#allocation3 + $0x30] sm:$0xf]  ;;  %v9441_v49 = vpop.f32.mrf.mxu0  ;;  %v3655_v0 = vld [vmem:[#allocation3 + $0x2c] sm:$0x1] }
 0x255   : > { %v3356_v31 = vor.u32 %v3354_v10, %v3353_v50  ;;  %v3357_v8 = vrot.slane %v3353_v50, 4  ;;  %v3125_v2 = vadd.f32 %v3023_v25, %v10658_v1  ;;  %v3662_v55 = vld [vmem:[#allocation3 + $0x38] sm:$0x1]  ;;  %v3126_v10 = vadd.f32 %v3026_v7, %v9321_v23  ;;  %v10659_v47 = vld [vmem:[#allocation21_spill] sm:$0xff]  ;;  %v3038_v5 = vpop.f32.mrf.mxu1 }
 0x256   : > { %v6536_v16 = vpack.c.bf16 %v3195_v4, %v3195_v4  ;;  %v3359_v58 = vshrl.u32 %v6534_v62, 16  ;;  %v3362_v45 = vshll.u32 %v6534_v62, 16  ;;  %v3373_v37 = vor.u32 %v3371_v18, %v3370_v52  ;;  %v9450_v60 = vpop.f32.mrf.mxu0  ;;  %v3751_v18 = vld [vmem:[#allocation3 + $0xc] sm:$0xf] }
 0x257   : > { %v3374_v33 = vrot.slane %v3370_v52, 4  ;;  %v3652_v20 = vsel %vm8493_vm8, %v3356_v31, %v3651_v63  ;;  %v3164_v11 = vadd.f32 %v9351_v38, %v3125_v2  ;;  %v3127_v36 = vadd.f32 %v3031_v32, %v10659_v47 }
 0x258   : > { %v3376_v29 = vshrl.u32 %v6536_v16, 16  ;;  %v3379_v53 = vshll.u32 %v6536_v16, 16  ;;  %3653 = vst [vmem:[#allocation3 + $0x24] sm:$0xf] %v3652_v20  ;;  %v3361_v40 = vrot.slane %v3359_v58, 7  ;;  %v3659_v54 = vsel %vm8493_vm8, %v3373_v37, %v3658_v43  ;;  %v9456_v7 = vpop.f32.mrf.mxu0 }
 0x259   : > { %3660 = vst [vmem:[#allocation3 + $0x30] sm:$0xf] %v3659_v54  ;;  %v3196_v50 = vmax.f32 %v3164_v11, 0.0  ;;  %v3034_v4 = vadd.f32 %v7580_v12, %v9386_v26  ;;  %v3039_v25 = vadd.f32 %v9390_v35, %v3038_v5  ;;  %v3165_v52 = vadd.f32 %v9351_v38, %v3126_v10 }
 0x25a   : > { %v3378_v56 = vrot.slane %v3376_v29, 7  ;;  %v3364_v63 = vor.u32 %v3362_v45, %v3361_v40  ;;  %v3366_v62 = vrot.slane %v3361_v40, 4  ;;  %v3166_v31 = vadd.f32 %v9351_v38, %v3127_v36  ;;  %v3752_v23 = vld [vmem:[#allocation3 + $0x10] sm:$0xf]  ;;  %v9464_v45 = vpop.f32.mrf.mxu0  ;;  %v10660_v36 = vld [vmem:[#allocation22_spill] sm:$0xff] }
 0x25b   : > { %v6537_v16 = vpack.c.bf16 %v3196_v50, %v3196_v50  ;;  %v9458_v1 = vcombine.low %v3751_v18, %v3752_v23  ;;  %v7963_v2 = vld [vmem:[#allocation3 + $0x14] ss:$0 sps:$4 sm:$0x11]   ;;  %v3197_v12 = vmax.f32 %v3165_v52, 0.0  ;;  %v3128_v5 = vadd.f32 %v3034_v4, %v10660_v36  ;;  %v9479_v4 = vpop.f32.mrf.mxu1 }
 0x25c   : > { %v3381_v32 = vor.u32 %v3379_v53, %v3378_v56  ;;  %v3383_v43 = vrot.slane %v3378_v56, 4  ;;  %v3365_v26 = vsel %vm8485_vm7, %v3357_v8, %v3364_v63  ;;  %v3656_v35 = vsel %vm8459_vm2, %v3366_v62, %v3655_v0  ;;  %v3665_v8 = vld [vmem:[#allocation3 + $0x3c] sm:$0xf]  ;;  %v10661_v56 = vld [vmem:[#allocation23_spill] sm:$0xff]  ;;  %v9474_v18 = vpop.f32.mrf.mxu0 }
 0x25d   : > { %v3198_v58 = vmax.f32 %v3166_v31, 0.0  ;;  %3654 = vst [vmem:[#allocation3 + $0x28] sm:$0xf] %v3365_v26  ;;  %3657 = vst [vmem:[#allocation3 + $0x2c] sm:$0x1] %v3656_v35  ;;  %v3385_v29 = vshrl.u32 %v6537_v16, 16  ;;  %v6538_v11 = vpack.c.bf16 %v3197_v12, %v3197_v12 }
 0x25e   : > { %v3382_v37 = vsel %vm8485_vm7, %v3374_v33, %v3381_v32  ;;  %v3663_v20 = vsel %vm8459_vm2, %v3383_v43, %v3662_v55  ;;  %v3388_v53 = vshll.u32 %v6537_v16, 16  ;;  %v4026_v0 = vshrl.u32 %v9458_v1, 16  ;;  %v7970_v50 = vld [vmem:[#allocation3 + $0x20] ss:$0 sps:$4 sm:$0x11]  }
 0x25f   : > { %3661 = vst [vmem:[#allocation3 + $0x34] sm:$0xf] %v3382_v37  ;;  %3664 = vst [vmem:[#allocation3 + $0x38] sm:$0x1] %v3663_v20  ;;  %v6539_v40 = vpack.c.bf16 %v3198_v58, %v3198_v58  ;;  %v4028_v54 = vshll.u32 %v9458_v1, 16  ;;  %v3387_v10 = vrot.slane %v3385_v29, 7  ;;  %v3129_v33 = vadd.f32 %v3039_v25, %v10661_v56 }
 0x260   : > { %v4033_v47 = vshll.u32 %v7963_v2, 16  ;;  %v3393_v55 = vshrl.u32 %v6538_v11, 16  ;;  %v3396_v63 = vshll.u32 %v6538_v11, 16  ;;  %v3754_v31 = vld [vmem:[#allocation3 + $0x1c] sm:$0xf]  ;;  %v3167_v2 = vadd.f32 %v9351_v38, %v3128_v5 }
 0x261   : > { %v3402_v62 = vshrl.u32 %v6539_v40, 16  ;;  %v3405_v52 = vshll.u32 %v6539_v40, 16  ;;  %v3390_v23 = vor.u32 %v3388_v53, %v3387_v10  ;;  %v3391_v32 = vrot.slane %v3387_v10, 4  ;;  %v3753_v12 = vld [vmem:[#allocation3 + $0x18] sm:$0xf]  ;;  %v7975_v40 = vld [vmem:[#allocation9 + $0xb0] sm:$0xff]  }
 0x262   : > { %v4030_v43 = vrot.slane %v4028_v54, 1  ;;  %v4035_v16 = vrot.slane %v4033_v47, 1  ;;  %v3395_v26 = vrot.slane %v3393_v55, 7  ;;  %v3168_v25 = vadd.f32 %v9351_v38, %v3129_v33  ;;  %v3669_v37 = vld [vmem:[#allocation3 + $0x44] sm:$0x1]  ;;  %v9486_v54 = vpop.f32.mrf.mxu0 }
 0x263   : > { %v9476_v35 = vrot.slane %v3402_v62, 7  ;;  %v3666_v58 = vsel %vm8493_vm8, %v3390_v23, %v3665_v8  ;;  %v3672_v20 = vld [vmem:[#allocation3 + $0x48] sm:$0xf]  ;;  %v9484_v53 = vcombine.low %v3753_v12, %v3754_v31  ;;  %v4045_v11 = vshll.u32 %v7970_v50, 16  ;;  %v3041_v31 = vpop.f32.mrf.mxu1 }
 0x264   : > { %v4031_v29 = vor.u32 %v4030_v43, %v4026_v0  ;;  %3667 = vst [vmem:[#allocation3 + $0x3c] sm:$0xf] %v3666_v58  ;;  %v3398_v10 = vor.u32 %v3396_v63, %v3395_v26  ;;  %v3400_v47 = vrot.slane %v3395_v26, 4  ;;  %v3756_v56 = vld [vmem:[#allocation3 + $0x28] sm:$0xf]  ;;  %v3199_v8 = vmax.f32 %v3167_v2, 0.0 }
 0x265   : > { %v3407_v36 = vor.u32 %v3405_v52, %v9476_v35  ;;  %v3408_v5 = vrot.slane %v9476_v35, 4  ;;  %v3200_v55 = vmax.f32 %v3168_v25, 0.0  ;;  %v4038_v0 = vshrl.u32 %v9484_v53, 16  ;;  %v7974_v62 = vld [vmem:[#allocation3 + $0x2c] ss:$0 sps:$4 sm:$0x11]   ;;  %v9504_v25 = vpop.f32.mrf.mxu0 }
 0x266   : > { %v9491_v33 = vsel %vm1241_vm9, %v4031_v29, %v4035_v16  ;;  %v3399_v50 = vsel %vm8485_vm7, %v3391_v32, %v3398_v10  ;;  %v3670_v63 = vsel %vm8459_vm2, %v3400_v47, %v3669_v37  ;;  %v4040_v23 = vshll.u32 %v9484_v53, 16  ;;  %v3755_v2 = vld [vmem:[#allocation3 + $0x24] sm:$0xf]  ;;  %v10662_v12 = vld [vmem:[#allocation20_spill] sm:$0xff]  ;;  %v9511_v10 = vpop.f32.mrf.mxu1 }
 0x267   : > { %v3673_v52 = vsel %vm8493_vm8, %v3407_v36, %v3672_v20  ;;  %4472 = vmatprep.mubr.bf16.mxu1 %v9491_v33  ;;  %3668 = vst [vmem:[#allocation3 + $0x40] sm:$0xf] %v3399_v50  ;;  %3671 = vst [vmem:[#allocation3 + $0x44] sm:$0x1] %v3670_v63  ;;  %v6540_v43 = vpack.c.bf16 %v3199_v8, %v3199_v8  ;;  %v6541_v16 = vpack.c.bf16 %v3200_v55, %v3200_v55  ;;  %v10663_v55 = vld [vmem:[#allocation24_spill] sm:$0xff] }
 0x268   : > { %3674 = vst [vmem:[#allocation3 + $0x48] sm:$0xf] %v3673_v52  ;;  %4473 = vmatmul.mubr.bf16.vlgmr.msra.gmra.mxu1 %v9326_v57  ;;  %v4047_v26 = vrot.slane %v4045_v11, 1  ;;  %v3042_v32 = vadd.f32 %v9392_v22, %v3041_v31  ;;  %v4042_v58 = vrot.slane %v4040_v23, 1  ;;  %v3047_v37 = vadd.f32 %v9436_v17, %v9394_v13  ;;  %v7980_v52 = vld [vmem:[#allocation9 + $0xa8] sm:$0xff]  }
 0x269   : > { %7650 = vmatpush3.bf16.msra.mxu1 %v10662_v12  ;;  %v9509_v20 = vcombine.low %v3755_v2, %v3756_v56  ;;  %v4057_v29 = vshll.u32 %v7974_v62, 16  ;;  %v3410_v57 = vshrl.u32 %v6540_v43, 16  ;;  %v3413_v47 = vshll.u32 %v6540_v43, 16  ;;  %v9519_v62 = vpop.f32.mrf.mxu0  ;;  %v3676_v23 = vld [vmem:[#allocation3 + $0x50] sm:$0x1]  ;;  %v3054_v2 = vpop.f32.mrf.mxu1 }
 0x26a   : > { %v3419_v36 = vshrl.u32 %v6541_v16, 16  ;;  %v3422_v11 = vshll.u32 %v6541_v16, 16  ;;  %7651 = vmatprep.subr.bf16.mxu1 %v7975_v40  ;;  %v4043_v22 = vor.u32 %v4042_v58, %v4038_v0  ;;  %v3130_v8 = vadd.f32 %v3042_v32, %v9338_v24  ;;  %v3679_v43 = vld [vmem:[#allocation3 + $0x54] sm:$0xf] }
 0x26b   : > { %v3131_v50 = vadd.f32 %v3047_v37, %v10663_v55  ;;  %v4050_v63 = vshrl.u32 %v9509_v20, 16  ;;  %v3412_v31 = vrot.slane %v3410_v57, 7  ;;  %v4052_v17 = vshll.u32 %v9509_v20, 16  ;;  %v7985_v57 = vld [vmem:[#allocation9 + $0xa0] sm:$0xff]  }
 0x26c   : > { %v9516_v13 = vrot.slane %v3419_v36, 7  ;;  %v4059_v56 = vrot.slane %v4057_v29, 1  ;;  %v9522_v16 = vsel %vm1241_vm9, %v4043_v22, %v4047_v26  ;;  %v3169_v24 = vadd.f32 %v9351_v38, %v3130_v8  ;;  %v7977_v26 = vld [vmem:[#allocation3 + $0x38] ss:$0 sps:$4 sm:$0x11]  }
 0x26d   : > { %v3170_v0 = vadd.f32 %v9351_v38, %v3131_v50  ;;  %7652 = vmatpush3.bf16.msra.mxu1 %v7975_v40  ;;  %v3050_v32 = vadd.f32 %v9479_v4, %v9397_v9  ;;  %v3415_v12 = vor.u32 %v3413_v47, %v3412_v31  ;;  %v3417_v58 = vrot.slane %v3412_v31, 4  ;;  %4480 = vmatprep.mubr.bf16.mxu1 %v9522_v16  ;;  %v10664_v40 = vld [vmem:[#allocation25_spill] sm:$0xff]  ;;  %v9544_v31 = vpop.f32.mrf.mxu0 }
 0x26e   : > { %v3424_v37 = vor.u32 %v3422_v11, %v9516_v13  ;;  %7617 = vmatprep.mubr.bf16.mxu0 %v9522_v16  ;;  %v3201_v36 = vmax.f32 %v3169_v24, 0.0  ;;  %v4054_v8 = vrot.slane %v4052_v17, 1  ;;  %v3758_v50 = vld [vmem:[#allocation3 + $0x34] sm:$0xf]  ;;  %7653 = vmatprep.subr.bf16.mxu1 %v7980_v52  ;;  %v6979_v11 = vadd.f32 %v9402_v3, %v9399_v46 }
 0x26f   : > { %v3202_v22 = vmax.f32 %v3170_v0, 0.0  ;;  %v3132_v55 = vadd.f32 %v3050_v32, %v10664_v40  ;;  %v3416_v9 = vsel %vm8485_vm7, %v3408_v5, %v3415_v12  ;;  %v3677_v4 = vsel %vm8459_vm2, %v3417_v58, %v3676_v23  ;;  %v9547_v0 = vpop.f32.mrf.mxu1  ;;  %v3757_v23 = vld [vmem:[#allocation3 + $0x30] sm:$0xf]  ;;  %v10665_v40 = vld [vmem:[#allocation26_spill] sm:$0xff] }
 0x270   : > { %v3680_v47 = vsel %vm8493_vm8, %v3424_v37, %v3679_v43  ;;  %4481 = vmatmul.mubr.bf16.gmra.mxu1 %v9491_v33  ;;  %3675 = vst [vmem:[#allocation3 + $0x4c] sm:$0xf] %v3416_v9  ;;  %3678 = vst [vmem:[#allocation3 + $0x50] sm:$0x1] %v3677_v4  ;;  %v6542_v35 = vpack.c.bf16 %v3201_v36, %v3201_v36  ;;  %v4055_v24 = vor.u32 %v4054_v8, %v4050_v63  ;;  %v7990_v36 = vld [vmem:[#allocation9 + $0x98] sm:$0xff]  }
 0x271   : > { %3681 = vst [vmem:[#allocation3 + $0x54] sm:$0xf] %v3680_v47  ;;  %v6543_v17 = vpack.c.bf16 %v3202_v22, %v3202_v22  ;;  %v3171_v5 = vadd.f32 %v9351_v38, %v3132_v55  ;;  %7654 = vmatpush3.bf16.msra.mxu1 %v7980_v52  ;;  %v3055_v43 = vadd.f32 %v6979_v11, %v3054_v2  ;;  %v4069_v33 = vshll.u32 %v7977_v26, 16  ;;  %v7992_v63 = vld [vmem:[#allocation9 + $0x38] sm:$0xff]   ;;  %v9558_v55 = vpop.f32.mrf.mxu0  ;;  %v7995_v26 = vld [vmem:[#allocation9 + $0x70] sm:$0xff]   ;;  %v3057_v9 = vpop.f32.mrf.mxu1 }
 0x272   : > { %v9549_v32 = vcombine.low %v3757_v23, %v3758_v50  ;;  %v6982_v46 = vadd.f32 %v9409_v51, %v9406_v44  ;;  %7655 = vmatprep.subr.bf16.mxu1 %v7985_v57  ;;  %v3427_v3 = vshrl.u32 %v6542_v35, 16  ;;  %v3430_v12 = vshll.u32 %v6542_v35, 16  ;;  %v3683_v44 = vld [vmem:[#allocation3 + $0x5c] sm:$0x1]  ;;  %v3686_v47 = vld [vmem:[#allocation3 + $0x60] sm:$0xf] }
 0x273   : > { %v3436_v58 = vshrl.u32 %v6543_v17, 16  ;;  %v3439_v37 = vshll.u32 %v6543_v17, 16  ;;  %v9554_v22 = vsel %vm1241_vm9, %v4055_v24, %v4059_v56  ;;  %v3203_v8 = vmax.f32 %v3171_v5, 0.0  ;;  %v7996_v5 = vld [vmem:[#allocation9 + $0x30] sm:$0xff]  }
 0x274   : > { %v3133_v52 = vadd.f32 %v3055_v43, %v10665_v40  ;;  %v4062_v2 = vshrl.u32 %v9549_v32, 16  ;;  %v3429_v50 = vrot.slane %v3427_v3, 7  ;;  %4488 = vmatprep.mubr.bf16.mxu1 %v9554_v22  ;;  %7618 = vmatmul.mubr.bf16.vlgmr.msra.gmra.mxu0 %v9554_v22  ;;  %v4064_v56 = vshll.u32 %v9549_v32, 16  ;;  %v9568_v23 = vld [vmem:[#allocation9 + $0x90] sm:$0xff]  }
 0x275   : > { %v9560_v51 = vrot.slane %v3436_v58, 7  ;;  %v4071_v4 = vrot.slane %v4069_v33, 1  ;;  %v6544_v11 = vpack.c.bf16 %v3203_v8, %v3203_v8  ;;  %v3058_v17 = vadd.f32 %v6982_v46, %v3057_v9  ;;  %7656 = vmatpush3.bf16.msra.mxu1 %v7985_v57  ;;  %v7979_v29 = vld [vmem:[#allocation3 + $0x44] ss:$0 sps:$4 sm:$0x11]   ;;  %7186 = vmatpush3.bf16.msra.mxu0 %v7992_v63  ;;  %v9573_v57 = vpop.f32.mrf.mxu0 }
 0x276   : > { %v3172_v35 = vadd.f32 %v9351_v38, %v3133_v52  ;;  %v6985_v24 = vadd.f32 %v9421_v42, %v9417_v34  ;;  %v3432_v43 = vor.u32 %v3430_v12, %v3429_v50  ;;  %v3434_v3 = vrot.slane %v3429_v50, 4  ;;  %7657 = vmatprep.subr.bf16.mxu1 %v7990_v36  ;;  %v8000_v33 = vld [vmem:[#allocation9 + $0x68] sm:$0xff]   ;;  %7187 = vmatprep.subr.bf16.mxu0 %v7995_v26 }
 0x277   : > { %v3441_v58 = vor.u32 %v3439_v37, %v9560_v51  ;;  %v3442_v40 = vrot.slane %v9560_v51, 4  ;;  %v3444_v46 = vshrl.u32 %v6544_v11, 16  ;;  %v3447_v8 = vshll.u32 %v6544_v11, 16  ;;  %v3760_v42 = vld [vmem:[#allocation3 + $0x40] sm:$0xf] }
 0x278   : > { %4489 = vmatmul.mubr.bf16.gmra.mxu1 %v9522_v16  ;;  %v3204_v52 = vmax.f32 %v3172_v35, 0.0  ;;  %v4066_v34 = vrot.slane %v4064_v56, 1  ;;  %v10666_v12 = vrot.slane %v9516_v13, 4  ;;  %v3684_v50 = vsel %vm8459_vm2, %v3434_v3, %v3683_v44  ;;  %v3759_v13 = vld [vmem:[#allocation3 + $0x3c] sm:$0xf] }
 0x279   : > { %v3687_v63 = vsel %vm8493_vm8, %v3441_v58, %v3686_v47  ;;  %v3134_v16 = vadd.f32 %v3058_v17, %v9342_v61  ;;  %3685 = vst [vmem:[#allocation3 + $0x5c] sm:$0x1] %v3684_v50  ;;  %v3446_v51 = vrot.slane %v3444_v46, 7  ;;  %v3063_v26 = vadd.f32 %v9511_v10, %v6985_v24  ;;  %7658 = vmatpush3.bf16.msra.mxu1 %v7990_v36  ;;  %v3690_v11 = vld [vmem:[#allocation3 + $0x68] sm:$0x1]  ;;  %v8001_v61 = vld [vmem:[#allocation9 + $0x28] sm:$0xff]   ;;  %v9591_v10 = vpop.f32.mrf.mxu1  ;;  %v9593_v36 = vpop.f32.mrf.mxu0 }
 0x27a   : > { %v3433_v37 = vsel %vm8485_vm7, %v10666_v12, %v3432_v43  ;;  %3688 = vst [vmem:[#allocation3 + $0x60] sm:$0xf] %v3687_v63  ;;  %v6545_v9 = vpack.c.bf16 %v3204_v52, %v3204_v52  ;;  %v4067_v56 = vor.u32 %v4066_v34, %v4062_v2  ;;  %v9586_v43 = vcombine.low %v3759_v13, %v3760_v42  ;;  %v8004_v24 = vld [vmem:[#allocation9 + $0x60] sm:$0xff]   ;;  %v10667_v52 = vld [vmem:[#allocation28_spill] sm:$0xff] }
 0x27b   : > { %3682 = vst [vmem:[#allocation3 + $0x58] sm:$0xf] %v3433_v37  ;;  %v3173_v35 = vadd.f32 %v9351_v38, %v3134_v16  ;;  %v4081_v44 = vshll.u32 %v7979_v29, 16  ;;  %v6988_v47 = vadd.f32 %v9438_v21, %v9431_v59  ;;  %7188 = vmatpush3.bf16.msra.mxu0 %v7996_v5  ;;  %7659 = vmatprep.subr.bf16.mxu1 %v9568_v23  ;;  %v3451_v3 = vrot.slane %v3446_v51, 4  ;;  %v8008_v5 = vld [vmem:[#allocation9 + $0x88] sm:$0xff]   ;;  %v3070_v13 = vpop.f32.mrf.mxu1 }
 0x27c   : > { %v3449_v17 = vor.u32 %v3447_v8, %v3446_v51  ;;  %v3453_v2 = vshrl.u32 %v6545_v9, 16  ;;  %v3456_v58 = vshll.u32 %v6545_v9, 16  ;;  %7189 = vmatprep.subr.bf16.mxu0 %v8000_v33  ;;  %v9596_v46 = vsel %vm1241_vm9, %v4067_v56, %v4071_v4  ;;  %v3693_v12 = vld [vmem:[#allocation3 + $0x6c] sm:$0xf]  ;;  %v8005_v33 = vld [vmem:[#allocation9 + $0x20] sm:$0xff]  }
 0x27d   : > { %v3205_v29 = vmax.f32 %v3173_v35, 0.0  ;;  %v3135_v59 = vadd.f32 %v3063_v26, %v10667_v52  ;;  %v4074_v21 = vshrl.u32 %v9586_v43, 16  ;;  %v3691_v34 = vsel %vm8459_vm2, %v3451_v3, %v3690_v11  ;;  %4496 = vmatprep.mubr.bf16.mxu1 %v9596_v46  ;;  %7621 = vmatprep.mubr.bf16.mxu0 %v9596_v46  ;;  %v3762_v16 = vld [vmem:[#allocation3 + $0x4c] sm:$0xf]  ;;  %v9617_v35 = vpop.f32.mrf.mxu0 }
 0x27e   : > { %v3450_v8 = vsel %vm8485_vm7, %v3442_v40, %v3449_v17  ;;  %v9604_v42 = vrot.slane %v3453_v2, 7  ;;  %v4076_v4 = vshll.u32 %v9586_v43, 16  ;;  %3692 = vst [vmem:[#allocation3 + $0x68] sm:$0x1] %v3691_v34  ;;  %v4083_v63 = vrot.slane %v4081_v44, 1  ;;  %7660 = vmatpush3.bf16.msra.mxu1 %v9568_v23  ;;  %v8017_v44 = vld [vmem:[#allocation9 + $0x80] sm:$0xff]  }
 0x27f   : > { %3689 = vst [vmem:[#allocation3 + $0x64] sm:$0xf] %v3450_v8  ;;  %v6546_v37 = vpack.c.bf16 %v3205_v29, %v3205_v29  ;;  %v3174_v50 = vadd.f32 %v9351_v38, %v3135_v59  ;;  %v3066_v40 = vadd.f32 %v9547_v0, %v6988_v47  ;;  %v7982_v51 = vld [vmem:[#allocation3 + $0x50] ss:$0 sps:$4 sm:$0x11]   ;;  %7190 = vmatpush3.bf16.msra.mxu0 %v8001_v61 }
 0x280   : > { %v3458_v9 = vor.u32 %v3456_v58, %v9604_v42  ;;  %v3459_v56 = vrot.slane %v9604_v42, 4  ;;  %4497 = vmatmul.mubr.bf16.gmra.mxu1 %v9554_v22  ;;  %v4078_v26 = vrot.slane %v4076_v4, 1  ;;  %v6991_v11 = vadd.f32 %v9450_v60, %v9441_v49  ;;  %7191 = vmatprep.subr.bf16.mxu0 %v8004_v24  ;;  %v8009_v0 = vld [vmem:[#allocation9 + $0x58] sm:$0xff]   ;;  %v3761_v2 = vld [vmem:[#allocation3 + $0x48] sm:$0xf]  ;;  %v9628_v4 = vpop.f32.mrf.mxu1 }
 0x281   : > { %v3461_v47 = vshrl.u32 %v6546_v37, 16  ;;  %v3464_v17 = vshll.u32 %v6546_v37, 16  ;;  %v3206_v23 = vmax.f32 %v3174_v50, 0.0  ;;  %v10668_v61 = vld [vmem:[#allocation29_spill] sm:$0xff]  ;;  %7661 = vmatprep.subr.bf16.mxu1 %v8008_v5  ;;  %v9622_v52 = vcombine.low %v3761_v2, %v3762_v16  ;;  %v8013_v16 = vld [vmem:[#allocation9 + $0x50] sm:$0xff]  }
 0x282   : > { %v3136_v3 = vadd.f32 %v3066_v40, %v10668_v61  ;;  %v3694_v22 = vsel %vm8493_vm8, %v3458_v9, %v3693_v12  ;;  %v4079_v58 = vor.u32 %v4078_v26, %v4074_v21  ;;  %v3071_v29 = vadd.f32 %v6991_v11, %v3070_v13  ;;  %7662 = vmatpush3.bf16.msra.mxu1 %v8008_v5  ;;  %v8010_v8 = vld [vmem:[#allocation9 + $0x18] sm:$0xff]   ;;  %v10669_v12 = vld [vmem:[#allocation30_spill] sm:$0xff]  ;;  %v9633_v40 = vpop.f32.mrf.mxu0 }
 0x283   : > { %3695 = vst [vmem:[#allocation3 + $0x6c] sm:$0xf] %v3694_v22  ;;  %v3463_v49 = vrot.slane %v3461_v47, 7  ;;  %v6547_v60 = vpack.c.bf16 %v3206_v23, %v3206_v23  ;;  %v4093_v59 = vshll.u32 %v7982_v51, 16  ;;  %7192 = vmatpush3.bf16.msra.mxu0 %v8005_v33  ;;  %v3697_v34 = vld [vmem:[#allocation3 + $0x74] sm:$0x1]  ;;  %7663 = vmatprep.subr.bf16.mxu1 %v8017_v44 }
 0x284   : > { %v3175_v24 = vadd.f32 %v9351_v38, %v3136_v3  ;;  %v9626_v42 = vsel %vm1241_vm9, %v4079_v58, %v4083_v63  ;;  %v3137_v21 = vadd.f32 %v3071_v29, %v10669_v12  ;;  %v4086_v37 = vshrl.u32 %v9622_v52, 16  ;;  %7193 = vmatprep.subr.bf16.mxu0 %v8009_v0  ;;  %v8026_v63 = vld [vmem:[#allocation9 + $0x1f8] sm:$0xff]   ;;  %v9638_v23 = vld [vmem:[#allocation3 + $0x58] sm:$0xf]  ;;  %v3073_v29 = vpop.f32.mrf.mxu1 }
 0x285   : > { %v4088_v50 = vshll.u32 %v9622_v52, 16  ;;  %v3466_v33 = vor.u32 %v3464_v17, %v3463_v49  ;;  %v3468_v5 = vrot.slane %v3463_v49, 4  ;;  %v3470_v51 = vshrl.u32 %v6547_v60, 16  ;;  %4504 = vmatprep.mubr.bf16.mxu1 %v9626_v42  ;;  %7622 = vmatmul.mubr.bf16.gmra.mxu0 %v9626_v42  ;;  %v3700_v2 = vld [vmem:[#allocation3 + $0x78] sm:$0xf] }
 0x286   : > { %v3473_v9 = vshll.u32 %v6547_v60, 16  ;;  %v3207_v26 = vmax.f32 %v3175_v24, 0.0  ;;  %v3176_v13 = vadd.f32 %v9351_v38, %v3137_v21  ;;  %v4095_v47 = vrot.slane %v4093_v59, 1  ;;  %7664 = vmatpush3.bf16.msra.mxu1 %v8017_v44  ;;  %v3763_v60 = vld [vmem:[#allocation3 + $0x54] sm:$0xf]  ;;  %v9651_v24 = vpop.f32.mrf.mxu0  ;;  %v8014_v59 = vld [vmem:[#allocation9 + $0x10] sm:$0xff]  }
 0x287   : > { %v4090_v11 = vrot.slane %v4088_v50, 1  ;;  %v3467_v0 = vsel %vm8485_vm7, %v3459_v56, %v3466_v33  ;;  %v3698_v17 = vsel %vm8459_vm2, %v3468_v5, %v3697_v34  ;;  %v9644_v61 = vrot.slane %v3470_v51, 7  ;;  %7194 = vmatpush3.bf16.msra.mxu0 %v8010_v8  ;;  %v8018_v34 = vld [vmem:[#allocation9 + $0x48] sm:$0xff]   ;;  %7321 = vmatprep.subr.bf16.mxu1 %v8026_v63  ;;  %v9670_v5 = vpop.f32.mrf.mxu1 }
 0x288   : > { %v6994_v3 = vadd.f32 %v9464_v45, %v9456_v7  ;;  %3696 = vst [vmem:[#allocation3 + $0x70] sm:$0xf] %v3467_v0  ;;  %3699 = vst [vmem:[#allocation3 + $0x74] sm:$0x1] %v3698_v17  ;;  %4505 = vmatmul.mubr.bf16.gmra.mxu1 %v9596_v46  ;;  %v6548_v22 = vpack.c.bf16 %v3207_v26, %v3207_v26  ;;  %v3208_v58 = vmax.f32 %v3176_v13, 0.0  ;;  %7195 = vmatprep.subr.bf16.mxu0 %v8013_v16  ;;  %v9673_v13 = vpop.f32.mrf.mxu0  ;;  %v10670_v17 = vld [vmem:[#allocation31_spill] sm:$0xff] }
 0x289   : > { %v4091_v49 = vor.u32 %v4090_v11, %v4086_v37  ;;  %v6997_v56 = vadd.f32 %v9486_v54, %v9474_v18  ;;  %v3475_v7 = vor.u32 %v3473_v9, %v9644_v61  ;;  %v3476_v45 = vrot.slane %v9644_v61, 4  ;;  %v9658_v46 = vld [vmem:[#allocation3 + $0x5c] ss:$0 sps:$4 sm:$0x11]   ;;  %v8019_v11 = vld [vmem:[#allocation9 + $0x8] sm:$0xff]  }
 0x28a   : > { %v3074_v44 = vadd.f32 %v6994_v3, %v3073_v29  ;;  %v9656_v8 = vcombine.low %v3763_v60, %v9638_v23  ;;  %v3478_v12 = vshrl.u32 %v6548_v22, 16  ;;  %v3481_v21 = vshll.u32 %v6548_v22, 16  ;;  %v3707_v0 = vld [vmem:[#allocation3 + $0x84] sm:$0xf] }
 0x28b   : > { %v6549_v18 = vpack.c.bf16 %v3208_v58, %v3208_v58  ;;  %v9661_v54 = vsel %vm1241_vm9, %v4091_v49, %v4095_v47  ;;  %v3701_v37 = vsel %vm8493_vm8, %v3475_v7, %v3700_v2  ;;  %v3079_v16 = vadd.f32 %v9591_v10, %v6997_v56  ;;  %7196 = vmatpush3.bf16.msra.mxu0 %v8014_v59  ;;  %v3704_v47 = vld [vmem:[#allocation3 + $0x80] sm:$0x1]  ;;  %v8024_v2 = vld [vmem:[#allocation9 + $0x40] sm:$0xff]   ;;  %v9682_v56 = vld [vmem:[#allocation3 + $0x68] ss:$0 sps:$4 sm:$0x11]  }
 0x28c   : > { %4512 = vmatprep.mubr.bf16.mxu1 %v9661_v54  ;;  %7625 = vmatprep.mubr.bf16.mxu0 %v9661_v54  ;;  %v3138_v50 = vadd.f32 %v3074_v44, %v9346_v48  ;;  %v4098_v33 = vshrl.u32 %v9656_v8, 16  ;;  %3702 = vst [vmem:[#allocation3 + $0x78] sm:$0xf] %v3701_v37  ;;  %v3480_v51 = vrot.slane %v3478_v12, 7  ;;  %v4100_v26 = vshll.u32 %v9656_v8, 16  ;;  %v3086_v12 = vpop.f32.mrf.mxu1  ;;  %v9695_v37 = vpop.f32.mrf.mxu0 }
 0x28d   : > { %v3487_v9 = vshrl.u32 %v6549_v18, 16  ;;  %v3490_v63 = vshll.u32 %v6549_v18, 16  ;;  %v3139_v10 = vadd.f32 %v3079_v16, %v10670_v17  ;;  %v4105_v61 = vshll.u32 %v9658_v46, 16  ;;  %7197 = vmatprep.subr.bf16.mxu0 %v8018_v34  ;;  %v9686_v18 = vld [vmem:[#allocation3 + $0x64] sm:$0xf]  ;;  %v10671_v16 = vld [vmem:[#allocation32_spill] sm:$0xff] }
 0x28e   : > { %v3177_v48 = vadd.f32 %v9351_v38, %v3138_v50  ;;  %v7000_v3 = vadd.f32 %v9519_v62, %v9504_v25  ;;  %v3483_v22 = vor.u32 %v3481_v21, %v3480_v51  ;;  %v3485_v58 = vrot.slane %v3480_v51, 4 }
 0x28f   : > { %v9680_v29 = vrot.slane %v3487_v9, 7  ;;  %v4102_v49 = vrot.slane %v4100_v26, 1  ;;  %v3178_v59 = vadd.f32 %v9351_v38, %v3139_v10  ;;  %v4107_v7 = vrot.slane %v4105_v61, 1  ;;  %7198 = vmatpush3.bf16.msra.mxu0 %v8019_v11  ;;  %v8025_v9 = vld [vmem:[#allocation9] sm:$0xff]   ;;  %v9711_v61 = vpop.f32.mrf.mxu1 }
 0x290   : > { %v3209_v60 = vmax.f32 %v3177_v48, 0.0  ;;  %v3082_v44 = vadd.f32 %v9628_v4, %v7000_v3  ;;  %v3484_v25 = vsel %vm8485_vm7, %v3476_v45, %v3483_v22  ;;  %v3705_v62 = vsel %vm8459_vm2, %v3485_v58, %v3704_v47  ;;  %4513 = vmatmul.mubr.bf16.gmra.mxu1 %v9626_v42  ;;  %v3765_v45 = vld [vmem:[#allocation3 + $0x60] sm:$0xf]  ;;  %7199 = vmatprep.subr.bf16.mxu0 %v8024_v2  ;;  %v9706_v47 = vld [vmem:[#allocation9 + $0x238] sm:$0xff]   ;;  %v7014_v22 = vpop.f32.mrf.mxu0 }
 0x291   : > { %v3492_v34 = vor.u32 %v3490_v63, %v9680_v29  ;;  %v3493_v21 = vrot.slane %v9680_v29, 4  ;;  %3703 = vst [vmem:[#allocation3 + $0x7c] sm:$0xf] %v3484_v25  ;;  %3706 = vst [vmem:[#allocation3 + $0x80] sm:$0x1] %v3705_v62  ;;  %v3210_v4 = vmax.f32 %v3178_v59, 0.0  ;;  %v4103_v50 = vor.u32 %v4102_v49, %v4098_v33 }
 0x292   : > { %v6550_v38 = vpack.c.bf16 %v3209_v60, %v3209_v60  ;;  %v3140_v51 = vadd.f32 %v3082_v44, %v10671_v16  ;;  %v7003_v26 = vadd.f32 %v9558_v55, %v9544_v31  ;;  %v9703_v42 = vcombine.low %v3765_v45, %v9686_v18  ;;  %v9718_v31 = vld [vmem:[%s10588_s2] ss:$0 sm:$0xff]  ;;  %v3711_v59 = vld [vmem:[#allocation3 + $0x8c] sm:$0x1]  ;;  %v10672_v44 = vld [vmem:[#allocation33_spill] sm:$0xff] }
 0x293   : > { %v3708_v63 = vsel %vm8493_vm8, %v3492_v34, %v3707_v0  ;;  %v4117_v11 = vshll.u32 %v9682_v56, 16  ;;  %v6551_v17 = vpack.c.bf16 %v3210_v4, %v3210_v4  ;;  %v9709_v10 = vsel %vm1241_vm9, %v4103_v50, %v4107_v7  ;;  %7200 = vmatpush3.bf16.msra.mxu0 %v8025_v9  ;;  %v3089_v50 = vpop.f32.mrf.mxu1  ;;  %v3714_v45 = vld [vmem:[#allocation3 + $0x90] sm:$0xf] }
 0x294   : > { %3709 = vst [vmem:[#allocation3 + $0x84] sm:$0xf] %v3708_v63  ;;  %v3495_v33 = vshrl.u32 %v6550_v38, 16  ;;  %v3498_v48 = vshll.u32 %v6550_v38, 16  ;;  %4520 = vmatprep.mubr.bf16.mxu1 %v9709_v10  ;;  %7626 = vmatmul.mubr.bf16.gmra.mxu0 %v9709_v10  ;;  %v3179_v55 = vadd.f32 %v9718_v31, %v3140_v51  ;;  %v3087_v0 = vadd.f32 %v7003_v26, %v3086_v12 }
 0x295   : > { %v4110_v3 = vshrl.u32 %v9703_v42, 16  ;;  %v4112_v2 = vshll.u32 %v9703_v42, 16  ;;  %v3504_v29 = vshrl.u32 %v6551_v17, 16  ;;  %v3507_v49 = vshll.u32 %v6551_v17, 16  ;;  %7697 = vmatprep.subr.bf16.mxu0 %v9706_v47 }
 0x296   : > { %v3497_v58 = vrot.slane %v3495_v33, 7  ;;  %v4119_v60 = vrot.slane %v4117_v11, 1  ;;  %v3211_v7 = vmax.f32 %v3179_v55, 0.0  ;;  %v3141_v25 = vadd.f32 %v3087_v0, %v10672_v44  ;;  %v9729_v51 = vld [vmem:[#allocation3 + $0x74] ss:$0 sps:$4 sm:$0x11]  }
 0x297   : > { %v4114_v62 = vrot.slane %v4112_v2, 1  ;;  %v7006_v34 = vadd.f32 %v9593_v36, %v9573_v57  ;;  %v3506_v4 = vrot.slane %v3504_v29, 7  ;;  %v7009_v16 = vadd.f32 %v9633_v40, %v9617_v35  ;;  %v9733_v57 = vpop.f32.mrf.mxu0  ;;  %v9739_v40 = vld [vmem:[#allocation3 + $0x70] sm:$0xf] }
 0x298   : > { %v3500_v12 = vor.u32 %v3498_v48, %v3497_v58  ;;  %v3502_v38 = vrot.slane %v3497_v58, 4  ;;  %4521 = vmatmul.mubr.bf16.gmra.mxu1 %v9661_v54  ;;  %v6552_v9 = vpack.c.bf16 %v3211_v7, %v3211_v7  ;;  %v3180_v63 = vadd.f32 %v9718_v31, %v3141_v25  ;;  %v3767_v58 = vld [vmem:[#allocation3 + $0x6c] sm:$0xf]  ;;  %v9754_v7 = vpop.f32.mrf.mxu1 }
 0x299   : > { %v4115_v26 = vor.u32 %v4114_v62, %v4110_v3  ;;  %v3090_v11 = vadd.f32 %v7006_v34, %v3089_v50  ;;  %v3509_v48 = vor.u32 %v3507_v49, %v3506_v4  ;;  %v3510_v35 = vrot.slane %v3506_v4, 4  ;;  %v7017_v25 = vpop.f32.mrf.mxu0  ;;  %v3718_v62 = vld [vmem:[#allocation3 + $0x98] sm:$0x1] }
 0x29a   : > { %v3501_v36 = vsel %vm8485_vm7, %v3493_v21, %v3500_v12  ;;  %v3712_v33 = vsel %vm8459_vm2, %v3502_v38, %v3711_v59  ;;  %v3512_v54 = vshrl.u32 %v6552_v9, 16  ;;  %v3515_v17 = vshll.u32 %v6552_v9, 16  ;;  %v10673_v34 = vld [vmem:[#allocation34_spill] sm:$0xff] }
 0x29b   : > { %3710 = vst [vmem:[#allocation3 + $0x88] sm:$0xf] %v3501_v36  ;;  %3713 = vst [vmem:[#allocation3 + $0x8c] sm:$0x1] %v3712_v33  ;;  %v3212_v55 = vmax.f32 %v3180_v63, 0.0  ;;  %v9742_v0 = vsel %vm1241_vm9, %v4115_v26, %v4119_v60  ;;  %v3715_v3 = vsel %vm8493_vm8, %v3509_v48, %v3714_v45  ;;  %v3142_v21 = vadd.f32 %v3090_v11, %v9361_v39  ;;  %v3102_v48 = vpop.f32.mrf.mxu1 }
 0x29c   : > { %4528 = vmatprep.mubr.bf16.mxu1 %v9742_v0  ;;  %7629 = vmatprep.mubr.bf16.mxu0 %v9742_v0  ;;  %v3095_v2 = vadd.f32 %v9670_v5, %v7009_v16  ;;  %v4129_v29 = vshll.u32 %v9729_v51, 16  ;;  %3716 = vst [vmem:[#allocation3 + $0x90] sm:$0xf] %v3715_v3  ;;  %v3514_v49 = vrot.slane %v3512_v54, 7  ;;  %v9752_v60 = vcombine.low %v3767_v58, %v9739_v40  ;;  %v7019_v54 = vpop.f32.mrf.mxu0 }
 0x29d   : > { %v6553_v59 = vpack.c.bf16 %v3212_v55, %v3212_v55  ;;  %v7012_v44 = vadd.f32 %v9673_v13, %v9651_v24  ;;  %v3181_v39 = vadd.f32 %v9718_v31, %v3142_v21  ;;  %v7015_v38 = vadd.f32 %v7014_v22, %v9695_v37  ;;  %v9764_v13 = vld [vmem:[#allocation3 + $0x7c] sm:$0xf] }
 0x29e   : > { %v3143_v5 = vadd.f32 %v3095_v2, %v10673_v34  ;;  %v4131_v12 = vrot.slane %v4129_v29, 1  ;;  %v3517_v4 = vor.u32 %v3515_v17, %v3514_v49  ;;  %v3519_v50 = vrot.slane %v3514_v49, 4  ;;  %v3721_v22 = vld [vmem:[#allocation3 + $0x9c] sm:$0xf]  ;;  %v3769_v2 = vld [vmem:[#allocation3 + $0x78] sm:$0xf] }
 0x29f   : > { %v3521_v16 = vshrl.u32 %v6553_v59, 16  ;;  %v3524_v45 = vshll.u32 %v6553_v59, 16  ;;  %v3213_v9 = vmax.f32 %v3181_v39, 0.0  ;;  %v4122_v26 = vshrl.u32 %v9752_v60, 16  ;;  %v10674_v29 = vld [vmem:[#allocation37_spill] sm:$0xff] }
 0x2a0   : > { %v3182_v63 = vadd.f32 %v9718_v31, %v3143_v5  ;;  %v4124_v24 = vshll.u32 %v9752_v60, 16  ;;  %v3518_v11 = vsel %vm8485_vm7, %v3510_v35, %v3517_v4  ;;  %v3719_v36 = vsel %vm8459_vm2, %v3519_v50, %v3718_v62  ;;  %4529 = vmatmul.mubr.bf16.gmra.mxu1 %v9709_v10  ;;  %v9776_v62 = vld [vmem:[#allocation3 + $0x80] ss:$0 sps:$4 sm:$0x11]  }
 0x2a1   : > { %v3523_v37 = vrot.slane %v3521_v16, 7  ;;  %v3098_v33 = vadd.f32 %v9711_v61, %v7012_v44  ;;  %3717 = vst [vmem:[#allocation3 + $0x94] sm:$0xf] %v3518_v11  ;;  %3720 = vst [vmem:[#allocation3 + $0x98] sm:$0x1] %v3719_v36  ;;  %v6554_v17 = vpack.c.bf16 %v3213_v9, %v3213_v9  ;;  %v3103_v21 = vadd.f32 %v7015_v38, %v3102_v48  ;;  %v10675_v38 = vld [vmem:[#allocation38_spill] sm:$0xff]  ;;  %v7020_v16 = vpop.f32.mrf.mxu0  ;;  %v9788_v36 = vpop.f32.mrf.mxu1 }
 0x2a2   : > { %v3214_v55 = vmax.f32 %v3182_v63, 0.0  ;;  %v4126_v3 = vrot.slane %v4124_v24, 1  ;;  %v9774_v59 = vcombine.low %v3769_v2, %v9764_v13  ;;  %v3725_v11 = vld [vmem:[#allocation3 + $0xa4] sm:$0x1] }
 0x2a3   : > { %v3526_v58 = vor.u32 %v3524_v45, %v3523_v37  ;;  %v3527_v35 = vrot.slane %v3523_v37, 4  ;;  %v3144_v49 = vadd.f32 %v3098_v33, %v10674_v29  ;;  %v3529_v10 = vshrl.u32 %v6554_v17, 16 }
 0x2a4   : > { %v3532_v61 = vshll.u32 %v6554_v17, 16  ;;  %v6555_v44 = vpack.c.bf16 %v3214_v55, %v3214_v55  ;;  %v4127_v39 = vor.u32 %v4126_v3, %v4122_v26  ;;  %v3145_v4 = vadd.f32 %v3103_v21, %v10675_v38  ;;  %v3728_v3 = vld [vmem:[#allocation3 + $0xa8] sm:$0xf]  ;;  %v3105_v38 = vpop.f32.mrf.mxu1 }
 0x2a5   : > { %v3722_v34 = vsel %vm8493_vm8, %v3526_v58, %v3721_v22  ;;  %v3183_v5 = vadd.f32 %v9718_v31, %v3144_v49  ;;  %v4134_v50 = vshrl.u32 %v9774_v59, 16  ;;  %v3531_v45 = vrot.slane %v3529_v10, 7  ;;  %v9795_v49 = vld [vmem:[#allocation3 + $0x88] sm:$0xf]  ;;  %v7022_v10 = vpop.f32.mrf.mxu0 }
 0x2a6   : > { %3723 = vst [vmem:[#allocation3 + $0x9c] sm:$0xf] %v3722_v34  ;;  %v3538_v9 = vshrl.u32 %v6555_v44, 16  ;;  %v3541_v63 = vshll.u32 %v6555_v44, 16  ;;  %v9784_v24 = vsel %vm1241_vm9, %v4127_v39, %v4131_v12  ;;  %v3184_v37 = vadd.f32 %v9718_v31, %v3145_v4 }
 0x2a7   : > { %4536 = vmatprep.mubr.bf16.mxu1 %v9784_v24  ;;  %7630 = vmatmul.mubr.bf16.gmra.mxu0 %v9784_v24  ;;  %v3215_v26 = vmax.f32 %v3183_v5, 0.0  ;;  %v4136_v22 = vshll.u32 %v9774_v59, 16  ;;  %v4141_v33 = vshll.u32 %v9776_v62, 16  ;;  %v3534_v48 = vor.u32 %v3532_v61, %v3531_v45  ;;  %v3771_v5 = vld [vmem:[#allocation3 + $0x84] sm:$0xf] }
 0x2a8   : > { %v3536_v17 = vrot.slane %v3531_v45, 4  ;;  %v3540_v55 = vrot.slane %v3538_v9, 7  ;;  %v7018_v12 = vadd.f32 %v7017_v25, %v9733_v57  ;;  %4537 = vmatmul.mubr.bf16.gmra.mxu1 %v9742_v0  ;;  %v3216_v2 = vmax.f32 %v3184_v37, 0.0  ;;  %v9801_v45 = vld [vmem:[#allocation3 + $0x8c] ss:$0 sps:$4 sm:$0x11]  }
 0x2a9   : > { %v6556_v21 = vpack.c.bf16 %v3215_v26, %v3215_v26  ;;  %v4138_v58 = vrot.slane %v4136_v22, 1  ;;  %v4143_v29 = vrot.slane %v4141_v33, 1  ;;  %v3535_v44 = vsel %vm8485_vm7, %v3527_v35, %v3534_v48  ;;  %v7023_v48 = vpop.f32.mrf.mxu0 }
 0x2aa   : > { %v3726_v61 = vsel %vm8459_vm2, %v3536_v17, %v3725_v11  ;;  %v3543_v39 = vor.u32 %v3541_v63, %v3540_v55  ;;  %v3544_v34 = vrot.slane %v3540_v55, 4  ;;  %3724 = vst [vmem:[#allocation3 + $0xa0] sm:$0xf] %v3535_v44  ;;  %v6557_v25 = vpack.c.bf16 %v3216_v2, %v3216_v2  ;;  %v3732_v17 = vld [vmem:[#allocation3 + $0xb0] sm:$0x1] }
 0x2ab   : > { %3727 = vst [vmem:[#allocation3 + $0xa4] sm:$0x1] %v3726_v61  ;;  %v3546_v57 = vshrl.u32 %v6556_v21, 16  ;;  %v3549_v0 = vshll.u32 %v6556_v21, 16  ;;  %v4139_v4 = vor.u32 %v4138_v58, %v4134_v50  ;;  %v3106_v26 = vadd.f32 %v7018_v12, %v3105_v38  ;;  %v3773_v38 = vld [vmem:[#allocation3 + $0x90] sm:$0xf] }
 0x2ac   : > { %v3729_v9 = vsel %vm8493_vm8, %v3543_v39, %v3728_v3  ;;  %v7021_v35 = vadd.f32 %v7020_v16, %v7019_v54  ;;  %v9806_v37 = vcombine.low %v3771_v5, %v9795_v49  ;;  %v3555_v11 = vshrl.u32 %v6557_v25, 16  ;;  %v9820_v58 = vld [vmem:[#allocation3 + $0x98] ss:$0 sps:$4 sm:$0x11]  }
 0x2ad   : > { %3730 = vst [vmem:[#allocation3 + $0xa8] sm:$0xf] %v3729_v9  ;;  %v3548_v63 = vrot.slane %v3546_v57, 7  ;;  %v3558_v22 = vshll.u32 %v6557_v25, 16  ;;  %v9809_v33 = vsel %vm1241_vm9, %v4139_v4, %v4143_v29  ;;  %v3146_v50 = vadd.f32 %v3106_v26, %v9374_v41  ;;  %v3735_v29 = vld [vmem:[#allocation3 + $0xb4] sm:$0xf] }
 0x2ae   : > { %4544 = vmatprep.mubr.bf16.mxu1 %v9809_v33  ;;  %7633 = vmatprep.mubr.bf16.mxu0 %v9809_v33  ;;  %v3111_v54 = vadd.f32 %v9754_v7, %v7021_v35  ;;  %v4146_v16 = vshrl.u32 %v9806_v37, 16  ;;  %v4148_v55 = vshll.u32 %v9806_v37, 16  ;;  %v9817_v21 = vrot.slane %v3555_v11, 7  ;;  %v9824_v7 = vld [vmem:[#allocation3 + $0x94] sm:$0xf] }
 0x2af   : > { %v3551_v3 = vor.u32 %v3549_v0, %v3548_v63  ;;  %v3553_v12 = vrot.slane %v3548_v63, 4  ;;  %v4153_v2 = vshll.u32 %v9801_v45, 16  ;;  %v3185_v44 = vadd.f32 %v9718_v31, %v3146_v50  ;;  %v3775_v11 = vld [vmem:[#allocation3 + $0x9c] sm:$0xf] }
 0x2b0   : > { %v3147_v61 = vadd.f32 %v3111_v54, %v9306_v28  ;;  %v4150_v41 = vrot.slane %v4148_v55, 1  ;;  %v7024_v39 = vadd.f32 %v7023_v48, %v7022_v10  ;;  %v3560_v0 = vor.u32 %v3558_v22, %v9817_v21  ;;  %4545 = vmatmul.mubr.bf16.gmra.mxu1 %v9784_v24 }
 0x2b1   : > { %v3552_v5 = vsel %vm8485_vm7, %v3544_v34, %v3551_v3  ;;  %v3733_v57 = vsel %vm8459_vm2, %v3553_v12, %v3732_v17  ;;  %v3561_v25 = vrot.slane %v9817_v21, 4  ;;  %v3217_v28 = vmax.f32 %v3185_v44, 0.0  ;;  %v9834_v26 = vld [vmem:[#allocation3 + $0xa0] sm:$0xf]  ;;  %v451_v12 = vld [vmem:[#allocation3 + $0xcc] sm:$0x1] }
 0x2b2   : > { %3731 = vst [vmem:[#allocation3 + $0xac] sm:$0xf] %v3552_v5  ;;  %3734 = vst [vmem:[#allocation3 + $0xb0] sm:$0x1] %v3733_v57  ;;  %v3186_v10 = vadd.f32 %v9718_v31, %v3147_v61  ;;  %v4151_v4 = vor.u32 %v4150_v41, %v4146_v16  ;;  %v4155_v9 = vrot.slane %v4153_v2, 1  ;;  %v3736_v34 = vsel %vm8493_vm8, %v3560_v0, %v3735_v29 }
 0x2b3   : > { %v3114_v35 = vadd.f32 %v9788_v36, %v7024_v39  ;;  %v9840_v63 = vcombine.low %v3773_v38, %v9824_v7  ;;  %v4165_v24 = vshll.u32 %v9820_v58, 16  ;;  %v9843_v22 = vld [vmem:[#allocation3 + $0xa4] ss:$0 sps:$4 sm:$0x11]   ;;  %3737 = vst [vmem:[#allocation3 + $0xb4] sm:$0xf] %v3736_v34  ;;  %v6558_v48 = vpack.c.bf16 %v3217_v28, %v3217_v28 }
 0x2b4   : > { %v3218_v17 = vmax.f32 %v3186_v10, 0.0  ;;  %v9846_v50 = vsel %vm1241_vm9, %v4151_v4, %v4155_v9  ;;  %v9849_v54 = vcombine.low %v3775_v11, %v9834_v26  ;;  %v3739_v61 = vld [vmem:[#allocation3 + $0xbc] sm:$0x1]  ;;  %v4177_v57 = vshll.u32 %v9843_v22, 16  ;;  %v3777_v10 = vld [vmem:[#allocation3 + $0xa8] sm:$0xf] }
 0x2b5   : > { %4552 = vmatprep.mubr.bf16.mxu1 %v9846_v50  ;;  %7634 = vmatmul.mubr.bf16.gmra.mxu0 %v9846_v50  ;;  %v3148_v36 = vadd.f32 %v3114_v35, %v9331_v30  ;;  %v4158_v16 = vshrl.u32 %v9840_v63, 16  ;;  %v4160_v55 = vshll.u32 %v9840_v63, 16  ;;  %v4167_v3 = vrot.slane %v4165_v24, 1  ;;  %v505_v30 = vld [vmem:[#allocation3 + $0xd4] sm:$0x1] }
 0x2b6   : > { %10676 = vst [vmem:[#allocation27_spill] sm:$0xff] %v9849_v54  ;;  %v3563_v21 = vshrl.u32 %v6558_v48, 16  ;;  %v3566_v2 = vshll.u32 %v6558_v48, 16  ;;  %v6559_v29 = vpack.c.bf16 %v3218_v17, %v3218_v17  ;;  %v4170_v44 = vshrl.u32 %v9849_v54, 16 }
 0x2b7   : > { %v3187_v41 = vadd.f32 %v9718_v31, %v3148_v36  ;;  %v4162_v39 = vrot.slane %v4160_v55, 1  ;;  %v4172_v5 = vshll.u32 %v9849_v54, 16  ;;  %v452_v4 = vsel %vm8459_vm2, 0, %v451_v12  ;;  %v3742_v55 = vld [vmem:[#allocation3 + $0xc0] sm:$0xf] }
 0x2b8   : > { %v3565_v0 = vrot.slane %v3563_v21, 7  ;;  %v3572_v38 = vshrl.u32 %v6559_v29, 16  ;;  %v3575_v28 = vshll.u32 %v6559_v29, 16  ;;  %4553 = vmatmul.mubr.bf16.gmra.mxu1 %v9809_v33  ;;  %v4179_v24 = vrot.slane %v4177_v57, 1  ;;  %453 = vst [vmem:[#allocation3 + $0xcc] sm:$0x1] %v452_v4 }
 0x2b9   : > { %v3219_v9 = vmax.f32 %v3187_v41, 0.0  ;;  %v4163_v34 = vor.u32 %v4162_v39, %v4158_v16  ;;  %v4174_v35 = vrot.slane %v4172_v5, 1  ;;  %v9863_v31 = vld [vmem:[#allocation3 + $0xac] sm:$0xf]  ;;  %v506_v33 = vsel %vm8465_vm4, 0, %v505_v30 }
 0x2ba   : > { %v3568_v11 = vor.u32 %v3566_v2, %v3565_v0  ;;  %v3570_v48 = vrot.slane %v3565_v0, 4  ;;  %v3574_v17 = vrot.slane %v3572_v38, 7  ;;  %v9866_v36 = vcombine.low %v3777_v10, %v9863_v31  ;;  %v9869_v54 = vld [vmem:[#allocation3 + $0xb0] ss:$0 sps:$4 sm:$0x11]  }
 0x2bb   : > { %v6560_v21 = vpack.c.bf16 %v3219_v9, %v3219_v9  ;;  %v4168_v29 = vsel %vm1241_vm9, %v4163_v34, %v4167_v3  ;;  %v4175_v12 = vor.u32 %v4174_v35, %v4170_v44  ;;  %507 = vst [vmem:[#allocation3 + $0xd4] sm:$0x1] %v506_v33  ;;  %v4189_v44 = vshll.u32 %v9869_v54, 16  ;;  %v3746_v30 = vld [vmem:[#allocation3 + $0xc8] sm:$0x1] }
 0x2bc   : > { %v3569_v16 = vsel %vm8485_vm7, %v3561_v25, %v3568_v11  ;;  %v3740_v2 = vsel %vm8459_vm2, %v3570_v48, %v3739_v61  ;;  %v3577_v41 = vor.u32 %v3575_v28, %v3574_v17  ;;  %4560 = vmatprep.mubr.bf16.mxu1 %v4168_v29  ;;  %7637 = vmatprep.mubr.bf16.mxu0 %v4168_v29  ;;  %v4184_v25 = vshll.u32 %v9866_v36, 16  ;;  %v9885_v61 = vld [vmem:[#allocation3 + $0xd0] sm:$0xf] }
 0x2bd   : > { %3738 = vst [vmem:[#allocation3 + $0xb8] sm:$0xf] %v3569_v16  ;;  %3741 = vst [vmem:[#allocation3 + $0xbc] sm:$0x1] %v3740_v2  ;;  %v3580_v39 = vshrl.u32 %v6560_v21, 16  ;;  %v9878_v3 = vsel %vm1241_vm9, %v4175_v12, %v4179_v24  ;;  %v3583_v57 = vshll.u32 %v6560_v21, 16 }
 0x2be   : > { %v3743_v19 = vsel %vm8493_vm8, %v3577_v41, %v3742_v55  ;;  %7638 = vmatmul.mubr.bf16.gmra.mxu0 %v9878_v3  ;;  %v4182_v0 = vshrl.u32 %v9866_v36, 16  ;;  %v4186_v38 = vrot.slane %v4184_v25, 1  ;;  %v3578_v10 = vrot.slane %v3574_v17, 4  ;;  %v3779_v24 = vld [vmem:[#allocation3 + $0xb4] sm:$0xf] }
 0x2bf   : > { %3744 = vst [vmem:[#allocation3 + $0xc0] sm:$0xf] %v3743_v19  ;;  %v3582_v5 = vrot.slane %v3580_v39, 7  ;;  %v3783_v28 = vld [vmem:[#allocation3 + $0xcc] sm:$0xf]  ;;  %v4191_v35 = vrot.slane %v4189_v44, 1 }
 0x2c0   : > { %4561 = vmatmul.mubr.bf16.gmra.mxu1 %v9846_v50  ;;  %v9890_v9 = vcombine.low %v3783_v28, %v9885_v61  ;;  %v4187_v34 = vor.u32 %v4186_v38, %v4182_v0  ;;  %v5236_v0 = vld [vmem:[#allocation3 + $0x60] sm:$0xe] }
 0x2c1   : > { %v3585_v4 = vor.u32 %v3583_v57, %v3582_v5  ;;  %v3587_v6 = vrot.slane %v3582_v5, 4  ;;  %4568 = vmatprep.mubr.bf16.mxu1 %v9878_v3  ;;  %v5235_v5 = vld [vmem:[#allocation3 + $0x54] sm:$0xe] }
 0x2c2   : > { %v9897_v55 = vld [vmem:[#allocation3 + $0xd4] ss:$0 sps:$4 sm:$0x11]   ;;  %v9900_v50 = vsel %vm1241_vm9, %v4187_v34, %v4191_v35  ;;  %v4218_v21 = vshrl.u32 %v9890_v9, 16  ;;  %v4220_v12 = vshll.u32 %v9890_v9, 16 }
 0x2c3   : > { %v3586_v11 = vsel %vm8485_vm7, %v3578_v10, %v3585_v4  ;;  %v3747_v48 = vsel %vm8459_vm2, %v3587_v6, %v3746_v30  ;;  %7641 = vmatprep.mubr.bf16.mxu0 %v9900_v50  ;;  %v4225_v33 = vshll.u32 %v9897_v55, 16  ;;  %v6487_v30 = vcombine.low %v5235_v5, %v9638_v23 }
 0x2c4   : > { %3745 = vst [vmem:[#allocation3 + $0xc4] sm:$0xf] %v3586_v11  ;;  %3748 = vst [vmem:[#allocation3 + $0xc8] sm:$0x1] %v3747_v48  ;;  %v9902_v17 = vld [vmem:[#allocation3 + $0xb8] sm:$0xf] }
 0x2c5   : > { %v9908_v14 = vcombine.low %v3779_v24, %v9902_v17  ;;  %v9910_v15 = vld [vmem:[#allocation3 + $0xbc] ss:$0 sps:$4 sm:$0x11]   ;;  %v4222_v16 = vrot.slane %v4220_v12, 1  ;;  %v4227_v19 = vrot.slane %v4225_v33, 1  ;;  %v5322_v4 = vrot.slane %v9658_v46, 1 }
 0x2c6   : > { %v4201_v41 = vshll.u32 %v9910_v15, 16  ;;  %v3781_v57 = vld [vmem:[#allocation3 + $0xc0] sm:$0xf]  ;;  %v5321_v35 = vrot.slane %v6487_v30, 1  ;;  %v6488_v24 = vcombine.low %v5236_v0, %v9686_v18  ;;  %v5237_v11 = vld [vmem:[#allocation3 + $0x6c] sm:$0xe] }
 0x2c7   : > { %v4196_v2 = vshll.u32 %v9908_v14, 16  ;;  %v4223_v39 = vor.u32 %v4222_v16, %v4218_v21  ;;  %v4194_v25 = vshrl.u32 %v9908_v14, 16  ;;  %v5325_v23 = vrot.slane %v9682_v56, 1 }
 0x2c8   : > { %4569 = vmatmul.mubr.bf16.gmra.mxu1 %v4168_v29  ;;  %v4203_v28 = vrot.slane %v4201_v41, 1  ;;  %v6489_v21 = vcombine.low %v5237_v11, %v9739_v40  ;;  %v5328_v12 = vrot.slane %v9729_v51, 1  ;;  %v9936_v18 = vsel %vm2529_vm10, %v5321_v35, %v5322_v4  ;;  %v5242_v35 = vld [vmem:[#allocation3 + $0xa8] sm:$0xe] }
 0x2c9   : > { %v4198_v44 = vrot.slane %v4196_v2, 1  ;;  %4576 = vmatprep.mubr.bf16.mxu1 %v9900_v50  ;;  %v4228_v29 = vsel %vm1241_vm9, %v4223_v39, %v4227_v19  ;;  %v5238_v2 = vld [vmem:[#allocation3 + $0x78] sm:$0xe]  ;;  %v5324_v41 = vrot.slane %v6488_v24, 1  ;;  %v5331_v40 = vrot.slane %v9776_v62, 1 }
 0x2ca   : > { %v5327_v39 = vrot.slane %v6489_v21, 1  ;;  %v6490_v56 = vcombine.low %v5238_v2, %v9764_v13  ;;  %v5239_v19 = vld [vmem:[#allocation3 + $0x84] sm:$0xe]  ;;  %v5334_v5 = vrot.slane %v9801_v45, 1  ;;  %v5241_v62 = vld [vmem:[#allocation3 + $0x9c] sm:$0xe] }
 0x2cb   : > { %v4199_v38 = vor.u32 %v4198_v44, %v4194_v25  ;;  %v3782_v10 = vld [vmem:[#allocation3 + $0xc4] sm:$0xf]  ;;  %v9921_v34 = vld [vmem:[#allocation3 + $0xc8] ss:$0 sps:$4 sm:$0x11]   ;;  %v6491_v44 = vcombine.low %v5239_v19, %v9795_v49  ;;  %v9944_v30 = vsel %vm2529_vm10, %v5324_v41, %v5325_v23  ;;  %v5337_v49 = vrot.slane %v9820_v58, 1 }
 0x2cc   : > { %v9919_v6 = vcombine.low %v3781_v57, %v3782_v10  ;;  %v4213_v16 = vshll.u32 %v9921_v34, 16  ;;  %v5240_v57 = vld [vmem:[#allocation3 + $0x90] sm:$0xe]  ;;  %v9947_v0 = vsel %vm2529_vm10, %v5327_v39, %v5328_v12  ;;  %v6493_v45 = vcombine.low %v5241_v62, %v9834_v26  ;;  %v5243_v58 = vld [vmem:[#allocation3 + $0xb4] sm:$0xe]  ;;  %v8029_v19 = vld [vmem:[#allocation9 + $0x1f0] sm:$0xff]  }
 0x2cd   : > { %v9926_v48 = vsel %vm1241_vm9, %v4199_v38, %v4203_v28  ;;  %v5330_v38 = vrot.slane %v6490_v56, 1  ;;  %v6492_v13 = vcombine.low %v5240_v57, %v9824_v7  ;;  %v5333_v4 = vrot.slane %v6491_v44, 1  ;;  %v5244_v2 = vld [vmem:[#allocation3 + $0xc0] sm:$0xe]  ;;  %v8036_v57 = vld [vmem:[#allocation9 + $0x1d8] sm:$0xff]   ;;  %v8040_v62 = vld [vmem:[#allocation9 + $0x190] sm:$0xff]  }
 0x2ce   : > { %7642 = vmatmul.mubr.bf16.gmra.mxu0 %v9926_v48  ;;  %v4206_v46 = vshrl.u32 %v9919_v6, 16  ;;  %v4208_v33 = vshll.u32 %v9919_v6, 16  ;;  %v4215_v25 = vrot.slane %v4213_v16, 1  ;;  %v5340_v11 = vrot.slane %v9843_v22, 1  ;;  %v8054_v44 = vld [vmem:[#allocation9 + $0x208] sm:$0xff]  }
 0x2cf   : > { %v5336_v24 = vrot.slane %v6492_v13, 1  ;;  %v6494_v23 = vcombine.low %v5242_v35, %v9863_v31  ;;  %v9960_v21 = vsel %vm2529_vm10, %v5333_v4, %v5334_v5  ;;  %v5339_v12 = vrot.slane %v6493_v45, 1  ;;  %v8035_v5 = vld [vmem:[#allocation9 + $0x1a0] sm:$0xff]   ;;  %v8039_v13 = vld [vmem:[#allocation9 + $0x1d0] sm:$0xff]   ;;  %v8104_v45 = vld [vmem:[#allocation3 + $0x10] sm:$0xf] }
 0x2d0   : > { %v4210_v51 = vrot.slane %v4208_v33, 1  ;;  %4577 = vmatmul.mubr.bf16.gmra.mxu1 %v9878_v3  ;;  %v9954_v3 = vsel %vm2529_vm10, %v5330_v38, %v5331_v40  ;;  %v6495_v16 = vcombine.low %v5243_v58, %v9902_v17  ;;  %v5346_v22 = vrot.slane %v9910_v15, 1  ;;  %v8057_v38 = vld [vmem:[#allocation9 + $0x200] sm:$0xff]  }
 0x2d1   : > { %4584 = vmatprep.mubr.bf16.mxu1 %v9926_v48  ;;  %v9964_v26 = vsel %vm2529_vm10, %v5336_v24, %v5337_v49  ;;  %v5342_v33 = vrot.slane %v6494_v23, 1  ;;  %v9969_v31 = vsel %vm2529_vm10, %v5339_v12, %v5340_v11  ;;  %v6496_v41 = vcombine.low %v5244_v2, %v3782_v10  ;;  %v8038_v10 = vld [vmem:[#allocation9 + $0x228] sm:$0xff]   ;;  %v8044_v4 = vld [vmem:[#allocation9 + $0x1c0] sm:$0xff]  }
 0x2d2   : > { %v4211_v28 = vor.u32 %v4210_v51, %v4206_v46  ;;  %v5343_v46 = vrot.slane %v9869_v54, 1  ;;  %v5349_v39 = vrot.slane %v9921_v34, 1  ;;  %v5345_v56 = vrot.slane %v6495_v16, 1  ;;  %v8027_v34 = vld [vmem:[#allocation9 + $0x1b8] sm:$0xff]   ;;  %v8051_v51 = vld [vmem:[#allocation9 + $0x210] sm:$0xff]   ;;  %v8045_v49 = vld [vmem:[#allocation9 + $0x180] sm:$0xff]  }
 0x2d3   : > { %v5348_v40 = vrot.slane %v6496_v41, 1  ;;  %v5228_v24 = vld [vmem:[#allocation3] sm:$0xe]  ;;  %v8107_v58 = vld [vmem:[#allocation3 + $0x1c] sm:$0xf] }
 0x2d4   : > { %v4216_v7 = vsel %vm1241_vm9, %v4211_v28, %v4215_v25  ;;  %v9974_v54 = vsel %vm2529_vm10, %v5342_v33, %v5343_v46  ;;  %v9978_v17 = vsel %vm2529_vm10, %v5345_v56, %v5346_v22  ;;  %v8034_v25 = vld [vmem:[#allocation9 + $0x1e0] sm:$0xff]   ;;  %v8041_v28 = vld [vmem:[#allocation9 + $0x1c8] sm:$0xff]   ;;  %v8108_v22 = vld [vmem:[#allocation3 + $0x8] ss:$0 sps:$4 sm:$0x11]  }
 0x2d5   : > { %7645 = vmatprep.mubr.bf16.mxu0 %v4216_v7  ;;  %v9981_v15 = vsel %vm2529_vm10, %v5348_v40, %v5349_v39  ;;  %v5301_v2 = vrot.slane %v8108_v22, 1  ;;  %v8109_v39 = vld [vmem:[#allocation3 + $0x20] ss:$0 sps:$4 sm:$0x11]   ;;  %v5231_v40 = vld [vmem:[#allocation3 + $0x24] sm:$0xe] }
 0x2d6   : > { %7646 = vmatmul.mubr.bf16.gmra.mxu0 %v4228_v29  ;;  %v8033_v29 = vld [vmem:[#allocation9 + $0x230] sm:$0xff]   ;;  %v5307_v56 = vrot.slane %v8109_v39, 1  ;;  %v8115_v22 = vld [vmem:[#allocation3 + $0x44] ss:$0 sps:$4 sm:$0x11]  }
 0x2d7   : > { %4938 = vmatprep.mubr.bf16.mxu0 %v9458_v1 }
 0x2d8   : > { %4585 = vmatmul.mubr.bf16.gmra.mxu1 %v9900_v50  ;;  %v8043_v50 = vld [vmem:[#allocation9 + $0x220] sm:$0xff]  }
 0x2d9   : > { %4592 = vmatprep.mubr.bf16.mxu1 %v4216_v7  ;;  %v8106_v7 = vld [vmem:[#allocation3 + $0x4] sm:$0xf] }
 0x2da   : > { %v6480_v12 = vcombine.low %v5228_v24, %v8106_v7  ;;  %v5233_v24 = vld [vmem:[#allocation3 + $0x3c] sm:$0xe]  ;;  %v8114_v7 = vld [vmem:[#allocation3 + $0x40] sm:$0xf] }
 0x2dc   : > { %v5300_v16 = vrot.slane %v6480_v12, 1  ;;  %v6485_v12 = vcombine.low %v5233_v24, %v8114_v7 }
 0x2de   : > { %4939 = vmatmul.mubr.bf16.vlgmr.msra.gmra.mxu0 %v9274_v27  ;;  %v8048_v27 = vld [vmem:[#allocation9 + $0x218] sm:$0xff]  }
 0x2df   : > { %4946 = vmatprep.mubr.bf16.mxu0 %v9484_v53  ;;  %7698 = vmatpush3.bf16.msra.mxu0 %v9706_v47  ;;  %v8030_v47 = vld [vmem:[#allocation9 + $0x1b0] sm:$0xff]  }
 0x2e0   : > { %7699 = vmatprep.subr.bf16.mxu0 %v8033_v29  ;;  %4593 = vmatmul.mubr.bf16.gmra.mxu1 %v9926_v48  ;;  %v8031_v48 = vld [vmem:[#allocation9 + $0x1e8] sm:$0xff]  }
 0x2e1   : > { %7665 = vmatprep.mubr.bf16.mxu1 %v9484_v53 }
 0x2e3   : > { %7700 = vmatpush3.bf16.msra.mxu0 %v8033_v29 }
 0x2e4   : > { %7701 = vmatprep.subr.bf16.mxu0 %v8038_v10 }
 0x2e6   : > { %4947 = vmatmul.mubr.bf16.gmra.mxu0 %v9458_v1  ;;  %v8032_v1 = vld [vmem:[#allocation9 + $0x1a8] sm:$0xff]  }
 0x2e7   : > { %4954 = vmatprep.mubr.bf16.mxu0 %v9509_v20  ;;  %7702 = vmatpush3.bf16.msra.mxu0 %v8038_v10  ;;  %v8110_v10 = vld [vmem:[#allocation3 + $0x28] sm:$0xf] }
 0x2e8   : > { %7703 = vmatprep.subr.bf16.mxu0 %v8043_v50  ;;  %7666 = vmatmul.mubr.bf16.vlgmr.msra.gmra.mxu1 %v9509_v20 }
 0x2e9   : > { %7669 = vmatprep.mubr.bf16.mxu1 %v9549_v32  ;;  %7322 = vmatpush3.bf16.msra.mxu1 %v8027_v34 }
 0x2ea   : > { %7323 = vmatprep.subr.bf16.mxu1 %v8029_v19 }
 0x2eb   : > { %7704 = vmatpush3.bf16.msra.mxu0 %v8043_v50  ;;  %v6483_v50 = vcombine.low %v5231_v40, %v8110_v10 }
 0x2ec   : > { %7705 = vmatprep.subr.bf16.mxu0 %v8048_v27 }
 0x2ed   : > { %7324 = vmatpush3.bf16.msra.mxu1 %v8030_v47  ;;  %v5309_v47 = vrot.slane %v6483_v50, 1 }
 0x2ee   : > { %4955 = vmatmul.mubr.bf16.gmra.mxu0 %v9484_v53  ;;  %7325 = vmatprep.subr.bf16.mxu1 %v8031_v48  ;;  %v8037_v53 = vld [vmem:[#allocation9 + $0x198] sm:$0xff]   ;;  %v8111_v48 = vld [vmem:[#allocation3 + $0x2c] ss:$0 sps:$4 sm:$0x11]  }
 0x2ef   : > { %4962 = vmatprep.mubr.bf16.mxu0 %v9549_v32  ;;  %7706 = vmatpush3.bf16.msra.mxu0 %v8048_v27 }
 0x2f0   : > { %7670 = vmatmul.mubr.bf16.gmra.mxu1 %v9586_v43  ;;  %7707 = vmatprep.subr.bf16.mxu0 %v8051_v51 }
 0x2f1   : > { %7673 = vmatprep.mubr.bf16.mxu1 %v9622_v52  ;;  %7326 = vmatpush3.bf16.msra.mxu1 %v8032_v1 }
 0x2f2   : > { %7327 = vmatprep.subr.bf16.mxu1 %v8034_v25  ;;  %v5232_v25 = vld [vmem:[#allocation3 + $0x30] sm:$0xe] }
 0x2f3   : > { %7708 = vmatpush3.bf16.msra.mxu0 %v8051_v51  ;;  %v5310_v51 = vrot.slane %v8111_v48, 1 }
 0x2f4   : > { %7709 = vmatprep.subr.bf16.mxu0 %v8054_v44 }
 0x2f5   : > { %7328 = vmatpush3.bf16.msra.mxu1 %v8035_v5  ;;  %v10032_v5 = vsel %vm2529_vm10, %v5309_v47, %v5310_v51  ;;  %v8117_v47 = vld [vmem:[#allocation3 + $0x50] ss:$0 sps:$4 sm:$0x11]  }
 0x2f6   : > { %4963 = vmatmul.mubr.bf16.gmra.mxu0 %v9509_v20  ;;  %7329 = vmatprep.subr.bf16.mxu1 %v8036_v57  ;;  %v8042_v20 = vld [vmem:[#allocation9 + $0x188] sm:$0xff]   ;;  %v8112_v57 = vld [vmem:[#allocation3 + $0x34] sm:$0xf]  ;;  %v5319_v48 = vrot.slane %v8117_v47, 1 }
 0x2f7   : > { %4970 = vmatprep.mubr.bf16.mxu0 %v9586_v43  ;;  %7710 = vmatpush3.bf16.msra.mxu0 %v8054_v44 }
 0x2f8   : > { %7674 = vmatmul.mubr.bf16.gmra.mxu1 %v9656_v8  ;;  %7711 = vmatprep.subr.bf16.mxu0 %v8057_v38 }
 0x2f9   : > { %7677 = vmatprep.mubr.bf16.mxu1 %v9703_v42  ;;  %7330 = vmatpush3.bf16.msra.mxu1 %v8037_v53 }
 0x2fa   : > { %7331 = vmatprep.subr.bf16.mxu1 %v8039_v13 }
 0x2fb   : > { %7712 = vmatpush3.bf16.msra.mxu0 %v8057_v38  ;;  %v6484_v38 = vcombine.low %v5232_v25, %v8112_v57 }
 0x2fd   : > { %7332 = vmatpush3.bf16.msra.mxu1 %v8040_v62 }
 0x2fe   : > { %4971 = vmatmul.mubr.bf16.gmra.mxu0 %v9549_v32  ;;  %7333 = vmatprep.subr.bf16.mxu1 %v8041_v28  ;;  %v10677_v32 = vld [vmem:[#allocation27_spill] sm:$0xff]  ;;  %v5312_v28 = vrot.slane %v6484_v38, 1 }
 0x2ff   : > { %4978 = vmatprep.mubr.bf16.mxu0 %v9622_v52 }
 0x300   : > { %7678 = vmatmul.mubr.bf16.gmra.mxu1 %v9752_v60 }
 0x301   : > { %7681 = vmatprep.mubr.bf16.mxu1 %v9774_v59  ;;  %7334 = vmatpush3.bf16.msra.mxu1 %v8042_v20 }
 0x302   : > { %7335 = vmatprep.subr.bf16.mxu1 %v8044_v4 }
 0x305   : > { %7336 = vmatpush3.bf16.msra.mxu1 %v8045_v49 }
 0x306   : > { %4979 = vmatmul.mubr.bf16.gmra.mxu0 %v9586_v43  ;;  %v5229_v43 = vld [vmem:[#allocation3 + $0xc] sm:$0xe] }
 0x307   : > { %4986 = vmatprep.mubr.bf16.mxu0 %v9656_v8  ;;  %v6481_v35 = vcombine.low %v5229_v43, %v8104_v45 }
 0x308   : > { %7682 = vmatmul.mubr.bf16.gmra.mxu1 %v9806_v37 }
 0x309   : > { %7685 = vmatprep.mubr.bf16.mxu1 %v9840_v63  ;;  %v5303_v11 = vrot.slane %v6481_v35, 1 }
 0x30e   : > { %4987 = vmatmul.mubr.bf16.gmra.mxu0 %v9622_v52  ;;  %v8105_v52 = vld [vmem:[#allocation3 + $0x14] ss:$0 sps:$4 sm:$0x11]  }
 0x30f   : > { %4994 = vmatprep.mubr.bf16.mxu0 %v9703_v42  ;;  %v5304_v23 = vrot.slane %v8105_v52, 1 }
 0x310   : > { %7686 = vmatmul.mubr.bf16.gmra.mxu1 %v10677_v32 }
 0x311   : > { %7689 = vmatprep.mubr.bf16.mxu1 %v9866_v36  ;;  %v5305_v46 = vsel %vm2529_vm10, %v5303_v11, %v5304_v23 }
 0x316   : > { %4995 = vmatmul.mubr.bf16.gmra.mxu0 %v9656_v8  ;;  %v5230_v8 = vld [vmem:[#allocation3 + $0x18] sm:$0xe] }
 0x317   : > { %5002 = vmatprep.mubr.bf16.mxu0 %v9752_v60  ;;  %v6482_v33 = vcombine.low %v5230_v8, %v8107_v58 }
 0x318   : > { %7690 = vmatmul.mubr.bf16.gmra.mxu1 %v9908_v14 }
 0x319   : > { %7693 = vmatprep.mubr.bf16.mxu1 %v9919_v6  ;;  %v5306_v41 = vrot.slane %v6482_v33, 1 }
 0x31e   : > { %5003 = vmatmul.mubr.bf16.gmra.mxu0 %v9703_v42  ;;  %v5302_v42 = vsel %vm2529_vm10, %v5300_v16, %v5301_v2  ;;  %v5315_v16 = vrot.slane %v6485_v12, 1  ;;  %v5316_v2 = vrot.slane %v8115_v22, 1 }
 0x31f   : > { %5010 = vmatprep.mubr.bf16.mxu0 %v9774_v59 }
 0x320   : > { %7694 = vmatmul.mubr.bf16.gmra.mxu1 %v9890_v9  ;;  %v10024_v9 = vsel %vm2529_vm10, %v5306_v41, %v5307_v56  ;;  %v5234_v56 = vld [vmem:[#allocation3 + $0x48] sm:$0xe]  ;;  %v10052_v40 = vsel %vm2529_vm10, %v5315_v16, %v5316_v2 }
 0x321   : > { %5597 = vmatprep.mubr.bf16.mxu1 %v5305_v46 }
 0x326   : > { %5011 = vmatmul.mubr.bf16.gmra.mxu0 %v9752_v60 }
 0x327   : > { %5018 = vmatprep.mubr.bf16.mxu0 %v9806_v37 }
 0x328   : > { %v7065_v29 = vpop.f32.mrf.mxu1  ;;  %5598 = vmatmul.mubr.bf16.vlgmr.msra.gmra.mxu1 %v5302_v42 }
 0x329   : > { %5605 = vmatprep.mubr.bf16.mxu1 %v10024_v9 }
 0x32a   : > { %v7066_v34 = vpop.f32.mrf.mxu1 }
 0x32b   : > { %v7067_v19 = vadd.f32 %v7066_v34, %v7065_v29  ;;  %v8116_v29 = vld [vmem:[#allocation3 + $0x4c] sm:$0xf] }
 0x32c   : > { %v7068_v27 = vpop.f32.mrf.mxu1  ;;  %v6486_v10 = vcombine.low %v5234_v56, %v8116_v29 }
 0x32e   : > { %5019 = vmatmul.mubr.bf16.gmra.mxu0 %v9774_v59  ;;  %v7069_v60 = vpop.f32.mrf.mxu1  ;;  %v8113_v59 = vld [vmem:[#allocation3 + $0x38] ss:$0 sps:$4 sm:$0x11]  }
 0x32f   : > { %5026 = vmatprep.mubr.bf16.mxu0 %v9840_v63  ;;  %v10029_v1 = vadd.f32 %v7069_v60, %v7068_v27  ;;  %v5313_v20 = vrot.slane %v8113_v59, 1  ;;  %v5318_v27 = vrot.slane %v6486_v10, 1 }
 0x330   : > { %v7071_v44 = vpop.f32.mrf.mxu1  ;;  %5606 = vmatmul.mubr.bf16.gmra.mxu1 %v5305_v46 }
 0x331   : > { %5613 = vmatprep.mubr.bf16.mxu1 %v10032_v5  ;;  %v10043_v23 = vsel %vm2529_vm10, %v5312_v28, %v5313_v20 }
 0x332   : > { %v7072_v53 = vpop.f32.mrf.mxu1 }
 0x333   : > { %v7073_v13 = vadd.f32 %v7072_v53, %v7071_v44 }
 0x334   : > { %v7074_v62 = vpop.f32.mrf.mxu1  ;;  %v7619_v4 = vpop.f32.mrf.mxu0 }
 0x335   : > { %v10036_v43 = vadd.f32 %v7619_v4, %v7073_v13  ;;  %v5320_v13 = vsel %vm2529_vm10, %v5318_v27, %v5319_v48 }
 0x336   : > { %5027 = vmatmul.mubr.bf16.gmra.mxu0 %v9806_v37  ;;  %v7075_v49 = vpop.f32.mrf.mxu1  ;;  %v4635_v35 = vpop.f32.mrf.mxu0 }
 0x337   : > { %5034 = vmatprep.mubr.bf16.mxu0 %v10677_v32  ;;  %v7076_v45 = vadd.f32 %v7075_v49, %v7074_v62  ;;  %v10040_v52 = vadd.f32 %v7067_v19, %v4635_v35 }
 0x338   : > { %v7077_v11 = vpop.f32.mrf.mxu1  ;;  %5614 = vmatmul.mubr.bf16.gmra.mxu1 %v10024_v9  ;;  %v7620_v37 = vpop.f32.mrf.mxu0 }
 0x339   : > { %5621 = vmatprep.mubr.bf16.mxu1 %v10043_v23  ;;  %v10046_v46 = vadd.f32 %v7620_v37, %v7076_v45 }
 0x33a   : > { %v7078_v8 = vpop.f32.mrf.mxu1  ;;  %v10055_v34 = vpop.f32.mrf.mxu0 }
 0x33b   : > { %v7079_v58 = vadd.f32 %v7078_v8, %v7077_v11 }
 0x33c   : > { %v7080_v33 = vpop.f32.mrf.mxu1 }
 0x33e   : > { %5035 = vmatmul.mubr.bf16.gmra.mxu0 %v9840_v63  ;;  %v7081_v41 = vpop.f32.mrf.mxu1 }
 0x33f   : > { %5042 = vmatprep.mubr.bf16.mxu0 %v9866_v36  ;;  %v7082_v39 = vadd.f32 %v7081_v41, %v7080_v33 }
 0x340   : > { %v7083_v42 = vpop.f32.mrf.mxu1  ;;  %5622 = vmatmul.mubr.bf16.gmra.mxu1 %v10032_v5 }
 0x341   : > { %5629 = vmatprep.mubr.bf16.mxu1 %v10052_v40 }
 0x342   : > { %v7084_v50 = vpop.f32.mrf.mxu1 }
 0x343   : > { %v7085_v19 = vadd.f32 %v7084_v50, %v7083_v42 }
 0x344   : > { %v7086_v63 = vpop.f32.mrf.mxu1 }
 0x345   : > { %v7623_v51 = vpop.f32.mrf.mxu0 }
 0x346   : > { %5043 = vmatmul.mubr.bf16.gmra.mxu0 %v10677_v32  ;;  %v7087_v60 = vpop.f32.mrf.mxu1  ;;  %v10058_v25 = vadd.f32 %v7623_v51, %v7085_v19 }
 0x347   : > { %5050 = vmatprep.mubr.bf16.mxu0 %v9908_v14  ;;  %v7088_v44 = vadd.f32 %v7087_v60, %v7086_v63  ;;  %v4651_v57 = vpop.f32.mrf.mxu0 }
 0x348   : > { %v7089_v38 = vpop.f32.mrf.mxu1  ;;  %5630 = vmatmul.mubr.bf16.gmra.mxu1 %v10043_v23  ;;  %v10062_v53 = vadd.f32 %v7079_v58, %v4651_v57 }
 0x349   : > { %5637 = vmatprep.mubr.bf16.mxu1 %v5320_v13  ;;  %v7624_v62 = vpop.f32.mrf.mxu0 }
 0x34a   : > { %v7090_v28 = vpop.f32.mrf.mxu1  ;;  %v10065_v59 = vadd.f32 %v7624_v62, %v7088_v44 }
 0x34b   : > { %v7091_v32 = vadd.f32 %v7090_v28, %v7089_v38  ;;  %v4654_v20 = vpop.f32.mrf.mxu0 }
 0x34c   : > { %v7092_v4 = vpop.f32.mrf.mxu1  ;;  %v10067_v49 = vadd.f32 %v7082_v39, %v4654_v20 }
 0x34e   : > { %5051 = vmatmul.mubr.bf16.gmra.mxu0 %v9866_v36  ;;  %v7093_v45 = vpop.f32.mrf.mxu1 }
 0x34f   : > { %5058 = vmatprep.mubr.bf16.mxu0 %v9919_v6  ;;  %v7094_v35 = vadd.f32 %v7093_v45, %v7092_v4 }
 0x350   : > { %v7095_v24 = vpop.f32.mrf.mxu1  ;;  %5638 = vmatmul.mubr.bf16.gmra.mxu1 %v10052_v40 }
 0x351   : > { %5645 = vmatprep.mubr.bf16.mxu1 %v9936_v18 }
 0x352   : > { %v7096_v11 = vpop.f32.mrf.mxu1 }
 0x353   : > { %v7097_v7 = vadd.f32 %v7096_v11, %v7095_v24 }
 0x354   : > { %v7098_v12 = vpop.f32.mrf.mxu1  ;;  %v7627_v37 = vpop.f32.mrf.mxu0 }
 0x355   : > { %v10073_v8 = vadd.f32 %v7627_v37, %v7097_v7 }
 0x356   : > { %5059 = vmatmul.mubr.bf16.gmra.mxu0 %v9908_v14  ;;  %v7099_v58 = vpop.f32.mrf.mxu1  ;;  %v4667_v33 = vpop.f32.mrf.mxu0 }
 0x357   : > { %7713 = vmatprep.mubr.bf16.mxu0 %v10024_v9  ;;  %v7100_v36 = vadd.f32 %v7099_v58, %v7098_v12  ;;  %v10077_v6 = vadd.f32 %v7091_v32, %v4667_v33 }
 0x358   : > { %v7101_v16 = vpop.f32.mrf.mxu1  ;;  %5646 = vmatmul.mubr.bf16.gmra.mxu1 %v5320_v13  ;;  %v7628_v22 = vpop.f32.mrf.mxu0 }
 0x359   : > { %5653 = vmatprep.mubr.bf16.mxu1 %v9944_v30  ;;  %v10080_v2 = vadd.f32 %v7628_v22, %v7100_v36 }
 0x35a   : > { %v7102_v41 = vpop.f32.mrf.mxu1  ;;  %v4670_v39 = vpop.f32.mrf.mxu0 }
 0x35b   : > { %v7103_v56 = vadd.f32 %v7102_v41, %v7101_v16  ;;  %v10082_v42 = vadd.f32 %v7094_v35, %v4670_v39 }
 0x35c   : > { %v7104_v14 = vpop.f32.mrf.mxu1 }
 0x35e   : > { %7714 = vmatmul.mubr.bf16.vlgmr.msra.gmra.mxu0 %v10032_v5  ;;  %v7105_v29 = vpop.f32.mrf.mxu1 }
 0x35f   : > { %7717 = vmatprep.mubr.bf16.mxu0 %v10043_v23  ;;  %v7106_v9 = vadd.f32 %v7105_v29, %v7104_v14 }
 0x360   : > { %v7107_v10 = vpop.f32.mrf.mxu1  ;;  %5654 = vmatmul.mubr.bf16.gmra.mxu1 %v9936_v18 }
 0x361   : > { %5661 = vmatprep.mubr.bf16.mxu1 %v9947_v0 }
 0x362   : > { %v7108_v50 = vpop.f32.mrf.mxu1 }
 0x363   : > { %v7109_v19 = vadd.f32 %v7108_v50, %v7107_v10 }
 0x364   : > { %v7110_v63 = vpop.f32.mrf.mxu1 }
 0x366   : > { %7718 = vmatmul.mubr.bf16.gmra.mxu0 %v10052_v40  ;;  %v7111_v27 = vpop.f32.mrf.mxu1 }
 0x367   : > { %v7631_v47 = vpop.f32.mrf.mxu0  ;;  %7721 = vmatprep.mubr.bf16.mxu0 %v5320_v13  ;;  %v7112_v48 = vadd.f32 %v7111_v27, %v7110_v63 }
 0x368   : > { %v10089_v51 = vadd.f32 %v7631_v47, %v7109_v19  ;;  %v7113_v5 = vpop.f32.mrf.mxu1  ;;  %5662 = vmatmul.mubr.bf16.gmra.mxu1 %v9944_v30 }
 0x369   : > { %v4683_v23 = vpop.f32.mrf.mxu0  ;;  %5669 = vmatprep.mubr.bf16.mxu1 %v9954_v3 }
 0x36a   : > { %v10092_v60 = vadd.f32 %v7103_v56, %v4683_v23  ;;  %v7114_v44 = vpop.f32.mrf.mxu1 }
 0x36b   : > { %v7632_v57 = vpop.f32.mrf.mxu0  ;;  %v7115_v38 = vadd.f32 %v7114_v44, %v7113_v5 }
 0x36c   : > { %v10095_v62 = vadd.f32 %v7632_v57, %v7112_v48  ;;  %v7116_v40 = vpop.f32.mrf.mxu1 }
 0x36d   : > { %v4686_v28 = vpop.f32.mrf.mxu0 }
 0x36e   : > { %v10097_v32 = vadd.f32 %v7106_v9, %v4686_v28  ;;  %7722 = vmatmul.mubr.bf16.gmra.mxu0 %v9936_v18  ;;  %v7117_v13 = vpop.f32.mrf.mxu1 }
 0x36f   : > { %7725 = vmatprep.mubr.bf16.mxu0 %v9944_v30  ;;  %v7118_v20 = vadd.f32 %v7117_v13, %v7116_v40 }
 0x370   : > { %v7119_v4 = vpop.f32.mrf.mxu1  ;;  %5670 = vmatmul.mubr.bf16.gmra.mxu1 %v9947_v0 }
 0x371   : > { %5677 = vmatprep.mubr.bf16.mxu1 %v9960_v21 }
 0x372   : > { %v7120_v45 = vpop.f32.mrf.mxu1 }
 0x373   : > { %v7121_v35 = vadd.f32 %v7120_v45, %v7119_v4 }
 0x374   : > { %v7122_v24 = vpop.f32.mrf.mxu1 }
 0x375   : > { %v7635_v11 = vpop.f32.mrf.mxu0 }
 0x376   : > { %v10103_v7 = vadd.f32 %v7635_v11, %v7121_v35  ;;  %7726 = vmatmul.mubr.bf16.gmra.mxu0 %v9947_v0  ;;  %v7123_v12 = vpop.f32.mrf.mxu1 }
 0x377   : > { %v4699_v37 = vpop.f32.mrf.mxu0  ;;  %7729 = vmatprep.mubr.bf16.mxu0 %v9954_v3  ;;  %v7124_v18 = vadd.f32 %v7123_v12, %v7122_v24  ;;  %v5352_v24 = vrot.slane %v9897_v55, 1 }
 0x378   : > { %v10107_v30 = vadd.f32 %v7115_v38, %v4699_v37  ;;  %v7125_v58 = vpop.f32.mrf.mxu1  ;;  %5678 = vmatmul.mubr.bf16.gmra.mxu1 %v9954_v3 }
 0x379   : > { %v7636_v33 = vpop.f32.mrf.mxu0  ;;  %5685 = vmatprep.mubr.bf16.mxu1 %v9964_v26 }
 0x37a   : > { %v10111_v36 = vadd.f32 %v7636_v33, %v7124_v18  ;;  %v7126_v16 = vpop.f32.mrf.mxu1 }
 0x37b   : > { %v4702_v22 = vpop.f32.mrf.mxu0  ;;  %v7127_v41 = vadd.f32 %v7126_v16, %v7125_v58 }
 0x37c   : > { %v10113_v39 = vadd.f32 %v7118_v20, %v4702_v22  ;;  %v7128_v0 = vpop.f32.mrf.mxu1 }
 0x37e   : > { %v7639_v56 = vpop.f32.mrf.mxu0  ;;  %7730 = vmatmul.mubr.bf16.gmra.mxu0 %v9960_v21  ;;  %v7129_v14 = vpop.f32.mrf.mxu1 }
 0x37f   : > { %7733 = vmatprep.mubr.bf16.mxu0 %v9964_v26  ;;  %v7130_v29 = vadd.f32 %v7129_v14, %v7128_v0 }
 0x380   : > { %v4715_v9 = vpop.f32.mrf.mxu0  ;;  %v7131_v3 = vpop.f32.mrf.mxu1  ;;  %5686 = vmatmul.mubr.bf16.gmra.mxu1 %v9960_v21  ;;  %v5245_v21 = vld [vmem:[#allocation3 + $0xcc] sm:$0xe] }
 0x381   : > { %v10118_v10 = vadd.f32 %v7127_v41, %v4715_v9  ;;  %5693 = vmatprep.mubr.bf16.mxu1 %v9969_v31  ;;  %v6497_v28 = vcombine.low %v5245_v21, %v9885_v61 }
 0x382   : > { %v7640_v50 = vpop.f32.mrf.mxu0  ;;  %v7132_v19 = vpop.f32.mrf.mxu1 }
 0x383   : > { %v7133_v63 = vadd.f32 %v7132_v19, %v7131_v3  ;;  %v5351_v35 = vrot.slane %v6497_v28, 1 }
 0x384   : > { %v4718_v27 = vpop.f32.mrf.mxu0  ;;  %v7134_v47 = vpop.f32.mrf.mxu1 }
 0x385   : > { %v10121_v48 = vadd.f32 %v7130_v29, %v4718_v27  ;;  %v10123_v5 = vadd.f32 %v7639_v56, %v7133_v63  ;;  %v5353_v58 = vsel %vm2529_vm10, %v5351_v35, %v5352_v24  ;;  %v4639_v35 = vadd.f32 %v10029_v1, %v10055_v34 }
 0x386   : > { %7734 = vmatmul.mubr.bf16.gmra.mxu0 %v9969_v31  ;;  %v7135_v23 = vpop.f32.mrf.mxu1 }
 0x387   : > { %7737 = vmatprep.mubr.bf16.mxu0 %v9974_v54  ;;  %v7136_v44 = vadd.f32 %v7135_v23, %v7134_v47 }
 0x388   : > { %v7137_v57 = vpop.f32.mrf.mxu1  ;;  %5694 = vmatmul.mubr.bf16.gmra.mxu1 %v9964_v26 }
 0x389   : > { %5701 = vmatprep.mubr.bf16.mxu1 %v9974_v54  ;;  %v10129_v38 = vadd.f32 %v7640_v50, %v7136_v44 }
 0x38a   : > { %v7138_v40 = vpop.f32.mrf.mxu1 }
 0x38b   : > { %v7139_v13 = vadd.f32 %v7138_v40, %v7137_v57 }
 0x38c   : > { %v7140_v20 = vpop.f32.mrf.mxu1 }
 0x38e   : > { %v7643_v4 = vpop.f32.mrf.mxu0  ;;  %7738 = vmatmul.mubr.bf16.gmra.mxu0 %v9978_v17  ;;  %v7141_v45 = vpop.f32.mrf.mxu1 }
 0x38f   : > { %7741 = vmatprep.mubr.bf16.mxu0 %v9981_v15  ;;  %v7142_v11 = vadd.f32 %v7141_v45, %v7140_v20 }
 0x390   : > { %v4731_v26 = vpop.f32.mrf.mxu0  ;;  %v7143_v12 = vpop.f32.mrf.mxu1  ;;  %5702 = vmatmul.mubr.bf16.gmra.mxu1 %v9969_v31 }
 0x391   : > { %v10136_v37 = vadd.f32 %v7139_v13, %v4731_v26  ;;  %5709 = vmatprep.mubr.bf16.mxu1 %v9978_v17 }
 0x392   : > { %v7644_v61 = vpop.f32.mrf.mxu0  ;;  %v7144_v18 = vpop.f32.mrf.mxu1 }
 0x393   : > { %v7145_v33 = vadd.f32 %v7144_v18, %v7143_v12 }
 0x394   : > { %v4734_v16 = vpop.f32.mrf.mxu0  ;;  %v7146_v22 = vpop.f32.mrf.mxu1 }
 0x395   : > { %v10140_v41 = vadd.f32 %v7142_v11, %v4734_v16  ;;  %v10142_v0 = vadd.f32 %v7643_v4, %v7145_v33 }
 0x396   : > { %v7647_v55 = vpop.f32.mrf.mxu0  ;;  %7742 = vmatmul.mubr.bf16.gmra.mxu0 %v5353_v58  ;;  %v7147_v56 = vpop.f32.mrf.mxu1 }
 0x397   : > { %v7148_v14 = vadd.f32 %v7147_v56, %v7146_v22 }
 0x398   : > { %v4747_v31 = vpop.f32.mrf.mxu0  ;;  %v7149_v29 = vpop.f32.mrf.mxu1  ;;  %5710 = vmatmul.mubr.bf16.gmra.mxu1 %v9974_v54 }
 0x399   : > { %5717 = vmatprep.mubr.bf16.mxu1 %v9981_v15  ;;  %v10146_v9 = vadd.f32 %v7644_v61, %v7148_v14 }
 0x39a   : > { %v7648_v3 = vpop.f32.mrf.mxu0  ;;  %v7150_v50 = vpop.f32.mrf.mxu1 }
 0x39b   : > { %v7151_v19 = vadd.f32 %v7150_v50, %v7149_v29 }
 0x39c   : > { %v4750_v63 = vpop.f32.mrf.mxu0  ;;  %v7152_v27 = vpop.f32.mrf.mxu1 }
 0x39d   : > { %v10148_v47 = vadd.f32 %v7151_v19, %v4747_v31 }
 0x39e   : > { %v7201_v23 = vpop.f32.mrf.mxu0  ;;  %v7153_v44 = vpop.f32.mrf.mxu1 }
 0x39f   : > { %v7154_v21 = vadd.f32 %v7153_v44, %v7152_v27 }
 0x3a0   : > { %v7202_v57 = vpop.f32.mrf.mxu0  ;;  %v7155_v40 = vpop.f32.mrf.mxu1  ;;  %5718 = vmatmul.mubr.bf16.gmra.mxu1 %v9978_v17 }
 0x3a1   : > { %v7203_v28 = vadd.f32 %v7202_v57, %v7201_v23  ;;  %v10151_v54 = vadd.f32 %v7154_v21, %v4750_v63 }
 0x3a2   : > { %v7204_v15 = vpop.f32.mrf.mxu0  ;;  %v7156_v13 = vpop.f32.mrf.mxu1 }
 0x3a3   : > { %v4941_v20 = vadd.f32 %v7203_v28, %v10040_v52  ;;  %v7157_v4 = vadd.f32 %v7156_v13, %v7155_v40 }
 0x3a4   : > { %v7205_v45 = vpop.f32.mrf.mxu0  ;;  %v7158_v24 = vpop.f32.mrf.mxu1 }
 0x3a5   : > { %v7206_v11 = vadd.f32 %v7205_v45, %v7204_v15  ;;  %v10156_v26 = vadd.f32 %v7647_v55, %v7157_v4 }
 0x3a6   : > { %v7207_v12 = vpop.f32.mrf.mxu0  ;;  %v7159_v61 = vpop.f32.mrf.mxu1 }
 0x3a7   : > { %v4944_v18 = vadd.f32 %v7206_v11, %v4639_v35  ;;  %v7160_v17 = vadd.f32 %v7159_v61, %v7158_v24 }
 0x3a8   : > { %v7208_v58 = vpop.f32.mrf.mxu0  ;;  %v7667_v33 = vpop.f32.mrf.mxu1 }
 0x3a9   : > { %v7209_v16 = vadd.f32 %v7208_v58, %v7207_v12  ;;  %v10158_v22 = vadd.f32 %v7648_v3, %v7160_v17 }
 0x3aa   : > { %v7210_v56 = vpop.f32.mrf.mxu0  ;;  %v5101_v52 = vpop.f32.mrf.mxu1 }
 0x3ab   : > { %v4949_v14 = vadd.f32 %v7209_v16, %v10036_v43  ;;  %v10161_v31 = vadd.f32 %v5101_v52, %v4941_v20 }
 0x3ac   : > { %v7211_v1 = vpop.f32.mrf.mxu0  ;;  %v7668_v34 = vpop.f32.mrf.mxu1 }
 0x3ad   : > { %v7212_v29 = vadd.f32 %v7211_v1, %v7210_v56  ;;  %v10163_v55 = vadd.f32 %v7667_v33, %v4949_v14 }
 0x3ae   : > { %v7213_v50 = vpop.f32.mrf.mxu0  ;;  %v5104_v19 = vpop.f32.mrf.mxu1 }
 0x3af   : > { %v4952_v63 = vadd.f32 %v7212_v29, %v10046_v46  ;;  %v10166_v27 = vadd.f32 %v5104_v19, %v4944_v18 }
 0x3b0   : > { %v7214_v23 = vpop.f32.mrf.mxu0  ;;  %v7671_v3 = vpop.f32.mrf.mxu1 }
 0x3b1   : > { %v7215_v44 = vadd.f32 %v7214_v23, %v7213_v50  ;;  %v10168_v21 = vadd.f32 %v7668_v34, %v4952_v63 }
 0x3b2   : > { %v7216_v57 = vpop.f32.mrf.mxu0  ;;  %v5117_v43 = vpop.f32.mrf.mxu1 }
 0x3b3   : > { %v4957_v40 = vadd.f32 %v7215_v44, %v10062_v53 }
 0x3b4   : > { %v7217_v28 = vpop.f32.mrf.mxu0  ;;  %v7672_v15 = vpop.f32.mrf.mxu1 }
 0x3b5   : > { %v7218_v13 = vadd.f32 %v7217_v28, %v7216_v57  ;;  %v10171_v20 = vadd.f32 %v5117_v43, %v4957_v40 }
 0x3b6   : > { %v7219_v4 = vpop.f32.mrf.mxu0  ;;  %v5120_v45 = vpop.f32.mrf.mxu1 }
 0x3b7   : > { %v4960_v46 = vadd.f32 %v7218_v13, %v10067_v49 }
 0x3b8   : > { %v7220_v35 = vpop.f32.mrf.mxu0  ;;  %v7675_v24 = vpop.f32.mrf.mxu1 }
 0x3b9   : > { %v7221_v11 = vadd.f32 %v7220_v35, %v7219_v4  ;;  %v10174_v12 = vadd.f32 %v5120_v45, %v4960_v46 }
 0x3ba   : > { %v7222_v61 = vpop.f32.mrf.mxu0  ;;  %v5133_v18 = vpop.f32.mrf.mxu1 }
 0x3bb   : > { %v4965_v17 = vadd.f32 %v7221_v11, %v10058_v25 }
 0x3bc   : > { %v7223_v58 = vpop.f32.mrf.mxu0  ;;  %v7676_v53 = vpop.f32.mrf.mxu1 }
 0x3bd   : > { %v7224_v33 = vadd.f32 %v7223_v58, %v7222_v61  ;;  %v10177_v16 = vadd.f32 %v7671_v3, %v4965_v17 }
 0x3be   : > { %v7225_v56 = vpop.f32.mrf.mxu0  ;;  %v5136_v52 = vpop.f32.mrf.mxu1 }
 0x3bf   : > { %v4968_v14 = vadd.f32 %v7224_v33, %v10065_v59 }
 0x3c0   : > { %v7226_v1 = vpop.f32.mrf.mxu0  ;;  %v7679_v49 = vpop.f32.mrf.mxu1 }
 0x3c1   : > { %v7227_v34 = vadd.f32 %v7226_v1, %v7225_v56  ;;  %v10180_v29 = vadd.f32 %v7672_v15, %v4968_v14 }
 0x3c2   : > { %v7228_v50 = vpop.f32.mrf.mxu0  ;;  %v5149_v19 = vpop.f32.mrf.mxu1 }
 0x3c3   : > { %v4973_v63 = vadd.f32 %v7227_v34, %v10077_v6 }
 0x3c4   : > { %v7229_v23 = vpop.f32.mrf.mxu0  ;;  %v7680_v25 = vpop.f32.mrf.mxu1 }
 0x3c5   : > { %v7230_v44 = vadd.f32 %v7229_v23, %v7228_v50  ;;  %v10183_v57 = vadd.f32 %v5133_v18, %v4973_v63 }
 0x3c6   : > { %v7231_v3 = vpop.f32.mrf.mxu0  ;;  %v5152_v43 = vpop.f32.mrf.mxu1 }
 0x3c7   : > { %v4976_v40 = vadd.f32 %v7230_v44, %v10082_v42 }
 0x3c8   : > { %v7232_v28 = vpop.f32.mrf.mxu0  ;;  %v10186_v59 = vpop.f32.mrf.mxu1 }
 0x3c9   : > { %v7233_v13 = vadd.f32 %v7232_v28, %v7231_v3  ;;  %v10188_v4 = vadd.f32 %v5136_v52, %v4976_v40 }
 0x3ca   : > { %v7234_v15 = vpop.f32.mrf.mxu0  ;;  %v5165_v45 = vpop.f32.mrf.mxu1 }
 0x3cb   : > { %v4981_v46 = vadd.f32 %v7233_v13, %v10073_v8 }
 0x3cc   : > { %v7235_v6 = vpop.f32.mrf.mxu0  ;;  %v10191_v35 = vpop.f32.mrf.mxu1 }
 0x3cd   : > { %v7236_v11 = vadd.f32 %v7235_v6, %v7234_v15  ;;  %v10193_v61 = vadd.f32 %v7675_v24, %v4981_v46 }
 0x3ce   : > { %v7237_v18 = vpop.f32.mrf.mxu0  ;;  %v5168_v17 = vpop.f32.mrf.mxu1 }
 0x3cf   : > { %v4984_v42 = vadd.f32 %v7236_v11, %v10080_v2 }
 0x3d0   : > { %v7238_v58 = vpop.f32.mrf.mxu0  ;;  %v10196_v33 = vpop.f32.mrf.mxu1 }
 0x3d1   : > { %v7239_v56 = vadd.f32 %v7238_v58, %v7237_v18  ;;  %v10198_v52 = vadd.f32 %v7676_v53, %v4984_v42 }
 0x3d2   : > { %v7240_v14 = vpop.f32.mrf.mxu0  ;;  %v5181_v1 = vpop.f32.mrf.mxu1 }
 0x3d3   : > { %v4989_v8 = vadd.f32 %v7239_v56, %v10092_v60 }
 0x3d4   : > { %v7241_v34 = vpop.f32.mrf.mxu0  ;;  %v10201_v50 = vpop.f32.mrf.mxu1 }
 0x3d5   : > { %v7242_v63 = vadd.f32 %v7241_v34, %v7240_v14  ;;  %v10203_v24 = vadd.f32 %v5149_v19, %v4989_v8 }
 0x3d6   : > { %v7243_v23 = vpop.f32.mrf.mxu0  ;;  %v5184_v44 = vpop.f32.mrf.mxu1 }
 0x3d7   : > { %v4992_v2 = vadd.f32 %v7242_v63, %v10097_v32 }
 0x3d8   : > { %v7244_v3 = vpop.f32.mrf.mxu0  ;;  %v10206_v40 = vpop.f32.mrf.mxu1 }
 0x3d9   : > { %v7245_v28 = vadd.f32 %v7244_v3, %v7243_v23  ;;  %v10208_v53 = vadd.f32 %v5152_v43, %v4992_v2 }
 0x3da   : > { %v7246_v13 = vpop.f32.mrf.mxu0  ;;  %v10210_v15 = vpop.f32.mrf.mxu1 }
 0x3db   : > { %v4997_v60 = vadd.f32 %v7245_v28, %v10089_v51 }
 0x3dc   : > { %v7247_v46 = vpop.f32.mrf.mxu0  ;;  %v10213_v6 = vpop.f32.mrf.mxu1 }
 0x3dd   : > { %v7248_v19 = vadd.f32 %v7247_v46, %v7246_v13  ;;  %v10215_v11 = vadd.f32 %v7679_v49, %v4997_v60 }
 0x3de   : > { %v7249_v18 = vpop.f32.mrf.mxu0  ;;  %v10217_v42 = vpop.f32.mrf.mxu1 }
 0x3df   : > { %v5000_v32 = vadd.f32 %v7248_v19, %v10095_v62 }
 0x3e0   : > { %v7250_v58 = vpop.f32.mrf.mxu0  ;;  %v10220_v56 = vpop.f32.mrf.mxu1 }
 0x3e1   : > { %v7251_v43 = vadd.f32 %v7250_v58, %v7249_v18  ;;  %v10222_v14 = vadd.f32 %v7680_v25, %v5000_v32 }
 0x3e2   : > { %v7252_v8 = vpop.f32.mrf.mxu0  ;;  %v10224_v34 = vpop.f32.mrf.mxu1 }
 0x3e3   : > { %v5005_v51 = vadd.f32 %v7251_v43, %v10107_v30 }
 0x3e4   : > { %v7253_v63 = vpop.f32.mrf.mxu0  ;;  %v10227_v23 = vpop.f32.mrf.mxu1 }
 0x3e5   : > { %v7254_v49 = vadd.f32 %v7253_v63, %v7252_v8  ;;  %v10229_v2 = vadd.f32 %v5165_v45, %v5005_v51 }
 0x3e6   : > { %v7255_v3 = vpop.f32.mrf.mxu0  ;;  %v10231_v28 = vpop.f32.mrf.mxu1 }
 0x3e7   : > { %v5008_v62 = vadd.f32 %v7254_v49, %v10113_v39 }
 0x3e8   : > { %v7256_v13 = vpop.f32.mrf.mxu0  ;;  %v10234_v60 = vpop.f32.mrf.mxu1 }
 0x3e9   : > { %v7257_v25 = vadd.f32 %v7256_v13, %v7255_v3  ;;  %v10236_v46 = vadd.f32 %v5168_v17, %v5008_v62 }
 0x3ea   : > { %v7258_v19 = vpop.f32.mrf.mxu0  ;;  %v10238_v18 = vpop.f32.mrf.mxu1 }
 0x3eb   : > { %10678 = vst [vmem:[#allocation35_spill] sm:$0xff] %v10236_v46  ;;  %v5013_v30 = vadd.f32 %v7257_v25, %v10103_v7 }
 0x3ec   : > { %v7259_v32 = vpop.f32.mrf.mxu0  ;;  %v10241_v58 = vpop.f32.mrf.mxu1 }
 0x3ed   : > { %v7260_v45 = vadd.f32 %v7259_v32, %v7258_v19  ;;  %v10244_v43 = vadd.f32 %v10186_v59, %v5013_v30 }
 0x3ee   : > { %v7261_v8 = vpop.f32.mrf.mxu0  ;;  %v10246_v39 = vpop.f32.mrf.mxu1 }
 0x3ef   : > { %v5016_v51 = vadd.f32 %v7260_v45, %v10111_v36 }
 0x3f0   : > { %v7262_v63 = vpop.f32.mrf.mxu0  ;;  %v10249_v17 = vpop.f32.mrf.mxu1 }
 0x3f1   : > { %v7263_v49 = vadd.f32 %v7262_v63, %v7261_v8  ;;  %v10252_v3 = vadd.f32 %v10191_v35, %v5016_v51 }
 0x3f2   : > { %v7264_v7 = vpop.f32.mrf.mxu0  ;;  %v10254_v62 = vpop.f32.mrf.mxu1 }
 0x3f3   : > { %10679 = vst [vmem:[#allocation36_spill] sm:$0xff] %v10252_v3  ;;  %v5021_v13 = vadd.f32 %v7263_v49, %v10118_v10 }
 0x3f4   : > { %v7265_v25 = vpop.f32.mrf.mxu0  ;;  %v10257_v59 = vpop.f32.mrf.mxu1 }
 0x3f5   : > { %v7266_v19 = vadd.f32 %v7265_v25, %v7264_v7  ;;  %v10259_v30 = vadd.f32 %v5181_v1, %v5021_v13 }
 0x3f6   : > { %v7267_v32 = vpop.f32.mrf.mxu0  ;;  %v10261_v36 = vpop.f32.mrf.mxu1 }
 0x3f7   : > { %v5024_v45 = vadd.f32 %v7266_v19, %v10121_v48 }
 0x3f8   : > { %v7268_v8 = vpop.f32.mrf.mxu0  ;;  %v10264_v63 = vpop.f32.mrf.mxu1 }
 0x3f9   : > { %v7269_v35 = vadd.f32 %v7268_v8, %v7267_v32  ;;  %v10266_v51 = vadd.f32 %v5184_v44, %v5024_v45 }
 0x3fa   : > { %v7270_v46 = vpop.f32.mrf.mxu0  ;;  %v10268_v3 = vpop.f32.mrf.mxu1 }
 0x3fb   : > { %10680 = vst [vmem:[#allocation39_spill] sm:$0xff] %v10266_v51  ;;  %v5029_v10 = vadd.f32 %v7269_v35, %v10123_v5 }
 0x3fc   : > { %v7271_v49 = vpop.f32.mrf.mxu0  ;;  %v10271_v7 = vpop.f32.mrf.mxu1 }
 0x3fd   : > { %v7272_v1 = vadd.f32 %v7271_v49, %v7270_v46  ;;  %v10274_v13 = vadd.f32 %v10196_v33, %v5029_v10 }
 0x3fe   : > { %v7273_v25 = vpop.f32.mrf.mxu0  ;;  %v10276_v48 = vpop.f32.mrf.mxu1 }
 0x3ff   : > { %v5032_v19 = vadd.f32 %v7272_v1, %v10129_v38 }
 0x400   : > { %v7274_v32 = vpop.f32.mrf.mxu0  ;;  %v10279_v44 = vpop.f32.mrf.mxu1 }
 0x401   : > { %v7275_v45 = vadd.f32 %v7274_v32, %v7273_v25  ;;  %v10282_v8 = vadd.f32 %v10201_v50, %v5032_v19 }
 0x402   : > { %v7276_v5 = vpop.f32.mrf.mxu0  ;;  %v10284_v35 = vpop.f32.mrf.mxu1 }
 0x403   : > { %10681 = vst [vmem:[#allocation17_spill] sm:$0xff] %v10282_v8  ;;  %v5037_v46 = vadd.f32 %v7275_v45, %v10136_v37 }
 0x404   : > { %v7277_v49 = vpop.f32.mrf.mxu0  ;;  %v10287_v33 = vpop.f32.mrf.mxu1 }
 0x405   : > { %v7278_v10 = vadd.f32 %v7277_v49, %v7276_v5  ;;  %v10290_v51 = vadd.f32 %v10210_v15, %v5037_v46 }
 0x406   : > { %v7279_v38 = vpop.f32.mrf.mxu0  ;;  %v10292_v1 = vpop.f32.mrf.mxu1 }
 0x407   : > { %10682 = vst [vmem:[#allocation16_spill] sm:$0xff] %v10290_v51  ;;  %v5040_v25 = vadd.f32 %v7278_v10, %v10140_v41 }
 0x408   : > { %v7280_v32 = vpop.f32.mrf.mxu0  ;;  %v10295_v50 = vpop.f32.mrf.mxu1 }
 0x409   : > { %v7281_v19 = vadd.f32 %v7280_v32, %v7279_v38  ;;  %v10298_v8 = vadd.f32 %v10217_v42, %v5040_v25 }
 0x40a   : > { %v7282_v37 = vpop.f32.mrf.mxu0  ;;  %v10300_v45 = vpop.f32.mrf.mxu1 }
 0x40b   : > { %10683 = vst [vmem:[#allocation15_spill] sm:$0xff] %v10298_v8  ;;  %v5045_v5 = vadd.f32 %v7281_v19, %v10142_v0 }
 0x40c   : > { %v7283_v49 = vpop.f32.mrf.mxu0  ;;  %v10303_v15 = vpop.f32.mrf.mxu1 }
 0x40d   : > { %v7284_v46 = vadd.f32 %v7283_v49, %v7282_v37  ;;  %v10306_v51 = vadd.f32 %v10206_v40, %v5045_v5 }
 0x40e   : > { %v7285_v41 = vpop.f32.mrf.mxu0  ;;  %v10308_v10 = vpop.f32.mrf.mxu1 }
 0x40f   : > { %10684 = vst [vmem:[#allocation18_spill] sm:$0xff] %v10306_v51  ;;  %v5048_v38 = vadd.f32 %v7284_v46, %v10146_v9 }
 0x410   : > { %v7286_v32 = vpop.f32.mrf.mxu0  ;;  %v10311_v42 = vpop.f32.mrf.mxu1 }
 0x411   : > { %v7287_v25 = vadd.f32 %v7286_v32, %v7285_v41  ;;  %v10314_v8 = vadd.f32 %v10213_v6, %v5048_v38 }
 0x412   : > { %v7288_v0 = vpop.f32.mrf.mxu0  ;;  %v10316_v19 = vpop.f32.mrf.mxu1 }
 0x413   : > { %10685 = vst [vmem:[#allocation14_spill] sm:$0xff] %v10314_v8  ;;  %v5053_v37 = vadd.f32 %v7287_v25, %v10148_v47 }
 0x414   : > { %v7289_v49 = vpop.f32.mrf.mxu0  ;;  %v10319_v40 = vpop.f32.mrf.mxu1 }
 0x415   : > { %v7290_v5 = vadd.f32 %v7289_v49, %v7288_v0  ;;  %v10322_v51 = vadd.f32 %v10224_v34, %v5053_v37  ;;  %v7345_v37 = vadd.f32 %v10254_v62, %v10249_v17  ;;  %v10352_v17 = vld [vmem:[%s10590_s4] ss:$0 sm:$0xff] }
 0x416   : > { %v7291_v9 = vpop.f32.mrf.mxu0  ;;  %v10324_v46 = vpop.f32.mrf.mxu1 }
 0x417   : > { %10686 = vst [vmem:[#allocation19_spill] sm:$0xff] %v10322_v51  ;;  %v5056_v41 = vadd.f32 %v7290_v5, %v10151_v54 }
 0x418   : > { %v7292_v6 = vpop.f32.mrf.mxu0  ;;  %v10327_v38 = vpop.f32.mrf.mxu1 }
 0x419   : > { %v7293_v32 = vadd.f32 %v7292_v6, %v7291_v9  ;;  %v10330_v47 = vadd.f32 %v10231_v28, %v5056_v41  ;;  %v6626_v9 = vld [vmem:[%s8447_s6 + $0x8] sm:$0xff]   ;;  %v7339_v28 = vadd.f32 %v10238_v18, %v10234_v60 }
 0x41a   : > { %v7294_v25 = vpop.f32.mrf.mxu0  ;;  %v10332_v8 = vpop.f32.mrf.mxu1  ;;  %v6569_v51 = vunpack.c.h.bf16 %v6626_v9 }
 0x41b   : > { %10687 = vst [vmem:[#allocation21_spill] sm:$0xff] %v10330_v47  ;;  %v5061_v34 = vadd.f32 %v7293_v32, %v10156_v26  ;;  %v6563_v47 = vld [vmem:[%s8447_s6] sm:$0xff]  }
 0x41c   : > { %v7295_v0 = vpop.f32.mrf.mxu0  ;;  %v10337_v49 = vpop.f32.mrf.mxu1 }
 0x41d   : > { %v10340_v54 = vadd.f32 %v10220_v56, %v5061_v34  ;;  %v7296_v5 = vadd.f32 %v7295_v0, %v7294_v25  ;;  %v6568_v56 = vunpack.c.l.bf16 %v6626_v9  ;;  %v7348_v25 = vadd.f32 %v10261_v36, %v10257_v59 }
 0x41e   : > { %v7715_v6 = vpop.f32.mrf.mxu0  ;;  %v10345_v41 = vpop.f32.mrf.mxu1  ;;  %v6564_v0 = vunpack.c.l.bf16 %v6563_v47 }
 0x41f   : > { %10688 = vst [vmem:[#allocation22_spill] sm:$0xff] %v10340_v54  ;;  %v5064_v26 = vadd.f32 %v7296_v5, %v10158_v22  ;;  %v5769_v32 = vadd.f32 %v7715_v6, %v7345_v37  ;;  %v7342_v5 = vadd.f32 %v10246_v39, %v10241_v58  ;;  %v7351_v39 = vadd.f32 %v10268_v3, %v10264_v63 }
 0x420   : > { %v5760_v62 = vpop.f32.mrf.mxu0  ;;  %v10356_v34 = vpop.f32.mrf.mxu1 }
 0x421   : > { %v10359_v60 = vadd.f32 %v10227_v23, %v5064_v26  ;;  %v5889_v18 = vadd.f32 %v5769_v32, %v10163_v55  ;;  %v5761_v22 = vadd.f32 %v7339_v28, %v5760_v62  ;;  %v7357_v62 = vadd.f32 %v10284_v35, %v10279_v44 }
 0x422   : > { %v7716_v37 = vpop.f32.mrf.mxu0  ;;  %v10364_v6 = vpop.f32.mrf.mxu1 }
 0x423   : > { %v5928_v54 = vadd.f32 %v10352_v17, %v5889_v18  ;;  %v5887_v59 = vadd.f32 %v5761_v22, %v10161_v31  ;;  %v5772_v36 = vadd.f32 %v7716_v37, %v7348_v25  ;;  %v6565_v31 = vunpack.c.h.bf16 %v6563_v47 }
 0x424   : > { %v5763_v23 = vpop.f32.mrf.mxu0  ;;  %v10369_v26 = vpop.f32.mrf.mxu1 }
 0x425   : > { %v6024_v55 = vadd.f32 %v6568_v56, %v5928_v54  ;;  %v5926_v28 = vadd.f32 %v10352_v17, %v5887_v59  ;;  %v5890_v32 = vadd.f32 %v5772_v36, %v10168_v21  ;;  %v5764_v58 = vadd.f32 %v7342_v5, %v5763_v23  ;;  %v6628_v56 = vld [vmem:[%s8447_s6 + $0x18] sm:$0xff]   ;;  %v6627_v59 = vld [vmem:[%s8447_s6 + $0x10] sm:$0xff]  }
 0x426   : > { %v7719_v25 = vpop.f32.mrf.mxu0  ;;  %v10377_v9 = vpop.f32.mrf.mxu1  ;;  %v7360_v21 = vadd.f32 %v10292_v1, %v10287_v33  ;;  %v6576_v1 = vunpack.c.l.bf16 %v6628_v56  ;;  %v6572_v36 = vunpack.c.l.bf16 %v6627_v59 }
 0x427   : > { %v6056_v18 = vmax.f32 %v6024_v55, 0.0  ;;  %v6022_v22 = vadd.f32 %v6564_v0, %v5926_v28  ;;  %v5929_v37 = vadd.f32 %v10352_v17, %v5890_v32  ;;  %v5888_v54 = vadd.f32 %v5764_v58, %v10166_v27 }
 0x428   : > { %v5785_v5 = vadd.f32 %v7719_v25, %v7357_v62  ;;  %v5776_v3 = vpop.f32.mrf.mxu0  ;;  %v10385_v63 = vpop.f32.mrf.mxu1  ;;  %v7354_v27 = vadd.f32 %v10276_v48, %v10271_v7  ;;  %v6577_v48 = vunpack.c.h.bf16 %v6628_v56 }
 0x429   : > { %6088 = vst [vmem:[%s10387_s7 + $0x10] sm:$0xff] %v6056_v18  ;;  %v6054_v44 = vmax.f32 %v6022_v22, 0.0  ;;  %v6025_v35 = vadd.f32 %v6569_v51, %v5929_v37  ;;  %v5927_v47 = vadd.f32 %v10352_v17, %v5888_v54  ;;  %v5777_v0 = vadd.f32 %v7351_v39, %v5776_v3  ;;  %v6630_v37 = vld [vmem:[%s8447_s6 + $0x28] sm:$0xff]  }
 0x42a   : > { %v5893_v33 = vadd.f32 %v5785_v5, %v10177_v16  ;;  %v7720_v23 = vpop.f32.mrf.mxu0  ;;  %v10394_v55 = vpop.f32.mrf.mxu1  ;;  %v7369_v39 = vadd.f32 %v10316_v19, %v10311_v42  ;;  %v6573_v54 = vunpack.c.h.bf16 %v6627_v59 }
 0x42b   : > { %6086 = vst [vmem:[%s10387_s7] sm:$0xff] %v6054_v44  ;;  %v6057_v28 = vmax.f32 %v6025_v35, 0.0  ;;  %v6023_v32 = vadd.f32 %v6565_v31, %v5927_v47  ;;  %v5891_v51 = vadd.f32 %v5777_v0, %v10171_v20  ;;  %v5788_v58 = vadd.f32 %v7720_v23, %v7360_v21  ;;  %v6629_v23 = vld [vmem:[%s8447_s6 + $0x20] sm:$0xff]  }
 0x42c   : > { %v5932_v7 = vadd.f32 %v10352_v17, %v5893_v33  ;;  %v5779_v16 = vpop.f32.mrf.mxu0  ;;  %v10401_v62 = vpop.f32.mrf.mxu1  ;;  %v7363_v44 = vadd.f32 %v10300_v45, %v10295_v50  ;;  %v6584_v35 = vunpack.c.l.bf16 %v6630_v37 }
 0x42d   : > { %6089 = vst [vmem:[%s10387_s7 + $0x18] sm:$0xff] %v6057_v28  ;;  %v6055_v25 = vmax.f32 %v6023_v32, 0.0  ;;  %v5930_v18 = vadd.f32 %v10352_v17, %v5891_v51  ;;  %v5894_v22 = vadd.f32 %v5788_v58, %v10180_v29  ;;  %v5780_v31 = vadd.f32 %v7354_v27, %v5779_v16 }
 0x42e   : > { %v6028_v20 = vadd.f32 %v6576_v1, %v5932_v7  ;;  %v7723_v21 = vpop.f32.mrf.mxu0  ;;  %v10407_v5 = vpop.f32.mrf.mxu1  ;;  %v7372_v29 = vadd.f32 %v10324_v46, %v10319_v40  ;;  %v7381_v58 = vadd.f32 %v10364_v6, %v10356_v34  ;;  %v7375_v34 = vadd.f32 %v10332_v8, %v10327_v38 }
 0x42f   : > { %6087 = vst [vmem:[%s10387_s7 + $0x8] sm:$0xff] %v6055_v25  ;;  %v6026_v42 = vadd.f32 %v6572_v36, %v5930_v18  ;;  %v5933_v19 = vadd.f32 %v10352_v17, %v5894_v22  ;;  %v5892_v56 = vadd.f32 %v5780_v31, %v10174_v12  ;;  %v5801_v3 = vadd.f32 %v7723_v21, %v7369_v39  ;;  %v10430_v22 = vld [vmem:[%s8447_s6 + $0x38] sm:$0xff]  }
 0x430   : > { %v6060_v59 = vmax.f32 %v6028_v20, 0.0  ;;  %v5792_v47 = vpop.f32.mrf.mxu0  ;;  %v7391_v0 = vpop.f32.mrf.mxu1  ;;  %v7366_v12 = vadd.f32 %v10308_v10, %v10303_v15  ;;  %v6580_v39 = vunpack.c.l.bf16 %v6629_v23  ;;  %v6585_v15 = vunpack.c.h.bf16 %v6630_v37 }
 0x431   : > { %v6058_v27 = vmax.f32 %v6026_v42, 0.0  ;;  %v6029_v33 = vadd.f32 %v6577_v48, %v5933_v19  ;;  %v5931_v1 = vadd.f32 %v10352_v17, %v5892_v56  ;;  %v5897_v36 = vadd.f32 %v5801_v3, %v10193_v61 }
 0x432   : > { %6092 = vst [vmem:[%s10387_s7 + $0x30] sm:$0xff] %v6060_v59  ;;  %v5793_v50 = vadd.f32 %v7363_v44, %v5792_v47  ;;  %v7724_v45 = vpop.f32.mrf.mxu0  ;;  %v7392_v28 = vpop.f32.mrf.mxu1  ;;  %v6581_v6 = vunpack.c.h.bf16 %v6629_v23  ;;  %v6592_v56 = vunpack.c.l.bf16 %v10430_v22 }
 0x433   : > { %6090 = vst [vmem:[%s10387_s7 + $0x20] sm:$0xff] %v6058_v27  ;;  %v6061_v40 = vmax.f32 %v6029_v33, 0.0  ;;  %v6027_v46 = vadd.f32 %v6573_v54, %v5931_v1  ;;  %v5936_v32 = vadd.f32 %v10352_v17, %v5897_v36  ;;  %v5804_v51 = vadd.f32 %v7724_v45, %v7372_v29 }
 0x434   : > { %v5895_v61 = vadd.f32 %v5793_v50, %v10183_v57  ;;  %v5795_v10 = vpop.f32.mrf.mxu0  ;;  %v7394_v7 = vpop.f32.mrf.mxu1 }
 0x435   : > { %6093 = vst [vmem:[%s10387_s7 + $0x38] sm:$0xff] %v6061_v40  ;;  %v6059_v48 = vmax.f32 %v6027_v46, 0.0  ;;  %v6032_v16 = vadd.f32 %v6584_v35, %v5936_v32  ;;  %v5898_v25 = vadd.f32 %v5804_v51, %v10198_v52  ;;  %v5796_v18 = vadd.f32 %v7366_v12, %v5795_v10  ;;  %v6631_v52 = vld [vmem:[%s8447_s6 + $0x30] sm:$0xff]   ;;  %v10457_v32 = vld [vmem:[%s8447_s6 + $0x48] sm:$0xff]  }
 0x436   : > { %v5934_v57 = vadd.f32 %v10352_v17, %v5895_v61  ;;  %v7727_v31 = vpop.f32.mrf.mxu0  ;;  %v7395_v37 = vpop.f32.mrf.mxu1  ;;  %v7384_v35 = vadd.f32 %v10377_v9, %v10369_v26  ;;  %v6588_v27 = vunpack.c.l.bf16 %v6631_v52  ;;  %v7387_v51 = vadd.f32 %v10394_v55, %v10385_v63 }
 0x437   : > { %6091 = vst [vmem:[%s10387_s7 + $0x28] sm:$0xff] %v6059_v48  ;;  %v6064_v20 = vmax.f32 %v6032_v16, 0.0  ;;  %v5937_v54 = vadd.f32 %v10352_v17, %v5898_v25  ;;  %v5896_v21 = vadd.f32 %v5796_v18, %v10188_v4  ;;  %v5817_v42 = vadd.f32 %v7727_v31, %v7381_v58  ;;  %v10466_v16 = vld [vmem:[%s8447_s6 + $0x40] sm:$0xff]  }
 0x438   : > { %v6030_v19 = vadd.f32 %v6580_v39, %v5934_v57  ;;  %v5808_v3 = vpop.f32.mrf.mxu0  ;;  %v10440_v44 = vpop.f32.mrf.mxu1  ;;  %v7378_v4 = vadd.f32 %v10345_v41, %v10337_v49  ;;  %v7396_v25 = vadd.f32 %v7395_v37, %v7394_v7 }
 0x439   : > { %6096 = vst [vmem:[%s10387_s7 + $0x50] sm:$0xff] %v6064_v20  ;;  %v6033_v8 = vadd.f32 %v6585_v15, %v5937_v54  ;;  %v5935_v38 = vadd.f32 %v10352_v17, %v5896_v21  ;;  %v5901_v29 = vadd.f32 %v5817_v42, %v10215_v11  ;;  %v5809_v59 = vadd.f32 %v7375_v34, %v5808_v3 }
 0x43a   : > { %v6062_v47 = vmax.f32 %v6030_v19, 0.0  ;;  %v7728_v33 = vpop.f32.mrf.mxu0  ;;  %v7398_v1 = vpop.f32.mrf.mxu1  ;;  %v7393_v11 = vadd.f32 %v7392_v28, %v7391_v0  ;;  %v6593_v0 = vunpack.c.h.bf16 %v10430_v22  ;;  %v6589_v28 = vunpack.c.h.bf16 %v6631_v52 }
 0x43b   : > { %v6065_v36 = vmax.f32 %v6033_v8, 0.0  ;;  %v6031_v23 = vadd.f32 %v6581_v6, %v5935_v38  ;;  %v5940_v12 = vadd.f32 %v10352_v17, %v5901_v29  ;;  %v5899_v50 = vadd.f32 %v5809_v59, %v10203_v24 }
 0x43c   : > { %6094 = vst [vmem:[%s10387_s7 + $0x40] sm:$0xff] %v6062_v47  ;;  %v5820_v45 = vadd.f32 %v7728_v33, %v7384_v35  ;;  %v5811_v40 = vpop.f32.mrf.mxu0  ;;  %v10452_v49 = vpop.f32.mrf.mxu1  ;;  %v7390_v52 = vadd.f32 %v10407_v5, %v10401_v62  ;;  %v6636_v47 = vld [vmem:[%s8447_s6 + $0x58] sm:$0xff]  }
 0x43d   : > { %6097 = vst [vmem:[%s10387_s7 + $0x58] sm:$0xff] %v6065_v36  ;;  %v6063_v41 = vmax.f32 %v6031_v23, 0.0  ;;  %v6036_v26 = vadd.f32 %v6592_v56, %v5940_v12  ;;  %v5938_v9 = vadd.f32 %v10352_v17, %v5899_v50  ;;  %v5812_v46 = vadd.f32 %v7378_v4, %v5811_v40  ;;  %v10689_v4 = vld [vmem:[#allocation36_spill] sm:$0xff] }
 0x43e   : > { %v5902_v24 = vadd.f32 %v5820_v45, %v10222_v14  ;;  %v7731_v58 = vpop.f32.mrf.mxu0  ;;  %v7401_v61 = vpop.f32.mrf.mxu1  ;;  %v6600_v14 = vunpack.c.l.bf16 %v10457_v32  ;;  %v6601_v56 = vunpack.c.h.bf16 %v10457_v32  ;;  %v6635_v50 = vld [vmem:[%s8447_s6 + $0x50] sm:$0xff]   ;;  %v10690_v45 = vld [vmem:[#allocation35_spill] sm:$0xff] }
 0x43f   : > { %6095 = vst [vmem:[%s10387_s7 + $0x48] sm:$0xff] %v6063_v41  ;;  %v6068_v39 = vmax.f32 %v6036_v26, 0.0  ;;  %v6034_v15 = vadd.f32 %v6588_v27, %v5938_v9  ;;  %v5900_v10 = vadd.f32 %v5812_v46, %v10208_v53  ;;  %v5833_v48 = vadd.f32 %v7731_v58, %v7393_v11 }
 0x440   : > { %v5941_v63 = vadd.f32 %v10352_v17, %v5902_v24  ;;  %v5824_v55 = vpop.f32.mrf.mxu0  ;;  %v7403_v18 = vpop.f32.mrf.mxu1  ;;  %v6596_v53 = vunpack.c.l.bf16 %v10466_v16  ;;  %v6597_v41 = vunpack.c.h.bf16 %v10466_v16  ;;  %v6608_v26 = vunpack.c.l.bf16 %v6636_v47 }
 0x441   : > { %6100 = vst [vmem:[%s10387_s7 + $0x70] sm:$0xff] %v6068_v39  ;;  %v6066_v22 = vmax.f32 %v6034_v15, 0.0  ;;  %v5939_v34 = vadd.f32 %v10352_v17, %v5900_v10  ;;  %v5905_v57 = vadd.f32 %v5833_v48, %v10244_v43  ;;  %v5825_v6 = vadd.f32 %v7387_v51, %v5824_v55  ;;  %v10691_v55 = vld [vmem:[#allocation17_spill] sm:$0xff] }
 0x442   : > { %v6037_v31 = vadd.f32 %v6593_v0, %v5941_v63  ;;  %v7732_v20 = vpop.f32.mrf.mxu0  ;;  %v7404_v54 = vpop.f32.mrf.mxu1  ;;  %v7402_v24 = vadd.f32 %v7401_v61, %v10452_v49  ;;  %v6609_v63 = vunpack.c.h.bf16 %v6636_v47  ;;  %v10693_v47 = vld [vmem:[#allocation16_spill] sm:$0xff] }
 0x443   : > { %6098 = vst [vmem:[%s10387_s7 + $0x60] sm:$0xff] %v6066_v22  ;;  %v6035_v7 = vadd.f32 %v6589_v28, %v5939_v34  ;;  %v5944_v37 = vadd.f32 %v10352_v17, %v5905_v57  ;;  %v5903_v21 = vadd.f32 %v5825_v6, %v10229_v2  ;;  %v5836_v42 = vadd.f32 %v7732_v20, %v7396_v25 }
 0x444   : > { %v7405_v43 = vadd.f32 %v7404_v54, %v7403_v18  ;;  %v6069_v19 = vmax.f32 %v6037_v31, 0.0  ;;  %v5827_v3 = vpop.f32.mrf.mxu0  ;;  %v7406_v8 = vpop.f32.mrf.mxu1  ;;  %v7399_v2 = vadd.f32 %v7398_v1, %v10440_v44  ;;  %v6604_v28 = vunpack.c.l.bf16 %v6635_v50 }
 0x445   : > { %v6067_v38 = vmax.f32 %v6035_v7, 0.0  ;;  %v6040_v29 = vadd.f32 %v6600_v14, %v5944_v37  ;;  %v5942_v59 = vadd.f32 %v10352_v17, %v5903_v21  ;;  %v5906_v35 = vadd.f32 %v5836_v42, %v10689_v4  ;;  %v10692_v7 = vld [vmem:[#allocation39_spill] sm:$0xff]  ;;  %v6637_v21 = vld [vmem:[%s8447_s6 + $0x60] sm:$0xff]  }
 0x446   : > { %6101 = vst [vmem:[%s10387_s7 + $0x78] sm:$0xff] %v6069_v19  ;;  %v5828_v62 = vadd.f32 %v7390_v52, %v5827_v3  ;;  %v7735_v5 = vpop.f32.mrf.mxu0  ;;  %v7407_v27 = vpop.f32.mrf.mxu1  ;;  %v6605_v6 = vunpack.c.h.bf16 %v6635_v50 }
 0x447   : > { %6099 = vst [vmem:[%s10387_s7 + $0x68] sm:$0xff] %v6067_v38  ;;  %v6072_v33 = vmax.f32 %v6040_v29, 0.0  ;;  %v6038_v36 = vadd.f32 %v6596_v53, %v5942_v59  ;;  %v5945_v23 = vadd.f32 %v10352_v17, %v5906_v35  ;;  %v5849_v12 = vadd.f32 %v7735_v5, %v7405_v43 }
 0x448   : > { %v7408_v11 = vadd.f32 %v7407_v27, %v7406_v8  ;;  %v5904_v40 = vadd.f32 %v5828_v62, %v10690_v45  ;;  %v5840_v44 = vpop.f32.mrf.mxu0  ;;  %v7409_v1 = vpop.f32.mrf.mxu1  ;;  %v6612_v8 = vunpack.c.l.bf16 %v6637_v21 }
 0x449   : > { %6104 = vst [vmem:[%s10387_s7 + $0x90] sm:$0xff] %v6072_v33  ;;  %v6070_v9 = vmax.f32 %v6038_v36, 0.0  ;;  %v6041_v46 = vadd.f32 %v6601_v56, %v5945_v23  ;;  %v5909_v32 = vadd.f32 %v5849_v12, %v10274_v13  ;;  %v5841_v51 = vadd.f32 %v7399_v2, %v5840_v44  ;;  %v6638_v36 = vld [vmem:[%s8447_s6 + $0x68] sm:$0xff]  }
 0x44a   : > { %v5943_v0 = vadd.f32 %v10352_v17, %v5904_v40  ;;  %v7736_v58 = vpop.f32.mrf.mxu0  ;;  %v7410_v39 = vpop.f32.mrf.mxu1  ;;  %v6613_v44 = vunpack.c.h.bf16 %v6637_v21 }
 0x44b   : > { %6102 = vst [vmem:[%s10387_s7 + $0x80] sm:$0xff] %v6070_v9  ;;  %v6073_v15 = vmax.f32 %v6041_v46, 0.0  ;;  %v5948_v10 = vadd.f32 %v10352_v17, %v5909_v32  ;;  %v5907_v48 = vadd.f32 %v5841_v51, %v10259_v30  ;;  %v5852_v16 = vadd.f32 %v7736_v58, %v7408_v11  ;;  %v10695_v9 = vld [vmem:[#allocation18_spill] sm:$0xff] }
 0x44c   : > { %v6039_v25 = vadd.f32 %v6597_v41, %v5943_v0  ;;  %v5843_v14 = vpop.f32.mrf.mxu0  ;;  %v7412_v13 = vpop.f32.mrf.mxu1  ;;  %v7411_v34 = vadd.f32 %v7410_v39, %v7409_v1  ;;  %v10694_v41 = vld [vmem:[#allocation15_spill] sm:$0xff]  ;;  %v6616_v32 = vunpack.c.l.bf16 %v6638_v36 }
 0x44d   : > { %6105 = vst [vmem:[%s10387_s7 + $0x98] sm:$0xff] %v6073_v15  ;;  %v6044_v49 = vadd.f32 %v6608_v26, %v5948_v10  ;;  %v5946_v61 = vadd.f32 %v10352_v17, %v5907_v48  ;;  %v5910_v18 = vadd.f32 %v5852_v16, %v10691_v55  ;;  %v5844_v22 = vadd.f32 %v7402_v24, %v5843_v14  ;;  %v6639_v55 = vld [vmem:[%s8447_s6 + $0x70] sm:$0xff]  }
 0x44e   : > { %v6071_v57 = vmax.f32 %v6039_v25, 0.0  ;;  %v7739_v31 = vpop.f32.mrf.mxu0  ;;  %v7413_v30 = vpop.f32.mrf.mxu1 }
 0x44f   : > { %v6076_v53 = vmax.f32 %v6044_v49, 0.0  ;;  %v6042_v20 = vadd.f32 %v6604_v28, %v5946_v61  ;;  %v5949_v54 = vadd.f32 %v10352_v17, %v5910_v18  ;;  %v5908_v37 = vadd.f32 %v5844_v22, %v10692_v7 }
 0x450   : > { %6103 = vst [vmem:[%s10387_s7 + $0x88] sm:$0xff] %v6071_v57  ;;  %v5856_v42 = vpop.f32.mrf.mxu0  ;;  %v7415_v52 = vpop.f32.mrf.mxu1  ;;  %v7414_v29 = vadd.f32 %v7413_v30, %v7412_v13  ;;  %v6617_v13 = vunpack.c.h.bf16 %v6638_v36 }
 0x451   : > { %6108 = vst [vmem:[%s10387_s7 + $0xb0] sm:$0xff] %v6076_v53  ;;  %v6074_v43 = vmax.f32 %v6042_v20, 0.0  ;;  %v6045_v19 = vadd.f32 %v6609_v63, %v5949_v54  ;;  %v5947_v56 = vadd.f32 %v10352_v17, %v5908_v37  ;;  %v5857_v3 = vadd.f32 %v7411_v34, %v5856_v42  ;;  %v10696_v63 = vld [vmem:[#allocation14_spill] sm:$0xff]  ;;  %v10697_v53 = vld [vmem:[#allocation19_spill] sm:$0xff] }
 0x452   : > { %v7740_v38 = vpop.f32.mrf.mxu0  ;;  %v7416_v59 = vpop.f32.mrf.mxu1  ;;  %v6620_v54 = vunpack.c.l.bf16 %v6639_v55 }
 0x453   : > { %6106 = vst [vmem:[%s10387_s7 + $0xa0] sm:$0xff] %v6074_v43  ;;  %v6077_v4 = vmax.f32 %v6045_v19, 0.0  ;;  %v6043_v35 = vadd.f32 %v6605_v6, %v5947_v56  ;;  %v5911_v2 = vadd.f32 %v5857_v3, %v10693_v47  ;;  %v7417_v62 = vadd.f32 %v7416_v59, %v7415_v52  ;;  %v10698_v56 = vld [vmem:[#allocation21_spill] sm:$0xff] }
 0x454   : > { %v5859_v5 = vpop.f32.mrf.mxu0  ;;  %v7418_v27 = vpop.f32.mrf.mxu1 }
 0x455   : > { %6109 = vst [vmem:[%s10387_s7 + $0xb8] sm:$0xff] %v6077_v4  ;;  %v6075_v33 = vmax.f32 %v6043_v35, 0.0  ;;  %v5950_v23 = vadd.f32 %v10352_v17, %v5911_v2  ;;  %v5860_v12 = vadd.f32 %v7414_v29, %v5859_v5  ;;  %v5865_v50 = vadd.f32 %v7739_v31, %v7417_v62  ;;  %v10699_v2 = vld [vmem:[#allocation22_spill] sm:$0xff] }
 0x456   : > { %v7743_v11 = vpop.f32.mrf.mxu0  ;;  %v7419_v45 = vpop.f32.mrf.mxu1 }
 0x457   : > { %6107 = vst [vmem:[%s10387_s7 + $0xa8] sm:$0xff] %v6075_v33  ;;  %v6046_v40 = vadd.f32 %v6612_v8, %v5950_v23  ;;  %v5912_v26 = vadd.f32 %v5860_v12, %v10694_v41  ;;  %v7420_v1 = vadd.f32 %v7419_v45, %v7418_v27  ;;  %v5913_v46 = vadd.f32 %v5865_v50, %v10695_v9 }
 0x458   : > { %v5872_v51 = vpop.f32.mrf.mxu0  ;;  %v7421_v24 = vpop.f32.mrf.mxu1  ;;  %v6621_v8 = vunpack.c.h.bf16 %v6639_v55 }
 0x459   : > { %v6078_v0 = vmax.f32 %v6046_v40, 0.0  ;;  %v5951_v28 = vadd.f32 %v10352_v17, %v5912_v26  ;;  %v5952_v58 = vadd.f32 %v10352_v17, %v5913_v46  ;;  %v5868_v39 = vadd.f32 %v7740_v38, %v7420_v1  ;;  %v6640_v38 = vld [vmem:[%s8447_s6 + $0x78] sm:$0xff]   ;;  %s8198_s6 = scalar_lea.vmem %s10542_s11, 4096 }
 0x45a   : > { %v7422_v15 = vpop.f32.mrf.mxu1  ;;  %v7744_v48 = vpop.f32.mrf.mxu0  ;;  %v6624_v5 = vunpack.c.l.bf16 %v6640_v38  ;;  %v6625_v45 = vunpack.c.h.bf16 %v6640_v38  ;;  %p8199_p5 = scmp.ne.s32.totalorder %s10542_s11, %s8198_s6  ;;  %p8206_p0 = scmp.lt.s32.totalorder %s8204_s26, %s8198_s6 }
 0x45b   : > { %6110 = vst [vmem:[%s10387_s7 + $0xc0] sm:$0xff] %v6078_v0  ;;  %v6047_v10 = vadd.f32 %v6613_v44, %v5951_v28  ;;  %v6048_v16 = vadd.f32 %v6616_v32, %v5952_v58  ;;  %v7423_v25 = vadd.f32 %v7422_v15, %v7421_v24  ;;  %v5914_v14 = vadd.f32 %v5868_v39, %v10696_v63 }
 0x45c   : > { %v7424_v49 = vpop.f32.mrf.mxu1  ;;  %v5875_v6 = vpop.f32.mrf.mxu0  ;;  %p8200_p7 = pnand %p8199_p5, %p10700_p2  ;;  %p8207_p10 = por %p8206_p0, %p8205_p13 }
 0x45d   : > { %v6079_v61 = vmax.f32 %v6047_v10, 0.0  ;;  %v6080_v18 = vmax.f32 %v6048_v16, 0.0  ;;  %v5953_v22 = vadd.f32 %v10352_v17, %v5914_v14  ;;  %v5873_v34 = vadd.f32 %v7423_v25, %v5872_v51 }
 0x45e   : > { %v7425_v57 = vpop.f32.mrf.mxu1  ;;  %p8201_p12 = pneg %p8200_p7 }
 0x45f   : > { %6111 = vst [vmem:[%s10387_s7 + $0xc8] sm:$0xff] %v6079_v61  ;;  %6112 = vst [vmem:[%s10387_s7 + $0xd0] sm:$0xff] %v6080_v18  ;;  %v6049_v31 = vadd.f32 %v6617_v13, %v5953_v22  ;;  %v7426_v30 = vadd.f32 %v7425_v57, %v7424_v49  ;;  %v5915_v20 = vadd.f32 %v5873_v34, %v10697_v53 }
 0x460   : > { %v7427_v7 = vpop.f32.mrf.mxu1  ;;  %p8208_p3 = pnand %p8207_p10, %p8201_p12 }
 0x461   : > { %v6081_v37 = vmax.f32 %v6049_v31, 0.0  ;;  %v5954_v21 = vadd.f32 %v10352_v17, %v5915_v20  ;;  %v5876_v42 = vadd.f32 %v7426_v30, %v5875_v6 }
 0x462   : > { %v7428_v52 = vpop.f32.mrf.mxu1 }
 0x463   : > { %6113 = vst [vmem:[%s10387_s7 + $0xd8] sm:$0xff] %v6081_v37  ;;  %v7429_v43 = vadd.f32 %v7428_v52, %v7427_v7  ;;  %v6050_v19 = vadd.f32 %v6620_v54, %v5954_v21  ;;  %v5916_v3 = vadd.f32 %v5876_v42, %v10698_v56 }
 0x464   : > { %v7430_v29 = vpop.f32.mrf.mxu1 }
 0x465   : > { %v5881_v59 = vadd.f32 %v7743_v11, %v7429_v43  ;;  %v6082_v4 = vmax.f32 %v6050_v19, 0.0  ;;  %v5955_v35 = vadd.f32 %v10352_v17, %v5916_v3 }
 0x466   : > { %v7431_v47 = vpop.f32.mrf.mxu1 }
 0x467   : > { %v5917_v62 = vadd.f32 %v5881_v59, %v10699_v2  ;;  %6114 = vst [vmem:[%s10387_s7 + $0xe0] sm:$0xff] %v6082_v4  ;;  %v7432_v27 = vadd.f32 %v7431_v47, %v7430_v29  ;;  %v6051_v33 = vadd.f32 %v6621_v8, %v5955_v35 }
 0x469   : > { %v5956_v36 = vadd.f32 %v10352_v17, %v5917_v62  ;;  %v5884_v23 = vadd.f32 %v7744_v48, %v7432_v27  ;;  %v6083_v12 = vmax.f32 %v6051_v33, 0.0 }
 0x46b   : > { %v6052_v50 = vadd.f32 %v6624_v5, %v5956_v36  ;;  %v5918_v11 = vadd.f32 %v5884_v23, %v10359_v60  ;;  %6115 = vst [vmem:[%s10387_s7 + $0xe8] sm:$0xff] %v6083_v12 }
 0x46d   : > { %v6084_v40 = vmax.f32 %v6052_v50, 0.0  ;;  %v5957_v41 = vadd.f32 %v10352_v17, %v5918_v11 }
 0x46f   : > { %6116 = vst [vmem:[%s10387_s7 + $0xf0] sm:$0xff] %v6084_v40  ;;  %v6053_v26 = vadd.f32 %v6625_v45, %v5957_v41 }
 0x471   : > { %v6085_v60 = vmax.f32 %v6053_v26, 0.0 }
 0x473   : > { %6117 = vst [vmem:[%s10387_s7 + $0xf8] sm:$0xff] %v6085_v60 }
 0x474   : > { %8211 = shalt.err (!%p8208_p3)
}
 0x475   : > { %s8212_s9 = scalar_lea.hbm %s10540_s8, 4096  ;;  %s8216_s13 = scalar_lea.hbm %s10591_s5, 8192 }
 0x476   : > { %p8213_p11 = scmp.ne.s32.totalorder %s10540_s8, %s8212_s9  ;;  %p8217_p4 = scmp.lt.s32.totalorder %s10540_s8, %s10591_s5 }
 0x477   : > { %p8218_p6 = scmp.lt.s32.totalorder %s8216_s13, %s8212_s9 }
 0x478   : > { %p8214_p9 = pnand %p8213_p11, %p10700_p2 }
 0x479   : > { %p8219_p8 = por %p8218_p6, %p8217_p4 }
 0x47a   : > { %p8215_p1 = pneg %p8214_p9 }
 0x47c   : > { %p8220_p5 = pnand %p8219_p8, %p8215_p1 }
 0x47e   : > { %8223 = shalt.err (!%p8220_p5)
}
 0x47f   : > { %s8275_s28 = smov 128   ;;  %s8276_s17 = smov 8  }
 0x480   : > { %7755 = dma.vmem_to_hbm [thread:$0]  (%p10700_p2), %s10542_s11, 4096, %s10540_s8, %s6119_s29, %s8275_s28, %s8275_s28, %s8276_s17  }
 0x481 PF: > { %s6147_s16 = sand.u32 1, %s8254_s18   ;;  %p10701_p7 = scmp.ne.s32.totalorder %s10605_s25, 0 }
 0x482   : > { %p10702_p12 = scmp.ge.s32.totalorder %s8266_s21, 2  ;;  %s6148_s6 = scalar_lea.sflag [#allocation6], %s6147_s16 }
 0x484   : > { %p7769_p13 = pnand %p10702_p12, %p10701_p7 }
 0x486   : > { %p7770_p0 = pneg %p7769_p13 }
 0x488   : > { %8249 = dma.done.wait (%p7770_p0), %s6148_s6, 4096  }
 0x489   : > { %8251 = vsyncadd (%p7770_p0), %s6148_s6, 4294963200  ;;  %p19_p10 = scmp.ge.s32.totalorder %s8385_s15, 4   ;;  %s10703_s18 = smov %s8258_s19 }
 0x48a   : > { %s10704_s19 = smov %s8262_s20  ;;  %s10705_s20 = smov %s8401_s27 }
 0x48b   : > { %s10706_s21 = smov %s8385_s15  ;;  %21 = sbr.rel (!%p19_p10) target bundleno = 6 (0x6), region = 101 }
 0x490   :  { %6153 = vsyncpa [#allocation5], 1 }
 0x491   :  { %6155 = vsyncpa [#allocation5 + $0x1], 1 }
 0x492   :  { %6156 = vsyncpa [#allocation8], 1 }
 0x493   :  { %6157 = vsyncpa [#allocation6], 1 }
 0x494   :  { %6159 = vsyncpa [#allocation6 + $0x1], 1 }

</bundles_post_ra>
